<compile_context>
chip_gen: v7x
topology: tpu7x:2x2x1
jax: 0.10.0
libtpu: 0.0.40
codegen_flags: <defaults>
</compile_context>

<pallas_src>
import functools

import jax
import jax.numpy as jnp
from jax import lax
from jax.experimental import pallas as pl
from jax.experimental.pallas import tpu as pltpu

_EPS = 1e-5
_VMEM_LIMIT = 32 * 1024 * 1024   # explicit scoped-VMEM limit, safe on v5e/v6e/v7x


# ---------------------------------------------------------------------------
# Kernels
# ---------------------------------------------------------------------------
def _stage1_kernel(xp_ref, wf1_ref, y1_ref, st1_ref, *, K, stride, H1, W1, C_in):
    """ReLU -> fused dwConv1+1x1 (per-tap bf16 MXU matmuls). One batch sample."""
    x = jnp.maximum(xp_ref[...], 0.0)          # ReLU (exact on the zero halo)
    acc = None
    for kh in range(K):
        for kw in range(K):
            # TODO(synk): for stride > 1 a wrapper-side space-to-batch would avoid
            # strided sublane slices; the test config uses stride=1.
            patch = x[kh: kh + stride * (H1 - 1) + 1: stride,
                      kw: kw + stride * (W1 - 1) + 1: stride, :]
            p2 = patch.reshape(H1 * W1, C_in).astype(jnp.bfloat16)
            part = jnp.dot(p2, wf1_ref[kh * K + kw],
                           preferred_element_type=jnp.float32)
            acc = part if acc is None else acc + part
    y1_ref[...] = acc                                           # pre-BN activations
    st1_ref[0:1, :] = jnp.sum(acc, axis=0, keepdims=True)       # BN partial: sum
    st1_ref[1:2, :] = jnp.sum(acc * acc, axis=0, keepdims=True)  # BN partial: sumsq


def _stage2_kernel(y1_ref, sc1_ref, sh1_ref, wf2_ref, y2_ref, st2_ref,
                   *, K, pad, H1, W1, H2, W2, C_in):
    """BN1 (folded scale/shift) -> ReLU -> fused dwConv2+1x1. One batch sample."""
    a = jnp.maximum(y1_ref[...] * sc1_ref[...] + sh1_ref[...], 0.0)  # (H1*W1, C_in)
    a = a.reshape(H1, W1, C_in)
    if pad > 0:
        # Zero halo built as a value (no scratch round trip, only the ring is zeroed).
        zr = jnp.zeros((pad, W1, C_in), jnp.float32)
        a = jnp.concatenate([zr, a, zr], axis=0)
        zc = jnp.zeros((H1 + 2 * pad, pad, C_in), jnp.float32)
        a = jnp.concatenate([zc, a, zc], axis=1)
    acc = None
    for kh in range(K):
        for kw in range(K):
            p2 = a[kh: kh + H2, kw: kw + W2, :].reshape(H2 * W2, C_in)
            p2 = p2.astype(jnp.bfloat16)
            part = jnp.dot(p2, wf2_ref[kh * K + kw],
                           preferred_element_type=jnp.float32)
            acc = part if acc is None else acc + part
    y2_ref[...] = acc
    st2_ref[0:1, :] = jnp.sum(acc, axis=0, keepdims=True)
    st2_ref[1:2, :] = jnp.sum(acc * acc, axis=0, keepdims=True)


def _bn_affine_kernel(y_ref, sc_ref, sh_ref, o_ref):
    """Final BN2 normalization on a lane-dense (rows, W2*C_out) view."""
    o_ref[...] = y_ref[...] * sc_ref[...] + sh_ref[...]


# ---------------------------------------------------------------------------
# Wrapper
# ---------------------------------------------------------------------------
def sepconv_forward(x_nchw, kernel_params, *, kernel_size, stride, padding):
    """x_nchw: (N, C_in, H, W) float32, PyTorch NCHW convention."""
    wf1, wf2, g1, b1, g2, b2 = kernel_params
    N, C_in, H, W = x_nchw.shape
    C_out = wf2.shape[-1]
    K, s, p = kernel_size, stride, padding
    H1 = (H + 2 * p - K) // s + 1
    W1 = (W + 2 * p - K) // s + 1
    H2 = H1 + 2 * p - K + 1
    W2 = W1 + 2 * p - K + 1
    Hp, Wp = H + 2 * p, W + 2 * p

    cparams = pltpu.CompilerParams(
        dimension_semantics=("parallel",),          # shard batch across cores (v7x)
        vmem_limit_bytes=_VMEM_LIMIT)

    # glue: NCHW -> NHWC (channels on lanes) + zero halo for depthwise conv #1
    x_nhwc = jnp.transpose(x_nchw, (0, 2, 3, 1)).astype(jnp.float32)
    xp = jnp.pad(x_nhwc, ((0, 0), (p, p), (p, p), (0, 0)))

    # ---- stage 1: ReLU -> fused dw1.pw1 ; emits pre-BN y1 + per-sample BN partials
    k1 = functools.partial(_stage1_kernel, K=K, stride=s, H1=H1, W1=W1, C_in=C_in)
    y1, st1 = pl.pallas_call(
        k1,
        grid=(N,),
        in_specs=[
            pl.BlockSpec((None, Hp, Wp, C_in), lambda i: (i, 0, 0, 0)),
            pl.BlockSpec((K * K, C_in, C_in), lambda i: (0, 0, 0)),
        ],
        out_specs=(
            pl.BlockSpec((None, H1 * W1, C_in), lambda i: (i, 0, 0)),
            pl.BlockSpec((None, 2, C_in), lambda i: (i, 0, 0)),
        ),
        out_shape=(
            jax.ShapeDtypeStruct((N, H1 * W1, C_in), jnp.float32),
            jax.ShapeDtypeStruct((N, 2, C_in), jnp.float32),
        ),
        compiler_params=cparams,
    )(xp, wf1)

    # Fold BN1 (training-mode stats over N,H1,W1; biased variance) into scale/shift.
    cnt1 = N * H1 * W1
    tot1 = jnp.sum(st1, axis=0)                     # (2, C_in)
    mu1 = tot1[0] / cnt1
    var1 = tot1[1] / cnt1 - mu1 * mu1
    sc1 = g1 * lax.rsqrt(var1 + _EPS)
    sh1 = b1 - mu1 * sc1

    # ---- stage 2: BN1 + ReLU -> fused dw2.pw2 ; emits pre-BN y2 + BN partials
    k2 = functools.partial(_stage2_kernel, K=K, pad=p, H1=H1, W1=W1,
                           H2=H2, W2=W2, C_in=C_in)
    y2, st2 = pl.pallas_call(
        k2,
        grid=(N,),
        in_specs=[
            pl.BlockSpec((None, H1 * W1, C_in), lambda i: (i, 0, 0)),
            pl.BlockSpec((1, C_in), lambda i: (0, 0)),
            pl.BlockSpec((1, C_in), lambda i: (0, 0)),
            pl.BlockSpec((K * K, C_in, C_out), lambda i: (0, 0, 0)),
        ],
        out_specs=(
            pl.BlockSpec((None, H2 * W2, C_out), lambda i: (i, 0, 0)),
            pl.BlockSpec((None, 2, C_out), lambda i: (i, 0, 0)),
        ),
        out_shape=(
            jax.ShapeDtypeStruct((N, H2 * W2, C_out), jnp.float32),
            jax.ShapeDtypeStruct((N, 2, C_out), jnp.float32),
        ),
        compiler_params=cparams,
    )(y1, sc1.reshape(1, C_in), sh1.reshape(1, C_in), wf2)

    cnt2 = N * H2 * W2
    tot2 = jnp.sum(st2, axis=0)                     # (2, C_out)
    mu2 = tot2[0] / cnt2
    var2 = tot2[1] / cnt2 - mu2 * mu2
    sc2 = g2 * lax.rsqrt(var2 + _EPS)
    sh2 = b2 - mu2 * sc2

    # ---- stage 3: BN2 affine on a lane-dense (N*H2, W2*C_out) view
    rows = N * H2
    lane = W2 * C_out
    y2f = y2.reshape(rows, lane)                    # contiguous (free) reshape
    sc2_row = jnp.tile(sc2, W2).reshape(1, lane)
    sh2_row = jnp.tile(sh2, W2).reshape(1, lane)
    TR = max(8, (min(rows, 512) // 8) * 8)
    out_flat = pl.pallas_call(
        _bn_affine_kernel,
        grid=(pl.cdiv(rows, TR),),
        in_specs=[
            pl.BlockSpec((TR, lane), lambda i: (i, 0)),
            pl.BlockSpec((1, lane), lambda i: (0, 0)),
            pl.BlockSpec((1, lane), lambda i: (0, 0)),
        ],
        out_specs=pl.BlockSpec((TR, lane), lambda i: (i, 0)),
        out_shape=jax.ShapeDtypeStruct((rows, lane), jnp.float32),
        compiler_params=cparams,
    )(y2f, sc2_row, sh2_row)

    out_nhwc = out_flat.reshape(N, H2, W2, C_out)
    return jnp.transpose(out_nhwc, (0, 3, 1, 2))    # back to NCHW


# ---------------------------------------------------------------------------
# Parameters & reference
# ---------------------------------------------------------------------------
def init_params(key, C_in, C_out, K):
    """Deterministic synthetic weights: PyTorch layouts + fused kernel layouts."""
    k1, k2, k3, k4 = jax.random.split(key, 4)
    dw1_t = jax.random.normal(k1, (C_in, 1, K, K), jnp.float32) * 0.2   # depthwise
    pw1_t = jax.random.normal(k2, (C_in, C_in, 1, 1), jnp.float32) * 0.2
    dw2_t = jax.random.normal(k3, (C_in, 1, K, K), jnp.float32) * 0.2
    pw2_t = jax.random.normal(k4, (C_out, C_in, 1, 1), jnp.float32) * 0.2
    # BatchNorm affine params: PyTorch default init (gamma=1, beta=0)
    g1 = jnp.ones((C_in,), jnp.float32)
    b1 = jnp.zeros((C_in,), jnp.float32)
    g2 = jnp.ones((C_out,), jnp.float32)
    b2 = jnp.zeros((C_out,), jnp.float32)

    # Fused per-tap weights: Wf[t, ci, co] = dw[ci, kh, kw] * pw[co, ci], t = kh*K+kw
    dw1_k = jnp.transpose(dw1_t[:, 0], (1, 2, 0)).reshape(K * K, C_in)   # (t, ci)
    pw1_k = jnp.transpose(pw1_t[:, :, 0, 0], (1, 0))                     # (ci, co)
    wf1 = (dw1_k[:, :, None] * pw1_k[None, :, :]).astype(jnp.bfloat16)
    dw2_k = jnp.transpose(dw2_t[:, 0], (1, 2, 0)).reshape(K * K, C_in)
    pw2_k = jnp.transpose(pw2_t[:, :, 0, 0], (1, 0))
    wf2 = (dw2_k[:, :, None] * pw2_k[None, :, :]).astype(jnp.bfloat16)

    torch_params = (dw1_t, pw1_t, g1, b1, dw2_t, pw2_t, g2, b2)
    kernel_params = (wf1, wf2, g1, b1, g2, b2)
    return torch_params, kernel_params


def sepconv_reference(x_nchw, torch_params, *, stride, padding):
    """Pure-JAX reference matching the PyTorch forward (training-mode BN)."""
    dw1_t, pw1_t, g1, b1, dw2_t, pw2_t, g2, b2 = torch_params
    C_in = dw1_t.shape[0]
    dn = ('NCHW', 'OIHW', 'NCHW')

    def bn(y, g, b):
        mu = jnp.mean(y, axis=(0, 2, 3), keepdims=True)
        var = jnp.mean((y - mu) ** 2, axis=(0, 2, 3), keepdims=True)
        return ((y - mu) / jnp.sqrt(var + _EPS)
                * g.reshape(1, -1, 1, 1) + b.reshape(1, -1, 1, 1))

    y = jnp.maximum(x_nchw, 0.0)
    y = lax.conv_general_dilated(y, dw1_t, (stride, stride),
                                 [(padding, padding)] * 2, dimension_numbers=dn,
                                 feature_group_count=C_in,
                                 precision=lax.Precision.HIGHEST)
    y = lax.conv_general_dilated(y, pw1_t, (1, 1), [(0, 0)] * 2,
                                 dimension_numbers=dn,
                                 precision=lax.Precision.HIGHEST)
    y = bn(y, g1, b1)
    y = jnp.maximum(y, 0.0)
    y = lax.conv_general_dilated(y, dw2_t, (1, 1),
                                 [(padding, padding)] * 2, dimension_numbers=dn,
                                 feature_group_count=C_in,
                                 precision=lax.Precision.HIGHEST)
    y = lax.conv_general_dilated(y, pw2_t, (1, 1), [(0, 0)] * 2,
                                 dimension_numbers=dn,
                                 precision=lax.Precision.HIGHEST)
    y = bn(y, g2, b2)
    return y


if __name__ == "__main__":
    N, C_in, C_out, H, W = 2, 4, 8, 16, 16
    K, stride, padding = 3, 1, 1

    key = jax.random.PRNGKey(0)
    kx, kp = jax.random.split(key)
    x = jax.random.normal(kx, (N, C_in, H, W), jnp.float32)
    torch_params, kernel_params = init_params(kp, C_in, C_out, K)

    fwd = jax.jit(functools.partial(sepconv_forward, kernel_size=K,
                                    stride=stride, padding=padding))
    out = jax.block_until_ready(fwd(x, kernel_params))

    ref = sepconv_reference(x, torch_params, stride=stride, padding=padding)
    assert out.shape == ref.shape, (out.shape, ref.shape)
    err = jnp.abs(out - ref)
    max_err = float(jnp.max(err))
    mean_err = float(jnp.mean(err))
    # Kernel uses the native-bf16 MXU path (per perf review) vs an f32 HIGHEST
    # reference, so tolerances are wider than the original 1e-3.
    if not (max_err < 5e-2 and mean_err < 1e-2):
        raise AssertionError(
            f"mismatch vs reference: max abs err={max_err}, mean abs err={mean_err}")

    print("KERNEL_OK")
</pallas_src>

<mosaic_0001>
module attributes {stable_mosaic.version = 11 : i64} {
  func.func @_stage1_kernel(%arg0: i32, %arg1: memref<1x18x18x4xf32, #tpu.memory_space<vmem>>, %arg2: memref<9x4x4xbf16, #tpu.memory_space<vmem>>, %arg3: memref<1x256x4xf32, #tpu.memory_space<vmem>>, %arg4: memref<1x2x4xf32, #tpu.memory_space<vmem>>) attributes {dimension_semantics = [#tpu.dimension_semantics<parallel>], iteration_bounds = array<i64: 2>, scalar_prefetch = 0 : i64, scratch_operands = 0 : i64, tpu.core_type = #tpu.core_type<tc>, window_params = [{transform_indices = @transform_0, window_bounds = array<i64: 1, 18, 18, 4>}, {pipeline_mode = #tpu.pipeline_mode<synchronous>, transform_indices = @transform_1, window_bounds = array<i64: 9, 4, 4>}, {transform_indices = @transform_2, window_bounds = array<i64: 1, 256, 4>}, {transform_indices = @transform_3, window_bounds = array<i64: 1, 2, 4>}]} {
    %c0 = arith.constant 0 : index
    %c0_0 = arith.constant 0 : index
    %c0_1 = arith.constant 0 : index
    %c0_2 = arith.constant 0 : index
    %0 = vector.load %arg1[%c0, %c0_0, %c0_1, %c0_2] : memref<1x18x18x4xf32, #tpu.memory_space<vmem>>, vector<1x18x18x4xf32>
    %1 = vector.shape_cast %0 : vector<1x18x18x4xf32> to vector<18x18x4xf32>
    %cst = arith.constant 0.000000e+00 : f32
    %2 = vector.broadcast %cst : f32 to vector<18x18x4xf32>
    %3 = arith.maximumf %1, %2 : vector<18x18x4xf32>
    %4 = vector.extract_strided_slice %3 {offsets = [0, 0, 0], sizes = [16, 16, 4], strides = [1, 1, 1]} : vector<18x18x4xf32> to vector<16x16x4xf32>
    %5 = vector.shape_cast %4 : vector<16x16x4xf32> to vector<256x4xf32>
    %6 = arith.truncf %5 : vector<256x4xf32> to vector<256x4xbf16>
    %c0_3 = arith.constant 0 : index
    %c0_4 = arith.constant 0 : index
    %c0_5 = arith.constant 0 : index
    %7 = vector.load %arg2[%c0_3, %c0_4, %c0_5] : memref<9x4x4xbf16, #tpu.memory_space<vmem>>, vector<1x4x4xbf16>
    %8 = vector.shape_cast %7 : vector<1x4x4xbf16> to vector<4x4xbf16>
    %cst_6 = arith.constant dense<0.000000e+00> : vector<256x4xf32>
    %9 = tpu.matmul %6, %8, %cst_6 {dimension_numbers = #tpu.dot_dimension_numbers<[1], [0], [0], [1], [0, 0, 1, 1], [], []>} : vector<256x4xbf16>, vector<4x4xbf16>, vector<256x4xf32> -> vector<256x4xf32>
    %10 = vector.extract_strided_slice %3 {offsets = [0, 1, 0], sizes = [16, 16, 4], strides = [1, 1, 1]} : vector<18x18x4xf32> to vector<16x16x4xf32>
    %11 = vector.shape_cast %10 : vector<16x16x4xf32> to vector<256x4xf32>
    %12 = arith.truncf %11 : vector<256x4xf32> to vector<256x4xbf16>
    %c1 = arith.constant 1 : index
    %c0_7 = arith.constant 0 : index
    %c0_8 = arith.constant 0 : index
    %13 = vector.load %arg2[%c1, %c0_7, %c0_8] : memref<9x4x4xbf16, #tpu.memory_space<vmem>>, vector<1x4x4xbf16>
    %14 = vector.shape_cast %13 : vector<1x4x4xbf16> to vector<4x4xbf16>
    %cst_9 = arith.constant dense<0.000000e+00> : vector<256x4xf32>
    %15 = tpu.matmul %12, %14, %cst_9 {dimension_numbers = #tpu.dot_dimension_numbers<[1], [0], [0], [1], [0, 0, 1, 1], [], []>} : vector<256x4xbf16>, vector<4x4xbf16>, vector<256x4xf32> -> vector<256x4xf32>
    %16 = arith.addf %9, %15 : vector<256x4xf32>
    %17 = vector.extract_strided_slice %3 {offsets = [0, 2, 0], sizes = [16, 16, 4], strides = [1, 1, 1]} : vector<18x18x4xf32> to vector<16x16x4xf32>
    %18 = vector.shape_cast %17 : vector<16x16x4xf32> to vector<256x4xf32>
    %19 = arith.truncf %18 : vector<256x4xf32> to vector<256x4xbf16>
    %c2 = arith.constant 2 : index
    %c0_10 = arith.constant 0 : index
    %c0_11 = arith.constant 0 : index
    %20 = vector.load %arg2[%c2, %c0_10, %c0_11] : memref<9x4x4xbf16, #tpu.memory_space<vmem>>, vector<1x4x4xbf16>
    %21 = vector.shape_cast %20 : vector<1x4x4xbf16> to vector<4x4xbf16>
    %cst_12 = arith.constant dense<0.000000e+00> : vector<256x4xf32>
    %22 = tpu.matmul %19, %21, %cst_12 {dimension_numbers = #tpu.dot_dimension_numbers<[1], [0], [0], [1], [0, 0, 1, 1], [], []>} : vector<256x4xbf16>, vector<4x4xbf16>, vector<256x4xf32> -> vector<256x4xf32>
    %23 = arith.addf %16, %22 : vector<256x4xf32>
    %24 = vector.extract_strided_slice %3 {offsets = [1, 0, 0], sizes = [16, 16, 4], strides = [1, 1, 1]} : vector<18x18x4xf32> to vector<16x16x4xf32>
    %25 = vector.shape_cast %24 : vector<16x16x4xf32> to vector<256x4xf32>
    %26 = arith.truncf %25 : vector<256x4xf32> to vector<256x4xbf16>
    %c3 = arith.constant 3 : index
    %c0_13 = arith.constant 0 : index
    %c0_14 = arith.constant 0 : index
    %27 = vector.load %arg2[%c3, %c0_13, %c0_14] : memref<9x4x4xbf16, #tpu.memory_space<vmem>>, vector<1x4x4xbf16>
    %28 = vector.shape_cast %27 : vector<1x4x4xbf16> to vector<4x4xbf16>
    %cst_15 = arith.constant dense<0.000000e+00> : vector<256x4xf32>
    %29 = tpu.matmul %26, %28, %cst_15 {dimension_numbers = #tpu.dot_dimension_numbers<[1], [0], [0], [1], [0, 0, 1, 1], [], []>} : vector<256x4xbf16>, vector<4x4xbf16>, vector<256x4xf32> -> vector<256x4xf32>
    %30 = arith.addf %23, %29 : vector<256x4xf32>
    %31 = vector.extract_strided_slice %3 {offsets = [1, 1, 0], sizes = [16, 16, 4], strides = [1, 1, 1]} : vector<18x18x4xf32> to vector<16x16x4xf32>
    %32 = vector.shape_cast %31 : vector<16x16x4xf32> to vector<256x4xf32>
    %33 = arith.truncf %32 : vector<256x4xf32> to vector<256x4xbf16>
    %c4 = arith.constant 4 : index
    %c0_16 = arith.constant 0 : index
    %c0_17 = arith.constant 0 : index
    %34 = vector.load %arg2[%c4, %c0_16, %c0_17] : memref<9x4x4xbf16, #tpu.memory_space<vmem>>, vector<1x4x4xbf16>
    %35 = vector.shape_cast %34 : vector<1x4x4xbf16> to vector<4x4xbf16>
    %cst_18 = arith.constant dense<0.000000e+00> : vector<256x4xf32>
    %36 = tpu.matmul %33, %35, %cst_18 {dimension_numbers = #tpu.dot_dimension_numbers<[1], [0], [0], [1], [0, 0, 1, 1], [], []>} : vector<256x4xbf16>, vector<4x4xbf16>, vector<256x4xf32> -> vector<256x4xf32>
    %37 = arith.addf %30, %36 : vector<256x4xf32>
    %38 = vector.extract_strided_slice %3 {offsets = [1, 2, 0], sizes = [16, 16, 4], strides = [1, 1, 1]} : vector<18x18x4xf32> to vector<16x16x4xf32>
    %39 = vector.shape_cast %38 : vector<16x16x4xf32> to vector<256x4xf32>
    %40 = arith.truncf %39 : vector<256x4xf32> to vector<256x4xbf16>
    %c5 = arith.constant 5 : index
    %c0_19 = arith.constant 0 : index
    %c0_20 = arith.constant 0 : index
    %41 = vector.load %arg2[%c5, %c0_19, %c0_20] : memref<9x4x4xbf16, #tpu.memory_space<vmem>>, vector<1x4x4xbf16>
    %42 = vector.shape_cast %41 : vector<1x4x4xbf16> to vector<4x4xbf16>
    %cst_21 = arith.constant dense<0.000000e+00> : vector<256x4xf32>
    %43 = tpu.matmul %40, %42, %cst_21 {dimension_numbers = #tpu.dot_dimension_numbers<[1], [0], [0], [1], [0, 0, 1, 1], [], []>} : vector<256x4xbf16>, vector<4x4xbf16>, vector<256x4xf32> -> vector<256x4xf32>
    %44 = arith.addf %37, %43 : vector<256x4xf32>
    %45 = vector.extract_strided_slice %3 {offsets = [2, 0, 0], sizes = [16, 16, 4], strides = [1, 1, 1]} : vector<18x18x4xf32> to vector<16x16x4xf32>
    %46 = vector.shape_cast %45 : vector<16x16x4xf32> to vector<256x4xf32>
    %47 = arith.truncf %46 : vector<256x4xf32> to vector<256x4xbf16>
    %c6 = arith.constant 6 : index
    %c0_22 = arith.constant 0 : index
    %c0_23 = arith.constant 0 : index
    %48 = vector.load %arg2[%c6, %c0_22, %c0_23] : memref<9x4x4xbf16, #tpu.memory_space<vmem>>, vector<1x4x4xbf16>
    %49 = vector.shape_cast %48 : vector<1x4x4xbf16> to vector<4x4xbf16>
    %cst_24 = arith.constant dense<0.000000e+00> : vector<256x4xf32>
    %50 = tpu.matmul %47, %49, %cst_24 {dimension_numbers = #tpu.dot_dimension_numbers<[1], [0], [0], [1], [0, 0, 1, 1], [], []>} : vector<256x4xbf16>, vector<4x4xbf16>, vector<256x4xf32> -> vector<256x4xf32>
    %51 = arith.addf %44, %50 : vector<256x4xf32>
    %52 = vector.extract_strided_slice %3 {offsets = [2, 1, 0], sizes = [16, 16, 4], strides = [1, 1, 1]} : vector<18x18x4xf32> to vector<16x16x4xf32>
    %53 = vector.shape_cast %52 : vector<16x16x4xf32> to vector<256x4xf32>
    %54 = arith.truncf %53 : vector<256x4xf32> to vector<256x4xbf16>
    %c7 = arith.constant 7 : index
    %c0_25 = arith.constant 0 : index
    %c0_26 = arith.constant 0 : index
    %55 = vector.load %arg2[%c7, %c0_25, %c0_26] : memref<9x4x4xbf16, #tpu.memory_space<vmem>>, vector<1x4x4xbf16>
    %56 = vector.shape_cast %55 : vector<1x4x4xbf16> to vector<4x4xbf16>
    %cst_27 = arith.constant dense<0.000000e+00> : vector<256x4xf32>
    %57 = tpu.matmul %54, %56, %cst_27 {dimension_numbers = #tpu.dot_dimension_numbers<[1], [0], [0], [1], [0, 0, 1, 1], [], []>} : vector<256x4xbf16>, vector<4x4xbf16>, vector<256x4xf32> -> vector<256x4xf32>
    %58 = arith.addf %51, %57 : vector<256x4xf32>
    %59 = vector.extract_strided_slice %3 {offsets = [2, 2, 0], sizes = [16, 16, 4], strides = [1, 1, 1]} : vector<18x18x4xf32> to vector<16x16x4xf32>
    %60 = vector.shape_cast %59 : vector<16x16x4xf32> to vector<256x4xf32>
    %61 = arith.truncf %60 : vector<256x4xf32> to vector<256x4xbf16>
    %c8 = arith.constant 8 : index
    %c0_28 = arith.constant 0 : index
    %c0_29 = arith.constant 0 : index
    %62 = vector.load %arg2[%c8, %c0_28, %c0_29] : memref<9x4x4xbf16, #tpu.memory_space<vmem>>, vector<1x4x4xbf16>
    %63 = vector.shape_cast %62 : vector<1x4x4xbf16> to vector<4x4xbf16>
    %cst_30 = arith.constant dense<0.000000e+00> : vector<256x4xf32>
    %64 = tpu.matmul %61, %63, %cst_30 {dimension_numbers = #tpu.dot_dimension_numbers<[1], [0], [0], [1], [0, 0, 1, 1], [], []>} : vector<256x4xbf16>, vector<4x4xbf16>, vector<256x4xf32> -> vector<256x4xf32>
    %65 = arith.addf %58, %64 : vector<256x4xf32>
    %c0_31 = arith.constant 0 : index
    %c0_32 = arith.constant 0 : index
    %c0_33 = arith.constant 0 : index
    %66 = vector.load %arg3[%c0_31, %c0_32, %c0_33] : memref<1x256x4xf32, #tpu.memory_space<vmem>>, vector<1x256x4xf32>
    %67 = vector.shape_cast %66 : vector<1x256x4xf32> to vector<256x4xf32>
    %68 = vector.shape_cast %65 : vector<256x4xf32> to vector<1x256x4xf32>
    tpu.vector_store %arg3[%c0_31, %c0_32, %c0_33], %68 {strides = array<i32>} : memref<1x256x4xf32, #tpu.memory_space<vmem>>, vector<1x256x4xf32>,
    %cst_34 = arith.constant dense<0.000000e+00> : vector<4xf32>
    %69 = vector.multi_reduction <add>, %65, %cst_34 [0] : vector<256x4xf32> to vector<4xf32>
    %70 = vector.shape_cast %69 : vector<4xf32> to vector<1x4xf32>
    %c0_35 = arith.constant 0 : index
    %c0_36 = arith.constant 0 : index
    %c0_37 = arith.constant 0 : index
    %71 = vector.load %arg4[%c0_35, %c0_36, %c0_37] : memref<1x2x4xf32, #tpu.memory_space<vmem>>, vector<1x1x4xf32>
    %72 = vector.shape_cast %71 : vector<1x1x4xf32> to vector<1x4xf32>
    %73 = vector.shape_cast %70 : vector<1x4xf32> to vector<1x1x4xf32>
    tpu.vector_store %arg4[%c0_35, %c0_36, %c0_37], %73 {strides = array<i32>} : memref<1x2x4xf32, #tpu.memory_space<vmem>>, vector<1x1x4xf32>,
    %74 = arith.mulf %65, %65 : vector<256x4xf32>
    %cst_38 = arith.constant dense<0.000000e+00> : vector<4xf32>
    %75 = vector.multi_reduction <add>, %74, %cst_38 [0] : vector<256x4xf32> to vector<4xf32>
    %76 = vector.shape_cast %75 : vector<4xf32> to vector<1x4xf32>
    %c0_39 = arith.constant 0 : index
    %c1_40 = arith.constant 1 : index
    %c0_41 = arith.constant 0 : index
    %77 = vector.load %arg4[%c0_39, %c1_40, %c0_41] : memref<1x2x4xf32, #tpu.memory_space<vmem>>, vector<1x1x4xf32>
    %78 = vector.shape_cast %77 : vector<1x1x4xf32> to vector<1x4xf32>
    %79 = vector.shape_cast %76 : vector<1x4xf32> to vector<1x1x4xf32>
    tpu.vector_store %arg4[%c0_39, %c1_40, %c0_41], %79 {strides = array<i32>} : memref<1x2x4xf32, #tpu.memory_space<vmem>>, vector<1x1x4xf32>,
    return
  }
  func.func @transform_0(%arg0: i32) -> (i32, i32, i32, i32) {
    %c0_i32 = arith.constant 0 : i32
    %c0_i32_0 = arith.constant 0 : i32
    %c0_i32_1 = arith.constant 0 : i32
    %c0_i32_2 = arith.constant 0 : i32
    return %arg0, %c0_i32, %c0_i32_0, %c0_i32_1 : i32, i32, i32, i32
  }
  func.func @transform_1(%arg0: i32) -> (i32, i32, i32) {
    %c0_i32 = arith.constant 0 : i32
    %c0_i32_0 = arith.constant 0 : i32
    %c0_i32_1 = arith.constant 0 : i32
    %c0_i32_2 = arith.constant 0 : i32
    return %c0_i32, %c0_i32_0, %c0_i32_1 : i32, i32, i32
  }
  func.func @transform_2(%arg0: i32) -> (i32, i32, i32) {
    %c0_i32 = arith.constant 0 : i32
    %c0_i32_0 = arith.constant 0 : i32
    %c0_i32_1 = arith.constant 0 : i32
    return %arg0, %c0_i32, %c0_i32_0 : i32, i32, i32
  }
  func.func @transform_3(%arg0: i32) -> (i32, i32, i32) {
    %c0_i32 = arith.constant 0 : i32
    %c0_i32_0 = arith.constant 0 : i32
    %c0_i32_1 = arith.constant 0 : i32
    return %arg0, %c0_i32, %c0_i32_0 : i32, i32, i32
  }
}

module attributes {stable_mosaic.version = 11 : i64} {
  func.func @_stage2_kernel(%arg0: i32, %arg1: memref<1x256x4xf32, #tpu.memory_space<vmem>>, %arg2: memref<1x4xf32, #tpu.memory_space<vmem>>, %arg3: memref<1x4xf32, #tpu.memory_space<vmem>>, %arg4: memref<9x4x8xbf16, #tpu.memory_space<vmem>>, %arg5: memref<1x256x8xf32, #tpu.memory_space<vmem>>, %arg6: memref<1x2x8xf32, #tpu.memory_space<vmem>>) attributes {dimension_semantics = [#tpu.dimension_semantics<parallel>], iteration_bounds = array<i64: 2>, scalar_prefetch = 0 : i64, scratch_operands = 0 : i64, tpu.core_type = #tpu.core_type<tc>, window_params = [{transform_indices = @transform_0, window_bounds = array<i64: 1, 256, 4>}, {pipeline_mode = #tpu.pipeline_mode<synchronous>, transform_indices = @transform_1, window_bounds = array<i64: 1, 4>}, {pipeline_mode = #tpu.pipeline_mode<synchronous>, transform_indices = @transform_2, window_bounds = array<i64: 1, 4>}, {pipeline_mode = #tpu.pipeline_mode<synchronous>, transform_indices = @transform_3, window_bounds = array<i64: 9, 4, 8>}, {transform_indices = @transform_4, window_bounds = array<i64: 1, 256, 8>}, {transform_indices = @transform_5, window_bounds = array<i64: 1, 2, 8>}]} {
    %c0 = arith.constant 0 : index
    %c0_0 = arith.constant 0 : index
    %c0_1 = arith.constant 0 : index
    %0 = vector.load %arg1[%c0, %c0_0, %c0_1] : memref<1x256x4xf32, #tpu.memory_space<vmem>>, vector<1x256x4xf32>
    %1 = vector.shape_cast %0 : vector<1x256x4xf32> to vector<256x4xf32>
    %c0_2 = arith.constant 0 : index
    %c0_3 = arith.constant 0 : index
    %2 = vector.load %arg2[%c0_2, %c0_3] : memref<1x4xf32, #tpu.memory_space<vmem>>, vector<1x4xf32>
    %3 = vector.broadcast %2 : vector<1x4xf32> to vector<256x4xf32>
    %4 = arith.mulf %1, %3 : vector<256x4xf32>
    %c0_4 = arith.constant 0 : index
    %c0_5 = arith.constant 0 : index
    %5 = vector.load %arg3[%c0_4, %c0_5] : memref<1x4xf32, #tpu.memory_space<vmem>>, vector<1x4xf32>
    %6 = vector.broadcast %5 : vector<1x4xf32> to vector<256x4xf32>
    %7 = arith.addf %4, %6 : vector<256x4xf32>
    %cst = arith.constant 0.000000e+00 : f32
    %8 = vector.broadcast %cst : f32 to vector<256x4xf32>
    %9 = arith.maximumf %7, %8 : vector<256x4xf32>
    %10 = vector.shape_cast %9 : vector<256x4xf32> to vector<16x16x4xf32>
    %cst_6 = arith.constant 0.000000e+00 : f32
    %11 = vector.broadcast %cst_6 : f32 to vector<1x16x4xf32>
    %12 = tpu.concatenate %11, %10, %11 in 0 : vector<1x16x4xf32>, vector<16x16x4xf32>, vector<1x16x4xf32> -> vector<18x16x4xf32>
    %cst_7 = arith.constant 0.000000e+00 : f32
    %13 = vector.broadcast %cst_7 : f32 to vector<18x1x4xf32>
    %14 = tpu.concatenate %13, %12, %13 in 1 : vector<18x1x4xf32>, vector<18x16x4xf32>, vector<18x1x4xf32> -> vector<18x18x4xf32>
    %15 = vector.extract_strided_slice %14 {offsets = [0, 0, 0], sizes = [16, 16, 4], strides = [1, 1, 1]} : vector<18x18x4xf32> to vector<16x16x4xf32>
    %16 = vector.shape_cast %15 : vector<16x16x4xf32> to vector<256x4xf32>
    %17 = arith.truncf %16 : vector<256x4xf32> to vector<256x4xbf16>
    %c0_8 = arith.constant 0 : index
    %c0_9 = arith.constant 0 : index
    %c0_10 = arith.constant 0 : index
    %18 = vector.load %arg4[%c0_8, %c0_9, %c0_10] : memref<9x4x8xbf16, #tpu.memory_space<vmem>>, vector<1x4x8xbf16>
    %19 = vector.shape_cast %18 : vector<1x4x8xbf16> to vector<4x8xbf16>
    %cst_11 = arith.constant dense<0.000000e+00> : vector<256x8xf32>
    %20 = tpu.matmul %17, %19, %cst_11 {dimension_numbers = #tpu.dot_dimension_numbers<[1], [0], [0], [1], [0, 0, 1, 1], [], []>} : vector<256x4xbf16>, vector<4x8xbf16>, vector<256x8xf32> -> vector<256x8xf32>
    %21 = vector.extract_strided_slice %14 {offsets = [0, 1, 0], sizes = [16, 16, 4], strides = [1, 1, 1]} : vector<18x18x4xf32> to vector<16x16x4xf32>
    %22 = vector.shape_cast %21 : vector<16x16x4xf32> to vector<256x4xf32>
    %23 = arith.truncf %22 : vector<256x4xf32> to vector<256x4xbf16>
    %c1 = arith.constant 1 : index
    %c0_12 = arith.constant 0 : index
    %c0_13 = arith.constant 0 : index
    %24 = vector.load %arg4[%c1, %c0_12, %c0_13] : memref<9x4x8xbf16, #tpu.memory_space<vmem>>, vector<1x4x8xbf16>
    %25 = vector.shape_cast %24 : vector<1x4x8xbf16> to vector<4x8xbf16>
    %cst_14 = arith.constant dense<0.000000e+00> : vector<256x8xf32>
    %26 = tpu.matmul %23, %25, %cst_14 {dimension_numbers = #tpu.dot_dimension_numbers<[1], [0], [0], [1], [0, 0, 1, 1], [], []>} : vector<256x4xbf16>, vector<4x8xbf16>, vector<256x8xf32> -> vector<256x8xf32>
    %27 = arith.addf %20, %26 : vector<256x8xf32>
    %28 = vector.extract_strided_slice %14 {offsets = [0, 2, 0], sizes = [16, 16, 4], strides = [1, 1, 1]} : vector<18x18x4xf32> to vector<16x16x4xf32>
    %29 = vector.shape_cast %28 : vector<16x16x4xf32> to vector<256x4xf32>
    %30 = arith.truncf %29 : vector<256x4xf32> to vector<256x4xbf16>
    %c2 = arith.constant 2 : index
    %c0_15 = arith.constant 0 : index
    %c0_16 = arith.constant 0 : index
    %31 = vector.load %arg4[%c2, %c0_15, %c0_16] : memref<9x4x8xbf16, #tpu.memory_space<vmem>>, vector<1x4x8xbf16>
    %32 = vector.shape_cast %31 : vector<1x4x8xbf16> to vector<4x8xbf16>
    %cst_17 = arith.constant dense<0.000000e+00> : vector<256x8xf32>
    %33 = tpu.matmul %30, %32, %cst_17 {dimension_numbers = #tpu.dot_dimension_numbers<[1], [0], [0], [1], [0, 0, 1, 1], [], []>} : vector<256x4xbf16>, vector<4x8xbf16>, vector<256x8xf32> -> vector<256x8xf32>
    %34 = arith.addf %27, %33 : vector<256x8xf32>
    %35 = vector.extract_strided_slice %14 {offsets = [1, 0, 0], sizes = [16, 16, 4], strides = [1, 1, 1]} : vector<18x18x4xf32> to vector<16x16x4xf32>
    %36 = vector.shape_cast %35 : vector<16x16x4xf32> to vector<256x4xf32>
    %37 = arith.truncf %36 : vector<256x4xf32> to vector<256x4xbf16>
    %c3 = arith.constant 3 : index
    %c0_18 = arith.constant 0 : index
    %c0_19 = arith.constant 0 : index
    %38 = vector.load %arg4[%c3, %c0_18, %c0_19] : memref<9x4x8xbf16, #tpu.memory_space<vmem>>, vector<1x4x8xbf16>
    %39 = vector.shape_cast %38 : vector<1x4x8xbf16> to vector<4x8xbf16>
    %cst_20 = arith.constant dense<0.000000e+00> : vector<256x8xf32>
    %40 = tpu.matmul %37, %39, %cst_20 {dimension_numbers = #tpu.dot_dimension_numbers<[1], [0], [0], [1], [0, 0, 1, 1], [], []>} : vector<256x4xbf16>, vector<4x8xbf16>, vector<256x8xf32> -> vector<256x8xf32>
    %41 = arith.addf %34, %40 : vector<256x8xf32>
    %42 = vector.extract_strided_slice %14 {offsets = [1, 1, 0], sizes = [16, 16, 4], strides = [1, 1, 1]} : vector<18x18x4xf32> to vector<16x16x4xf32>
    %43 = vector.shape_cast %42 : vector<16x16x4xf32> to vector<256x4xf32>
    %44 = arith.truncf %43 : vector<256x4xf32> to vector<256x4xbf16>
    %c4 = arith.constant 4 : index
    %c0_21 = arith.constant 0 : index
    %c0_22 = arith.constant 0 : index
    %45 = vector.load %arg4[%c4, %c0_21, %c0_22] : memref<9x4x8xbf16, #tpu.memory_space<vmem>>, vector<1x4x8xbf16>
    %46 = vector.shape_cast %45 : vector<1x4x8xbf16> to vector<4x8xbf16>
    %cst_23 = arith.constant dense<0.000000e+00> : vector<256x8xf32>
    %47 = tpu.matmul %44, %46, %cst_23 {dimension_numbers = #tpu.dot_dimension_numbers<[1], [0], [0], [1], [0, 0, 1, 1], [], []>} : vector<256x4xbf16>, vector<4x8xbf16>, vector<256x8xf32> -> vector<256x8xf32>
    %48 = arith.addf %41, %47 : vector<256x8xf32>
    %49 = vector.extract_strided_slice %14 {offsets = [1, 2, 0], sizes = [16, 16, 4], strides = [1, 1, 1]} : vector<18x18x4xf32> to vector<16x16x4xf32>
    %50 = vector.shape_cast %49 : vector<16x16x4xf32> to vector<256x4xf32>
    %51 = arith.truncf %50 : vector<256x4xf32> to vector<256x4xbf16>
    %c5 = arith.constant 5 : index
    %c0_24 = arith.constant 0 : index
    %c0_25 = arith.constant 0 : index
    %52 = vector.load %arg4[%c5, %c0_24, %c0_25] : memref<9x4x8xbf16, #tpu.memory_space<vmem>>, vector<1x4x8xbf16>
    %53 = vector.shape_cast %52 : vector<1x4x8xbf16> to vector<4x8xbf16>
    %cst_26 = arith.constant dense<0.000000e+00> : vector<256x8xf32>
    %54 = tpu.matmul %51, %53, %cst_26 {dimension_numbers = #tpu.dot_dimension_numbers<[1], [0], [0], [1], [0, 0, 1, 1], [], []>} : vector<256x4xbf16>, vector<4x8xbf16>, vector<256x8xf32> -> vector<256x8xf32>
    %55 = arith.addf %48, %54 : vector<256x8xf32>
    %56 = vector.extract_strided_slice %14 {offsets = [2, 0, 0], sizes = [16, 16, 4], strides = [1, 1, 1]} : vector<18x18x4xf32> to vector<16x16x4xf32>
    %57 = vector.shape_cast %56 : vector<16x16x4xf32> to vector<256x4xf32>
    %58 = arith.truncf %57 : vector<256x4xf32> to vector<256x4xbf16>
    %c6 = arith.constant 6 : index
    %c0_27 = arith.constant 0 : index
    %c0_28 = arith.constant 0 : index
    %59 = vector.load %arg4[%c6, %c0_27, %c0_28] : memref<9x4x8xbf16, #tpu.memory_space<vmem>>, vector<1x4x8xbf16>
    %60 = vector.shape_cast %59 : vector<1x4x8xbf16> to vector<4x8xbf16>
    %cst_29 = arith.constant dense<0.000000e+00> : vector<256x8xf32>
    %61 = tpu.matmul %58, %60, %cst_29 {dimension_numbers = #tpu.dot_dimension_numbers<[1], [0], [0], [1], [0, 0, 1, 1], [], []>} : vector<256x4xbf16>, vector<4x8xbf16>, vector<256x8xf32> -> vector<256x8xf32>
    %62 = arith.addf %55, %61 : vector<256x8xf32>
    %63 = vector.extract_strided_slice %14 {offsets = [2, 1, 0], sizes = [16, 16, 4], strides = [1, 1, 1]} : vector<18x18x4xf32> to vector<16x16x4xf32>
    %64 = vector.shape_cast %63 : vector<16x16x4xf32> to vector<256x4xf32>
    %65 = arith.truncf %64 : vector<256x4xf32> to vector<256x4xbf16>
    %c7 = arith.constant 7 : index
    %c0_30 = arith.constant 0 : index
    %c0_31 = arith.constant 0 : index
    %66 = vector.load %arg4[%c7, %c0_30, %c0_31] : memref<9x4x8xbf16, #tpu.memory_space<vmem>>, vector<1x4x8xbf16>
    %67 = vector.shape_cast %66 : vector<1x4x8xbf16> to vector<4x8xbf16>
    %cst_32 = arith.constant dense<0.000000e+00> : vector<256x8xf32>
    %68 = tpu.matmul %65, %67, %cst_32 {dimension_numbers = #tpu.dot_dimension_numbers<[1], [0], [0], [1], [0, 0, 1, 1], [], []>} : vector<256x4xbf16>, vector<4x8xbf16>, vector<256x8xf32> -> vector<256x8xf32>
    %69 = arith.addf %62, %68 : vector<256x8xf32>
    %70 = vector.extract_strided_slice %14 {offsets = [2, 2, 0], sizes = [16, 16, 4], strides = [1, 1, 1]} : vector<18x18x4xf32> to vector<16x16x4xf32>
    %71 = vector.shape_cast %70 : vector<16x16x4xf32> to vector<256x4xf32>
    %72 = arith.truncf %71 : vector<256x4xf32> to vector<256x4xbf16>
    %c8 = arith.constant 8 : index
    %c0_33 = arith.constant 0 : index
    %c0_34 = arith.constant 0 : index
    %73 = vector.load %arg4[%c8, %c0_33, %c0_34] : memref<9x4x8xbf16, #tpu.memory_space<vmem>>, vector<1x4x8xbf16>
    %74 = vector.shape_cast %73 : vector<1x4x8xbf16> to vector<4x8xbf16>
    %cst_35 = arith.constant dense<0.000000e+00> : vector<256x8xf32>
    %75 = tpu.matmul %72, %74, %cst_35 {dimension_numbers = #tpu.dot_dimension_numbers<[1], [0], [0], [1], [0, 0, 1, 1], [], []>} : vector<256x4xbf16>, vector<4x8xbf16>, vector<256x8xf32> -> vector<256x8xf32>
    %76 = arith.addf %69, %75 : vector<256x8xf32>
    %c0_36 = arith.constant 0 : index
    %c0_37 = arith.constant 0 : index
    %c0_38 = arith.constant 0 : index
    %77 = vector.load %arg5[%c0_36, %c0_37, %c0_38] : memref<1x256x8xf32, #tpu.memory_space<vmem>>, vector<1x256x8xf32>
    %78 = vector.shape_cast %77 : vector<1x256x8xf32> to vector<256x8xf32>
    %79 = vector.shape_cast %76 : vector<256x8xf32> to vector<1x256x8xf32>
    tpu.vector_store %arg5[%c0_36, %c0_37, %c0_38], %79 {strides = array<i32>} : memref<1x256x8xf32, #tpu.memory_space<vmem>>, vector<1x256x8xf32>,
    %cst_39 = arith.constant dense<0.000000e+00> : vector<8xf32>
    %80 = vector.multi_reduction <add>, %76, %cst_39 [0] : vector<256x8xf32> to vector<8xf32>
    %81 = vector.shape_cast %80 : vector<8xf32> to vector<1x8xf32>
    %c0_40 = arith.constant 0 : index
    %c0_41 = arith.constant 0 : index
    %c0_42 = arith.constant 0 : index
    %82 = vector.load %arg6[%c0_40, %c0_41, %c0_42] : memref<1x2x8xf32, #tpu.memory_space<vmem>>, vector<1x1x8xf32>
    %83 = vector.shape_cast %82 : vector<1x1x8xf32> to vector<1x8xf32>
    %84 = vector.shape_cast %81 : vector<1x8xf32> to vector<1x1x8xf32>
    tpu.vector_store %arg6[%c0_40, %c0_41, %c0_42], %84 {strides = array<i32>} : memref<1x2x8xf32, #tpu.memory_space<vmem>>, vector<1x1x8xf32>,
    %85 = arith.mulf %76, %76 : vector<256x8xf32>
    %cst_43 = arith.constant dense<0.000000e+00> : vector<8xf32>
    %86 = vector.multi_reduction <add>, %85, %cst_43 [0] : vector<256x8xf32> to vector<8xf32>
    %87 = vector.shape_cast %86 : vector<8xf32> to vector<1x8xf32>
    %c0_44 = arith.constant 0 : index
    %c1_45 = arith.constant 1 : index
    %c0_46 = arith.constant 0 : index
    %88 = vector.load %arg6[%c0_44, %c1_45, %c0_46] : memref<1x2x8xf32, #tpu.memory_space<vmem>>, vector<1x1x8xf32>
    %89 = vector.shape_cast %88 : vector<1x1x8xf32> to vector<1x8xf32>
    %90 = vector.shape_cast %87 : vector<1x8xf32> to vector<1x1x8xf32>
    tpu.vector_store %arg6[%c0_44, %c1_45, %c0_46], %90 {strides = array<i32>} : memref<1x2x8xf32, #tpu.memory_space<vmem>>, vector<1x1x8xf32>,
    return
  }
  func.func @transform_0(%arg0: i32) -> (i32, i32, i32) {
    %c0_i32 = arith.constant 0 : i32
    %c0_i32_0 = arith.constant 0 : i32
    %c0_i32_1 = arith.constant 0 : i32
    return %arg0, %c0_i32, %c0_i32_0 : i32, i32, i32
  }
  func.func @transform_1(%arg0: i32) -> (i32, i32) {
    %c0_i32 = arith.constant 0 : i32
    %c0_i32_0 = arith.constant 0 : i32
    %c0_i32_1 = arith.constant 0 : i32
    return %c0_i32, %c0_i32_0 : i32, i32
  }
  func.func @transform_2(%arg0: i32) -> (i32, i32) {
    %c0_i32 = arith.constant 0 : i32
    %c0_i32_0 = arith.constant 0 : i32
    %c0_i32_1 = arith.constant 0 : i32
    return %c0_i32, %c0_i32_0 : i32, i32
  }
  func.func @transform_3(%arg0: i32) -> (i32, i32, i32) {
    %c0_i32 = arith.constant 0 : i32
    %c0_i32_0 = arith.constant 0 : i32
    %c0_i32_1 = arith.constant 0 : i32
    %c0_i32_2 = arith.constant 0 : i32
    return %c0_i32, %c0_i32_0, %c0_i32_1 : i32, i32, i32
  }
  func.func @transform_4(%arg0: i32) -> (i32, i32, i32) {
    %c0_i32 = arith.constant 0 : i32
    %c0_i32_0 = arith.constant 0 : i32
    %c0_i32_1 = arith.constant 0 : i32
    return %arg0, %c0_i32, %c0_i32_0 : i32, i32, i32
  }
  func.func @transform_5(%arg0: i32) -> (i32, i32, i32) {
    %c0_i32 = arith.constant 0 : i32
    %c0_i32_0 = arith.constant 0 : i32
    %c0_i32_1 = arith.constant 0 : i32
    return %arg0, %c0_i32, %c0_i32_0 : i32, i32, i32
  }
}

module attributes {stable_mosaic.version = 11 : i64} {
  func.func @_bn_affine_kernel(%arg0: i32, %arg1: memref<32x128xf32, #tpu.memory_space<vmem>>, %arg2: memref<1x128xf32, #tpu.memory_space<vmem>>, %arg3: memref<1x128xf32, #tpu.memory_space<vmem>>, %arg4: memref<32x128xf32, #tpu.memory_space<vmem>>) attributes {dimension_semantics = [#tpu.dimension_semantics<parallel>], iteration_bounds = array<i64: 1>, scalar_prefetch = 0 : i64, scratch_operands = 0 : i64, tpu.core_type = #tpu.core_type<tc>, window_params = [{transform_indices = @transform_0, window_bounds = array<i64: 32, 128>}, {pipeline_mode = #tpu.pipeline_mode<synchronous>, transform_indices = @transform_1, window_bounds = array<i64: 1, 128>}, {pipeline_mode = #tpu.pipeline_mode<synchronous>, transform_indices = @transform_2, window_bounds = array<i64: 1, 128>}, {transform_indices = @transform_3, window_bounds = array<i64: 32, 128>}]} {
    %c0 = arith.constant 0 : index
    %c0_0 = arith.constant 0 : index
    %0 = vector.load %arg1[%c0, %c0_0] : memref<32x128xf32, #tpu.memory_space<vmem>>, vector<32x128xf32>
    %c0_1 = arith.constant 0 : index
    %c0_2 = arith.constant 0 : index
    %1 = vector.load %arg2[%c0_1, %c0_2] : memref<1x128xf32, #tpu.memory_space<vmem>>, vector<1x128xf32>
    %2 = vector.broadcast %1 : vector<1x128xf32> to vector<32x128xf32>
    %3 = arith.mulf %0, %2 : vector<32x128xf32>
    %c0_3 = arith.constant 0 : index
    %c0_4 = arith.constant 0 : index
    %4 = vector.load %arg3[%c0_3, %c0_4] : memref<1x128xf32, #tpu.memory_space<vmem>>, vector<1x128xf32>
    %5 = vector.broadcast %4 : vector<1x128xf32> to vector<32x128xf32>
    %6 = arith.addf %3, %5 : vector<32x128xf32>
    %c0_5 = arith.constant 0 : index
    %c0_6 = arith.constant 0 : index
    %7 = vector.load %arg4[%c0_5, %c0_6] : memref<32x128xf32, #tpu.memory_space<vmem>>, vector<32x128xf32>
    tpu.vector_store %arg4[%c0_5, %c0_6], %6 {strides = array<i32>} : memref<32x128xf32, #tpu.memory_space<vmem>>, vector<32x128xf32>,
    return
  }
  func.func @transform_0(%arg0: i32) -> (i32, i32) {
    %c0_i32 = arith.constant 0 : i32
    %c0_i32_0 = arith.constant 0 : i32
    return %arg0, %c0_i32 : i32, i32
  }
  func.func @transform_1(%arg0: i32) -> (i32, i32) {
    %c0_i32 = arith.constant 0 : i32
    %c0_i32_0 = arith.constant 0 : i32
    %c0_i32_1 = arith.constant 0 : i32
    return %c0_i32, %c0_i32_0 : i32, i32
  }
  func.func @transform_2(%arg0: i32) -> (i32, i32) {
    %c0_i32 = arith.constant 0 : i32
    %c0_i32_0 = arith.constant 0 : i32
    %c0_i32_1 = arith.constant 0 : i32
    return %c0_i32, %c0_i32_0 : i32, i32
  }
  func.func @transform_3(%arg0: i32) -> (i32, i32) {
    %c0_i32 = arith.constant 0 : i32
    %c0_i32_0 = arith.constant 0 : i32
    return %arg0, %c0_i32 : i32, i32
  }
}

</mosaic_0001>

<bundles_post_ra>
// kernel: tile.13
= control target key start
LH: loop header
LB: loop body
LE: loop exit
PB: predicated region body
PF: predicated region fallthrough
CT: control target
= control target key end

     0   :  { %s28_s0 = inlined_call_operand.vmem [shape: f32[8], index: 0, kind: input, shape index: {}]   ;;  %s29_s1 = inlined_call_operand.vmem [shape: f32[16,8], index: 1, kind: output, shape index: {}]  }
   0x1   :  { %v4_v0 = vld [vmem:[%s28_s0] ss:$0 sm:$0xff] }
   0x2   :  { %5 = vst [vmem:[%s29_s1] sm:$0xff] %v4_v0  ;;  %8 = vst [vmem:[%s29_s1 + $0x8] sm:$0xff] %v4_v0 }

// kernel: tile.14
= control target key start
LH: loop header
LB: loop body
LE: loop exit
PB: predicated region body
PF: predicated region fallthrough
CT: control target
= control target key end

     0   :  { %s131_s10 = smov 120   ;;  %s132_s11 = smov 104   ;;  %vm3_vm0 = vcmask 64512   ;;  %vm9_vm1 = vcmask 1048512   ;;  %vm15_vm2 = vcmask 982912   ;;  %vm21_vm3 = vcmask 917312   ;;  %s207_s0 = inlined_call_operand.vmem [shape: f32[16,8], index: 0, kind: input, shape index: {}]   ;;  %s208_s1 = inlined_call_operand.vmem [shape: f32[1,128], index: 1, kind: output, shape index: {}]  }
   0x1   :  { %v101_v0 = vld [vmem:[%s207_s0 + $0xf] sm:$0x1]   ;;  %v103_v1 = vld [vmem:[%s207_s0 + $0xd] sm:$0x1]   ;;  %v102_v2 = vld [vmem:[%s207_s0 + $0xe] sm:$0x1]  }
   0x2   :  { %7 = vrot.lane.b32.xlu0 %v101_v0, %s131_s10  ;;  %19 = vrot.lane.b32.xlu1 %v103_v1, %s132_s11  ;;  %v104_v3 = vld [vmem:[%s207_s0 + $0xc] sm:$0x1]   ;;  %s133_s16 = smov 112   ;;  %s134_s17 = smov 96   ;;  %v105_v4 = vld [vmem:[%s207_s0 + $0xb] sm:$0x1]  }
   0x3   :  { %v106_v5 = vld [vmem:[%s207_s0 + $0xa] sm:$0x1]   ;;  %v2_v6 = vld [vmem:[%s207_s0] sm:$0x1]   ;;  %s135_s24 = smov 88   ;;  %s136_s25 = smov 80  }
   0x4   :  { %4 = vst.msk [vmem:[#allocation0] sm:$0x1] %vm3_vm0, %v2_v6   ;;  %v107_v7 = vld [vmem:[%s207_s0 + $0x9] sm:$0x1]   ;;  %v108_v8 = vld [vmem:[%s207_s0 + $0x8] sm:$0x1]  }
   0x5   :  { %s137_s30 = smov 72   ;;  %s138_s2 = smov 64   ;;  %v109_v9 = vld [vmem:[%s207_s0 + $0x7] sm:$0x1]   ;;  %v110_v10 = vld [vmem:[%s207_s0 + $0x6] sm:$0x1]  }
   0x6   :  { %13 = vrot.lane.b32.xlu0 %v102_v2, %s133_s16  ;;  %25 = vrot.lane.b32.xlu1 %v104_v3, %s134_s17  ;;  %s139_s7 = smov 56   ;;  %s140_s8 = smov 48   ;;  %v111_v11 = vld [vmem:[%s207_s0 + $0x5] sm:$0x1]   ;;  %v112_v12 = vld [vmem:[%s207_s0 + $0x4] sm:$0x1]  }
   0x7   :  { %s141_s13 = smov 40   ;;  %s142_s14 = smov 32   ;;  %v113_v13 = vld [vmem:[%s207_s0 + $0x3] sm:$0x1]   ;;  %v114_v14 = vld [vmem:[%s207_s0 + $0x2] sm:$0x1]  }
   0x8   :  { %s143_s19 = smov 24   ;;  %s144_s20 = smov 16   ;;  %v115_v15 = vld [vmem:[%s207_s0 + $0x1] sm:$0x1]   ;;  %vm27_vm4 = vcmask 851712   ;;  %vm33_vm5 = vcmask 786112  }
   0x9   :  { %s145_s0 = smov 8   ;;  %vm39_vm6 = vcmask 720512   ;;  %vm45_vm7 = vcmask 654912   ;;  %vm51_vm8 = vcmask 589312   ;;  %vm57_vm9 = vcmask 523712  }
   0xa   :  { %31 = vrot.lane.b32.xlu0 %v105_v4, %s135_s24  ;;  %37 = vrot.lane.b32.xlu1 %v106_v5, %s136_s25  ;;  %vm63_vm10 = vcmask 458112   ;;  %vm69_vm11 = vcmask 392512   ;;  %vm75_vm12 = vcmask 326912   ;;  %vm81_vm13 = vcmask 261312  }
   0xb   :  { %vm87_vm14 = vcmask 195712   ;;  %vm93_vm15 = vcmask 130112  }
   0xe   :  { %43 = vrot.lane.b32.xlu0 %v107_v7, %s137_s30  ;;  %49 = vrot.lane.b32.xlu1 %v108_v8, %s138_s2 }
  0x12   :  { %55 = vrot.lane.b32.xlu0 %v109_v9, %s139_s7  ;;  %61 = vrot.lane.b32.xlu1 %v110_v10, %s140_s8 }
  0x16   :  { %67 = vrot.lane.b32.xlu0 %v111_v11, %s141_s13  ;;  %73 = vrot.lane.b32.xlu1 %v112_v12, %s142_s14 }
  0x1a   :  { %79 = vrot.lane.b32.xlu0 %v113_v13, %s143_s19  ;;  %85 = vrot.lane.b32.xlu1 %v114_v14, %s144_s20 }
  0x1e   :  { %91 = vrot.lane.b32.xlu0 %v115_v15, %s145_s0 }
  0x74   :  { %v8_v16 = vpop.permute.xlu0 %7   ;;  %v20_v17 = vpop.permute.xlu1 %19  }
  0x75   :  { %10 = vst.msk [vmem:[#allocation0] sm:$0x1] %vm9_vm1, %v8_v16  }
  0x78   :  { %v14_v18 = vpop.permute.xlu0 %13   ;;  %v26_v19 = vpop.permute.xlu1 %25  }
  0x79   :  { %16 = vst.msk [vmem:[#allocation0] sm:$0x1] %vm15_vm2, %v14_v18  }
  0x7a   :  { %22 = vst.msk [vmem:[#allocation0] sm:$0x1] %vm21_vm3, %v20_v17  }
  0x7b   :  { %28 = vst.msk [vmem:[#allocation0] sm:$0x1] %vm27_vm4, %v26_v19  }
  0x7c   :  { %v32_v20 = vpop.permute.xlu0 %31   ;;  %v38_v21 = vpop.permute.xlu1 %37  }
  0x7d   :  { %34 = vst.msk [vmem:[#allocation0] sm:$0x1] %vm33_vm5, %v32_v20  }
  0x7e   :  { %40 = vst.msk [vmem:[#allocation0] sm:$0x1] %vm39_vm6, %v38_v21  }
  0x80   :  { %v44_v22 = vpop.permute.xlu0 %43   ;;  %v50_v23 = vpop.permute.xlu1 %49  }
  0x81   :  { %46 = vst.msk [vmem:[#allocation0] sm:$0x1] %vm45_vm7, %v44_v22  }
  0x82   :  { %52 = vst.msk [vmem:[#allocation0] sm:$0x1] %vm51_vm8, %v50_v23  }
  0x84   :  { %v56_v24 = vpop.permute.xlu0 %55   ;;  %v62_v25 = vpop.permute.xlu1 %61  }
  0x85   :  { %58 = vst.msk [vmem:[#allocation0] sm:$0x1] %vm57_vm9, %v56_v24  }
  0x86   :  { %64 = vst.msk [vmem:[#allocation0] sm:$0x1] %vm63_vm10, %v62_v25  }
  0x88   :  { %v68_v26 = vpop.permute.xlu0 %67   ;;  %v74_v27 = vpop.permute.xlu1 %73  }
  0x89   :  { %70 = vst.msk [vmem:[#allocation0] sm:$0x1] %vm69_vm11, %v68_v26  }
  0x8a   :  { %76 = vst.msk [vmem:[#allocation0] sm:$0x1] %vm75_vm12, %v74_v27  }
  0x8c   :  { %v80_v28 = vpop.permute.xlu0 %79   ;;  %v86_v29 = vpop.permute.xlu1 %85  }
  0x8d   :  { %82 = vst.msk [vmem:[#allocation0] sm:$0x1] %vm81_vm13, %v80_v28  }
  0x8e   :  { %88 = vst.msk [vmem:[#allocation0] sm:$0x1] %vm87_vm14, %v86_v29  }
  0x90   :  { %v92_v30 = vpop.permute.xlu0 %91  }
  0x91   :  { %94 = vst.msk [vmem:[#allocation0] sm:$0x1] %vm93_vm15, %v92_v30  }
  0x98   :  { %v98_v31 = vld [vmem:[#allocation0] sm:$0x1] }
  0x99   :  { %100 = vst [vmem:[%s208_s1] sm:$0x1] %v98_v31 }

// kernel: sepconv_forward.5
= control target key start
LH: loop header
LB: loop body
LE: loop exit
PB: predicated region body
PF: predicated region fallthrough
CT: control target
= control target key end

     0   :  { %s100_s0 = inlined_call_operand.vmem [shape: f32[32,128], index: 0, kind: input, shape index: {}]   ;;  %s101_s1 = inlined_call_operand.vmem [shape: f32[1,128], index: 1, kind: input, shape index: {}]   ;;  %s102_s2 = inlined_call_operand.vmem [shape: f32[1,128], index: 2, kind: input, shape index: {}]   ;;  %s103_s3 = inlined_call_operand.vmem [shape: f32[32,128], index: 3, kind: output, shape index: {}]  }
   0x1   :  { %v14_v0 = vld [vmem:[%s100_s0] sm:$0xff]  ;;  %v15_v4 = vld [vmem:[%s100_s0 + $0x8] sm:$0xff]  ;;  %v16_v5 = vld [vmem:[%s100_s0 + $0x10] sm:$0xff] }
   0x2   :  { %v48_v1 = vld [vmem:[%s101_s1] ss:$0 sm:$0xff]  ;;  %v17_v6 = vld [vmem:[%s100_s0 + $0x18] sm:$0xff] }
   0x3   :  { %v49_v2 = vld [vmem:[%s102_s2] ss:$0 sm:$0xff]  ;;  %v25_v3 = vmul.f32 %v48_v1, %v14_v0  ;;  %v26_v7 = vmul.f32 %v48_v1, %v15_v4  ;;  %v27_v8 = vmul.f32 %v48_v1, %v16_v5  ;;  %v28_v9 = vmul.f32 %v48_v1, %v17_v6 }
   0x5   :  { %v36_v10 = vadd.f32 %v49_v2, %v25_v3  ;;  %v37_v11 = vadd.f32 %v49_v2, %v26_v7  ;;  %v38_v12 = vadd.f32 %v49_v2, %v27_v8  ;;  %v39_v13 = vadd.f32 %v49_v2, %v28_v9 }
   0x7   :  { %40 = vst [vmem:[%s103_s3] sm:$0xff] %v36_v10  ;;  %41 = vst [vmem:[%s103_s3 + $0x8] sm:$0xff] %v37_v11 }
   0x8   :  { %42 = vst [vmem:[%s103_s3 + $0x10] sm:$0xff] %v38_v12  ;;  %43 = vst [vmem:[%s103_s3 + $0x18] sm:$0xff] %v39_v13 }

// kernel: sepconv_forward.3
= control target key start
LH: loop header
LB: loop body
LE: loop exit
PB: predicated region body
PF: predicated region fallthrough
CT: control target
= control target key end

     0   :  { %s3753_s12 = smov 0   ;;  %s4799_s0 = inlined_call_operand.vmem [shape: f32[2,18,18,4], index: 0, kind: input, shape index: {}]   ;;  %s4800_s1 = inlined_call_operand.vmem [shape: bf16[9,4,4], index: 1, kind: input, shape index: {}]   ;;  %s4801_s2 = inlined_call_operand.vmem [shape: f32[2,256,4], index: 2, kind: output, shape index: {0}]   ;;  %s4802_s3 = inlined_call_operand.vmem [shape: f32[2,2,4], index: 3, kind: output, shape index: {1}]  }
   0x1 LB: > { %s2825_s13 = sadd.s32 4294967295, %s3731_s12   ;;  %p2829_p0 = scmp.ge.s32.totalorder %s3731_s12, 1  ;;  %s3731_s12 = sphi %s3753_s12, %s14_s12  }
   0x2   : > { %p140_p1 = scmp.lt.s32.totalorder %s3731_s12, 3 }
   0x4   : > { %p141_p2 = pnand %p2829_p0, %p140_p1 }
   0x6   : > { %144 = sbr.rel (%p141_p2) target bundleno = 550 (0x226), region = 28 }
   0xd   : > { %v2834_v0 = vld [vmem:[%s4800_s1 + $0x2] sm:$0x3]  ;;  %vm536_vm0 = vcmask 1041408   ;;  %v3767_v1 = vld [vmem:[%s4800_s1 + $0x8] sm:$0x3]  ;;  %p168_p3 = scmp.lt.s32.totalorder %s2825_s13, 1 }
   0xe   : > { %4833 = vst [vmem:[#allocation2_spill] sm:$0xff] %v3767_v1  ;;  %3706 = vmatprep.subr.msk.bf16.mxu1 %vm536_vm0, %v2834_v0  ;;  %3710 = vmatprep.subr.msk.bf16.mxu0 %vm536_vm0, %v3767_v1  ;;  %v538_v2 = vsel %vm536_vm0, %v2834_v0, 0  ;;  %v3775_v3 = vsel %vm536_vm0, %v3767_v1, 0  ;;  %v307_v4 = vld [vmem:[%s4800_s1] sm:$0x3]  ;;  %vm356_vm1 = vcmask 1046528  }
   0xf   : > { %4834 = vst [vmem:[#allocation3_spill] sm:$0xff] %v3775_v3  ;;  %3143 = vmatpush3.bf16.msra.mxu1 %v538_v2  ;;  %3279 = vmatpush3.bf16.msra.mxu0 %v3775_v3  ;;  %s4884_s13 = smov (!%p168_p3, %s2825_s13), 1  ;;  %v2918_v5 = vld [vmem:[%s4800_s1 + $0xa] sm:$0x3]  ;;  %vm487_vm2 = vcmask 31744   ;;  %v750_v36 = vsel %vm536_vm0, %v307_v4, 0 }
  0x10   : > { %3707 = vmatprep.subr.msk.bf16.mxu1 %vm536_vm0, %v307_v4  ;;  %3712 = vmatprep.subr.msk.bf16.mxu0 %vm536_vm0, %v2918_v5  ;;  %s3716_s22 = smul.u32 432, %s4884_s13  ;;  %v1716_v44 = vsel %vm536_vm0, %v2918_v5, 0  ;;  %v3871_v55 = vld [vmem:[%s4800_s1 + $0xc] sm:$0x3]  ;;  %v3882_v60 = vld [vmem:[%s4800_s1 + $0x4] sm:$0x3] }
  0x11   : > { %vm913_vm3 = vcmask 1045504   ;;  %s2988_s9 = sshll.u32 %s4884_s13, 8  ;;  %s2833_s15 = sshll.u32 %s4884_s13, 1  ;;  %vm2635_vm4 = vcmask 24576  }
  0x12   : > { %s3792_s25 = scalar_lea.vmem %s4799_s0, %s3716_s22  ;;  %s4654_s14 = scalar_lea.vmem %s4801_s2, %s2988_s9 }
  0x13   : > { %v183_v6 = vld [vmem:[%s3792_s25] sm:$0xff]  ;;  %v184_v7 = vld [vmem:[%s3792_s25 + $0x8] sm:$0xff]  ;;  %v3797_v8 = vld [vmem:[%s3792_s25 + $0x10] sm:$0x3]  ;;  %s181_s18 = scalar_lea.vmem %s4802_s3, %s2833_s15 }
  0x14   : > { %v3799_v9 = vmax.f32 %v183_v6, 0.0  ;;  %v3801_v10 = vmax.f32 %v184_v7, 0.0  ;;  %v4803_v11 = vmax.f32 %v3797_v8, 0.0  ;;  %v186_v12 = vld [vmem:[%s3792_s25 + $0x18] sm:$0xff]  ;;  %v187_v13 = vld [vmem:[%s3792_s25 + $0x20] sm:$0xff]  ;;  %v189_v14 = vld [vmem:[%s3792_s25 + $0x30] sm:$0xff] }
  0x15   : > { %v3808_v15 = vld [vmem:[%s3792_s25 + $0x28] sm:$0x3]  ;;  %v3810_v16 = vmax.f32 %v186_v12, 0.0  ;;  %v3812_v17 = vmax.f32 %v187_v13, 0.0  ;;  %v190_v18 = vld [vmem:[%s3792_s25 + $0x38] sm:$0xff]  ;;  %v3822_v23 = vmax.f32 %v189_v14, 0.0 }
  0x16   : > { %v357_v19 = vrot.slane %v3799_v9, 1  ;;  %v358_v20 = vrot.slane %v3801_v10, 1  ;;  %v360_v21 = vrot.slane %v4803_v11, 1  ;;  %v3820_v22 = vld [vmem:[%s3792_s25 + $0x40] sm:$0x3]  ;;  %v242_v24 = vmax.f32 %v3808_v15, 0.0 }
  0x17   : > { %v3827_v25 = vpack.c.bf16 %v3812_v17, %v3810_v16  ;;  %v362_v26 = vrot.slane %v3810_v16, 1  ;;  %v363_v27 = vrot.slane %v3812_v17, 1  ;;  %v3833_v30 = vmax.f32 %v190_v18, 0.0  ;;  %v192_v32 = vld [vmem:[%s3792_s25 + $0x48] sm:$0xff]  ;;  %v193_v37 = vld [vmem:[%s3792_s25 + $0x50] sm:$0xff]  ;;  %v195_v42 = vld [vmem:[%s3792_s25 + $0x60] sm:$0xff] }
  0x18   : > { %v359_v28 = vsel %vm356_vm1, %v357_v19, %v358_v20  ;;  %v361_v29 = vsel %vm356_vm1, %v358_v20, %v360_v21  ;;  %v245_v31 = vmax.f32 %v3820_v22, 0.0  ;;  %v365_v35 = vrot.slane %v242_v24, 1  ;;  %v3847_v41 = vld [vmem:[%s3792_s25 + $0x58] sm:$0x3]  ;;  %v196_v46 = vld [vmem:[%s3792_s25 + $0x68] sm:$0xff]  ;;  %v199_v53 = vld [vmem:[%s3792_s25 + $0x80] sm:$0xff] }
  0x19   : > { %4835 = vst [vmem:[#allocation4_spill] sm:$0xff] %v3827_v25  ;;  %v469_v33 = vpack.c.bf16 %v361_v29, %v359_v28  ;;  %v364_v34 = vsel %vm356_vm1, %v362_v26, %v363_v27  ;;  %v367_v38 = vrot.slane %v3822_v23, 1  ;;  %v368_v39 = vrot.slane %v3833_v30, 1  ;;  %v3857_v47 = vld [vmem:[%s3792_s25 + $0x70] sm:$0x3]  ;;  %v198_v48 = vld [vmem:[%s3792_s25 + $0x78] sm:$0xff] }
  0x1a   : > { %v370_v40 = vrot.slane %v245_v31, 1  ;;  %v366_v43 = vsel %vm356_vm1, %v363_v27, %v365_v35  ;;  %v3853_v45 = vmax.f32 %v192_v32, 0.0  ;;  %v3862_v52 = vmax.f32 %v193_v37, 0.0  ;;  %v3866_v54 = vld [vmem:[%s3792_s25 + $0x88] sm:$0x3]  ;;  %v201_v2 = vld [vmem:[%s3792_s25 + $0x90] sm:$0xff] }
  0x1b   : > { %3144 = vmatprep.mubr.msk.bf16.mxu1 %vm487_vm2, %v469_v33  ;;  %v470_v49 = vpack.c.bf16 %v366_v43, %v364_v34  ;;  %v369_v50 = vsel %vm356_vm1, %v367_v38, %v368_v39  ;;  %v248_v57 = vmax.f32 %v3847_v41, 0.0  ;;  %v3877_v59 = vmax.f32 %v195_v42, 0.0  ;;  %v202_v12 = vld [vmem:[%s3792_s25 + $0x98] sm:$0xff]  ;;  %v3910_v20 = vld [vmem:[%s3792_s25 + $0xa0] sm:$0x3]  ;;  %v204_v29 = vld [vmem:[%s3792_s25 + $0xa8] sm:$0xff] }
  0x1c   : > { %v371_v51 = vsel %vm356_vm1, %v368_v39, %v370_v40  ;;  %v372_v58 = vrot.slane %v3853_v45, 1  ;;  %v373_v61 = vrot.slane %v3862_v52, 1  ;;  %v3887_v62 = vmax.f32 %v196_v46, 0.0  ;;  %v3931_v37 = vld [vmem:[%s3792_s25 + $0xb8] sm:$0x3]  ;;  %v207_v43 = vld [vmem:[%s3792_s25 + $0xc0] sm:$0xff] }
  0x1d   : > { %v3873_v56 = vpack.c.bf16 %v371_v51, %v369_v50  ;;  %3280 = vmatprep.mubr.msk.bf16.mxu0 %vm487_vm2, %v470_v49  ;;  %3145 = vmatmul.mubr.msk.bf16.vlgmr.msra.gmra.mrb[0].mxu1 %vm487_vm2, %v470_v49  ;;  %v4808_v63 = vmax.f32 %v3857_v47, 0.0  ;;  %v3890_v0 = vmax.f32 %v198_v48, 0.0  ;;  %v375_v4 = vrot.slane %v248_v57, 1  ;;  %v3941_v46 = vld [vmem:[%s3792_s25 + $0xd0] sm:$0x3]  ;;  %v216_v11 = vld [vmem:[%s3792_s25 + $0x108] sm:$0xff] }
  0x1e   : > { %3177 = vmatpush3.bf16.msra.mxu1 %v750_v36  ;;  %v377_v5 = vrot.slane %v3877_v59, 1  ;;  %v3898_v6 = vmax.f32 %v199_v53, 0.0  ;;  %v4807_v7 = vmax.f32 %v3866_v54, 0.0  ;;  %v374_v13 = vsel %vm356_vm1, %v372_v58, %v373_v61  ;;  %v205_v36 = vld [vmem:[%s3792_s25 + $0xb0] sm:$0xff]  ;;  %v226_v1 = vld [vmem:[%s3792_s25 + $0x158] sm:$0xff] }
  0x1f   : > { %4836 = vst [vmem:[#allocation5_spill] sm:$0xff] %v3873_v56  ;;  %3281 = vmatmul.mubr.msk.bf16.vlgmr.msra.gmra.mrb[0].mxu0 %vm487_vm2, %v3873_v56  ;;  %3148 = vmatprep.mubr.msk.bf16.mxu1 %vm487_vm2, %v3873_v56  ;;  %v378_v14 = vrot.slane %v3887_v62, 1  ;;  %v380_v18 = vrot.slane %v4808_v63, 1  ;;  %v382_v19 = vrot.slane %v3890_v0, 1  ;;  %v376_v21 = vsel %vm356_vm1, %v373_v61, %v375_v4  ;;  %v225_v56 = vld [vmem:[%s3792_s25 + $0x150] sm:$0xff] }
  0x20   : > { %3313 = vmatpush3.bf16.msra.mxu0 %v1716_v44  ;;  %v383_v26 = vrot.slane %v3898_v6, 1  ;;  %v385_v27 = vrot.slane %v4807_v7, 1  ;;  %v3916_v28 = vmax.f32 %v201_v2, 0.0  ;;  %3708 = vmatprep.subr.msk.bf16.mxu1 %vm536_vm0, %v3882_v60  ;;  %v3923_v32 = vpack.c.bf16 %v376_v21, %v374_v13  ;;  %v208_v44 = vld [vmem:[%s3792_s25 + $0xc8] sm:$0xff]  ;;  %v210_v21 = vld [vmem:[%s3792_s25 + $0xd8] sm:$0xff] }
  0x21   : > { %3713 = vmatprep.subr.msk.bf16.mxu0 %vm536_vm0, %v3871_v55  ;;  %v379_v33 = vsel %vm356_vm1, %v377_v5, %v378_v14  ;;  %v381_v34 = vsel %vm356_vm1, %v378_v14, %v380_v18  ;;  %v3927_v35 = vmax.f32 %v202_v12, 0.0  ;;  %v4806_v42 = vmax.f32 %v3910_v20, 0.0  ;;  %v220_v7 = vld [vmem:[%s3792_s25 + $0x128] sm:$0xff] }
  0x22   : > { %4837 = vst [vmem:[#allocation6_spill] sm:$0xff] %v3923_v32  ;;  %v3933_v38 = vpack.c.bf16 %v381_v34, %v379_v33  ;;  %v384_v39 = vsel %vm356_vm1, %v382_v19, %v383_v26  ;;  %v386_v40 = vsel %vm356_vm1, %v383_v26, %v385_v27  ;;  %3284 = vmatprep.mubr.msk.bf16.mxu0 %vm487_vm2, %v3923_v32  ;;  %v387_v49 = vrot.slane %v3916_v28, 1  ;;  %v211_v26 = vld [vmem:[%s3792_s25 + $0xe0] sm:$0xff] }
  0x23   : > { %v3945_v48 = vpack.c.bf16 %v386_v40, %v384_v39  ;;  %v388_v50 = vrot.slane %v3927_v35, 1  ;;  %v3949_v51 = vmax.f32 %v204_v29, 0.0  ;;  %v390_v53 = vrot.slane %v4806_v42, 1  ;;  %v3986_v40 = vld [vmem:[%s3792_s25 + $0xe8] sm:$0x3] }
  0x24   : > { %4838 = vst [vmem:[#allocation7_spill] sm:$0xff] %v3933_v38  ;;  %v3953_v58 = vmax.f32 %v205_v36, 0.0  ;;  %v4805_v61 = vmax.f32 %v3931_v37, 0.0  ;;  %v3959_v4 = vmax.f32 %v207_v43, 0.0  ;;  %v3961_v5 = vmax.f32 %v208_v44, 0.0 }
  0x25   : > { %4839 = vst [vmem:[#allocation8_spill] sm:$0xff] %v3945_v48  ;;  %3149 = vmatmul.mubr.msk.bf16.gmra.mrb[4].mxu1 %vm487_vm2, %v3923_v32  ;;  %v392_v2 = vrot.slane %v3949_v51, 1  ;;  %v4804_v12 = vmax.f32 %v3941_v46, 0.0  ;;  %v389_v13 = vsel %vm356_vm1, %v387_v49, %v388_v50  ;;  %v391_v14 = vsel %vm356_vm1, %v388_v50, %v390_v53 }
  0x26   : > { %3152 = vmatprep.mubr.msk.bf16.mxu1 %vm487_vm2, %v3933_v38  ;;  %v393_v18 = vrot.slane %v3953_v58, 1  ;;  %v395_v19 = vrot.slane %v4805_v61, 1  ;;  %v3979_v33 = vpack.c.bf16 %v391_v14, %v389_v13  ;;  %v397_v34 = vrot.slane %v3959_v4, 1  ;;  %v213_v14 = vld [vmem:[%s3792_s25 + $0xf0] sm:$0xff] }
  0x27   : > { %3285 = vmatmul.mubr.msk.bf16.gmra.mrb[4].mxu0 %vm487_vm2, %v3933_v38  ;;  %v398_v36 = vrot.slane %v3961_v5, 1  ;;  %v400_v39 = vrot.slane %v4804_v12, 1  ;;  %v919_v43 = vrot.slane %v3810_v16, 2  ;;  %v920_v44 = vrot.slane %v3812_v17, 2  ;;  %v217_v12 = vld [vmem:[%s3792_s25 + $0x110] sm:$0xff] }
  0x28   : > { %3288 = vmatprep.mubr.msk.bf16.mxu0 %vm487_vm2, %v3945_v48  ;;  %v394_v27 = vsel %vm356_vm1, %v392_v2, %v393_v18  ;;  %v396_v29 = vsel %vm356_vm1, %v393_v18, %v395_v19  ;;  %4840 = vst [vmem:[#allocation9_spill] sm:$0xff] %v3979_v33  ;;  %v3990_v49 = vmax.f32 %v210_v21, 0.0  ;;  %v3992_v50 = vmax.f32 %v211_v26, 0.0  ;;  %v214_v18 = vld [vmem:[%s3792_s25 + $0xf8] sm:$0xff]  ;;  %v4002_v19 = vld [vmem:[%s3792_s25 + $0x100] sm:$0x3] }
  0x29   : > { %v922_v53 = vrot.slane %v242_v24, 2  ;;  %v3996_v2 = vpack.c.bf16 %v396_v29, %v394_v27  ;;  %v4809_v13 = vmax.f32 %v3986_v40, 0.0  ;;  %v924_v16 = vrot.slane %v3822_v23, 2 }
  0x2a   : > { %v925_v17 = vrot.slane %v3833_v30, 2  ;;  %v927_v21 = vrot.slane %v245_v31, 2  ;;  %v399_v15 = vsel %vm356_vm1, %v397_v34, %v398_v36  ;;  %v401_v24 = vsel %vm356_vm1, %v398_v36, %v400_v39 }
  0x2b   : > { %4841 = vst [vmem:[#allocation10_spill] sm:$0xff] %v3996_v2  ;;  %v921_v26 = vsel %vm913_vm3, %v919_v43, %v920_v44  ;;  %v402_v22 = vrot.slane %v3990_v49, 1  ;;  %v403_v31 = vrot.slane %v3992_v50, 1  ;;  %v923_v27 = vsel %vm913_vm3, %v920_v44, %v922_v53 }
  0x2c   : > { %v4022_v29 = vmax.f32 %v213_v14, 0.0  ;;  %v4024_v34 = vmax.f32 %v214_v18, 0.0  ;;  %v4810_v36 = vmax.f32 %v4002_v19, 0.0  ;;  %v405_v39 = vrot.slane %v4809_v13, 1  ;;  %v4039_v14 = vld [vmem:[%s3792_s25 + $0x118] sm:$0x3] }
  0x2d   : > { %3153 = vmatmul.mubr.msk.bf16.gmra.mrb[8].mxu1 %vm487_vm2, %v3945_v48  ;;  %v4029_v43 = vpack.c.bf16 %v401_v24, %v399_v15  ;;  %v4033_v61 = vpack.c.bf16 %v923_v27, %v921_v26  ;;  %v404_v42 = vsel %vm356_vm1, %v402_v22, %v403_v31  ;;  %v926_v44 = vsel %vm913_vm3, %v924_v16, %v925_v17  ;;  %v219_v18 = vld [vmem:[%s3792_s25 + $0x120] sm:$0xff]  ;;  %v4049_v26 = vld [vmem:[%s3792_s25 + $0x130] sm:$0x3] }
  0x2e   : > { %3156 = vmatprep.mubr.msk.bf16.mxu1 %vm487_vm2, %v3979_v33  ;;  %v928_v53 = vsel %vm913_vm3, %v925_v17, %v927_v21  ;;  %v407_v63 = vrot.slane %v4022_v29, 1  ;;  %v408_v13 = vrot.slane %v4024_v34, 1  ;;  %v410_v15 = vrot.slane %v4810_v36, 1 }
  0x2f   : > { %3289 = vmatmul.mubr.msk.bf16.gmra.mrb[8].mxu0 %vm487_vm2, %v3979_v33  ;;  %4842 = vst [vmem:[#allocation11_spill] sm:$0xff] %v4029_v43  ;;  %4843 = vst [vmem:[#allocation12_spill] sm:$0xff] %v4033_v61  ;;  %v929_v24 = vrot.slane %v3853_v45, 2  ;;  %v406_v22 = vsel %vm356_vm1, %v403_v31, %v405_v39  ;;  %v930_v16 = vrot.slane %v3862_v52, 2  ;;  %v932_v17 = vrot.slane %v248_v57, 2 }
  0x30   : > { %3292 = vmatprep.mubr.msk.bf16.mxu0 %vm487_vm2, %v3996_v2  ;;  %v4055_v21 = vmax.f32 %v216_v11, 0.0  ;;  %v4059_v27 = vmax.f32 %v217_v12, 0.0  ;;  %v4066_v31 = vmax.f32 %v219_v18, 0.0  ;;  %v4068_v41 = vmax.f32 %v220_v7, 0.0 }
  0x31   : > { %v4073_v57 = vpack.c.bf16 %v406_v22, %v404_v42  ;;  %v4075_v12 = vpack.c.bf16 %v928_v53, %v926_v44  ;;  %v409_v39 = vsel %vm356_vm1, %v407_v63, %v408_v13  ;;  %v411_v36 = vsel %vm356_vm1, %v408_v13, %v410_v15 }
  0x32   : > { %v931_v3 = vsel %vm913_vm3, %v929_v24, %v930_v16  ;;  %v933_v18 = vsel %vm913_vm3, %v930_v16, %v932_v17  ;;  %v412_v7 = vrot.slane %v4055_v21, 1  ;;  %v934_v11 = vrot.slane %v3877_v59, 2  ;;  %v4092_v24 = vld [vmem:[%s3792_s25 + $0x148] sm:$0x3] }
  0x33   : > { %4844 = vst [vmem:[#allocation13_spill] sm:$0xff] %v4073_v57  ;;  %4845 = vst [vmem:[#allocation14_spill] sm:$0xff] %v4075_v12  ;;  %v413_v42 = vrot.slane %v4059_v27, 1  ;;  %v4846_v44 = vmax.f32 %v4039_v14, 0.0  ;;  %v935_v63 = vrot.slane %v3887_v62, 2  ;;  %v4847_v13 = vmax.f32 %v3857_v47, 0.0 }
  0x34   : > { %v4094_v22 = vpack.c.bf16 %v411_v36, %v409_v39  ;;  %v417_v16 = vrot.slane %v4066_v31, 1  ;;  %v418_v17 = vrot.slane %v4068_v41, 1  ;;  %v4849_v33 = vmax.f32 %v4049_v26, 0.0 }
  0x35   : > { %3157 = vmatmul.mubr.msk.bf16.gmra.mrb[12].mxu1 %vm487_vm2, %v3996_v2  ;;  %v223_v2 = vld [vmem:[%s3792_s25 + $0x140] sm:$0xff]  ;;  %v415_v53 = vrot.slane %v4846_v44, 1  ;;  %v937_v15 = vrot.slane %v4847_v13, 2  ;;  %v4100_v38 = vpack.c.bf16 %v933_v18, %v931_v3  ;;  %v939_v44 = vrot.slane %v3890_v0, 2 }
  0x36   : > { %3160 = vmatprep.mubr.msk.bf16.mxu1 %vm487_vm2, %v4029_v43  ;;  %4848 = vst [vmem:[#allocation15_spill] sm:$0xff] %v4094_v22  ;;  %v420_v48 = vrot.slane %v4849_v33, 1  ;;  %v940_v32 = vrot.slane %v3898_v6, 2  ;;  %v4851_v47 = vmax.f32 %v3866_v54, 0.0  ;;  %v1918_v36 = vsel %vm536_vm0, %v3871_v55, 0 }
  0x37   : > { %3293 = vmatmul.mubr.msk.bf16.gmra.mrb[12].mxu0 %vm487_vm2, %v4029_v43  ;;  %v222_v43 = vld [vmem:[%s3792_s25 + $0x138] sm:$0xff]  ;;  %4850 = vst [vmem:[#allocation16_spill] sm:$0xff] %v4100_v38  ;;  %v4824_v33 = vmax.f32 %v4092_v24, 0.0  ;;  %v4116_v3 = vld [vmem:[%s3792_s25 + $0x160] sm:$0x3]  ;;  %v414_v18 = vsel %vm356_vm1, %v412_v7, %v413_v42  ;;  %v416_v54 = vsel %vm356_vm1, %v413_v42, %v415_v53  ;;  %v938_v25 = vsel %vm913_vm3, %v935_v63, %v937_v15 }
  0x38   : > { %3314 = vmatprep.mubr.msk.bf16.mxu0 %vm487_vm2, %v4033_v61  ;;  %v942_v13 = vrot.slane %v4851_v47, 2  ;;  %v4110_v39 = vmax.f32 %v222_v43, 0.0  ;;  %v4112_v61 = vmax.f32 %v223_v2, 0.0  ;;  %4852 = vst [vmem:[#allocation17_spill] sm:$0xff] %v4116_v3  ;;  %v936_v47 = vsel %vm913_vm3, %v934_v11, %v935_v63  ;;  %v4127_v55 = vld [vmem:[%s4800_s1 + $0xe] sm:$0x3] }
  0x39   : > { %4853 = vst [vmem:[#allocation18_spill] sm:$0xff] %v4127_v55  ;;  %v419_v2 = vsel %vm356_vm1, %v417_v16, %v418_v17  ;;  %v421_v43 = vsel %vm356_vm1, %v418_v17, %v420_v48  ;;  %v4135_v7 = vmax.f32 %v225_v56, 0.0  ;;  %v4137_v11 = vmax.f32 %v226_v1, 0.0 }
  0x3a   : > { %v941_v42 = vsel %vm913_vm3, %v939_v44, %v940_v32  ;;  %v943_v53 = vsel %vm913_vm3, %v940_v32, %v942_v13  ;;  %v944_v63 = vrot.slane %v3916_v28, 2  ;;  %v422_v56 = vrot.slane %v4110_v39, 1 }
  0x3b   : > { %v423_v1 = vrot.slane %v4112_v61, 1  ;;  %v425_v48 = vrot.slane %v4824_v33, 1  ;;  %v945_v16 = vrot.slane %v3927_v35, 2  ;;  %v4152_v17 = vpack.c.bf16 %v416_v54, %v414_v18 }
  0x3c   : > { %v4154_v32 = vpack.c.bf16 %v938_v25, %v936_v47  ;;  %v4156_v44 = vpack.c.bf16 %v421_v43, %v419_v2  ;;  %v4854_v13 = vmax.f32 %v3910_v20, 0.0  ;;  %v4160_v15 = vpack.c.bf16 %v943_v53, %v941_v42 }
  0x3d   : > { %3161 = vmatmul.mubr.msk.bf16.gmra.mrb[16].mxu1 %vm487_vm2, %v4073_v57  ;;  %v428_v33 = vrot.slane %v4137_v11, 1  ;;  %v228_v57 = vld [vmem:[%s3792_s25 + $0x168] sm:$0xff]  ;;  %v4855_v25 = vmax.f32 %v4116_v3, 0.0  ;;  %v949_v47 = vrot.slane %v3949_v51, 2  ;;  %v950_v20 = vrot.slane %v3953_v58, 2 }
  0x3e   : > { %3164 = vmatprep.mubr.msk.bf16.mxu1 %vm487_vm2, %v4094_v22  ;;  %v427_v22 = vrot.slane %v4135_v7, 1  ;;  %v4856_v2 = vmax.f32 %v3931_v37, 0.0  ;;  %v424_v42 = vsel %vm356_vm1, %v422_v56, %v423_v1  ;;  %v426_v53 = vsel %vm356_vm1, %v423_v1, %v425_v48 }
  0x3f   : > { %3315 = vmatmul.mubr.msk.bf16.vlgmr.msra.gmra.mrb[0].mxu0 %vm487_vm2, %v4075_v12  ;;  %v4167_v12 = vld [vmem:[%s3792_s25 + $0x178] sm:$0x3]  ;;  %v430_v54 = vrot.slane %v4855_v25, 1  ;;  %v4204_v1 = vpack.c.bf16 %v3862_v52, %v3853_v45  ;;  %v4206_v48 = vpack.c.bf16 %v426_v53, %v424_v42  ;;  %v955_v52 = vrot.slane %v3961_v5, 2 }
  0x40   : > { %3347 = vmatpush3.bf16.msra.mxu0 %v1918_v36  ;;  %3318 = vmatprep.mubr.msk.bf16.mxu0 %vm487_vm2, %v4100_v38  ;;  %v947_v36 = vrot.slane %v4854_v13, 2  ;;  %v229_v38 = vld [vmem:[%s3792_s25 + $0x170] sm:$0xff]  ;;  %v952_v43 = vrot.slane %v4856_v2, 2  ;;  %v946_v13 = vsel %vm913_vm3, %v944_v63, %v945_v16  ;;  %v284_v3 = vmax.f32 %v4167_v12, 0.0 }
  0x41   : > { %3714 = vmatprep.subr.msk.bf16.mxu0 %vm536_vm0, %v4127_v55  ;;  %v4183_v55 = vmax.f32 %v228_v57, 0.0  ;;  %v4185_v25 = vmax.f32 %v229_v38, 0.0  ;;  %v429_v37 = vsel %vm356_vm1, %v427_v22, %v428_v33  ;;  %v4195_v63 = vpack.c.bf16 %v3833_v30, %v3822_v23 }
  0x42   : > { %v948_v18 = vsel %vm913_vm3, %v945_v16, %v947_v36  ;;  %v431_v38 = vsel %vm356_vm1, %v428_v33, %v430_v54  ;;  %v951_v57 = vsel %vm913_vm3, %v949_v47, %v950_v20  ;;  %v953_v56 = vsel %vm913_vm3, %v950_v20, %v952_v43 }
  0x43   : > { %v4208_v22 = vpack.c.bf16 %v948_v18, %v946_v13  ;;  %v954_v23 = vrot.slane %v3959_v4, 2  ;;  %v432_v30 = vrot.slane %v4183_v55, 1  ;;  %v433_v16 = vrot.slane %v4185_v25, 1 }
  0x44   : > { %v435_v33 = vrot.slane %v284_v3, 1  ;;  %v4217_v36 = vpack.c.bf16 %v3887_v62, %v3877_v59  ;;  %v4219_v54 = vpack.c.bf16 %v431_v38, %v429_v37  ;;  %v4221_v45 = vpack.c.bf16 %v953_v56, %v951_v57 }
  0x45   : > { %3165 = vmatmul.mubr.msk.bf16.gmra.mrb[20].mxu1 %vm487_vm2, %v4152_v17  ;;  %v4857_v18 = vmax.f32 %v3941_v46, 0.0  ;;  %v959_v20 = vrot.slane %v3990_v49, 2  ;;  %v960_v2 = vrot.slane %v3992_v50, 2  ;;  %v4858_v43 = vmax.f32 %v3986_v40, 0.0 }
  0x46   : > { %3168 = vmatprep.mubr.msk.bf16.mxu1 %vm487_vm2, %v4156_v44  ;;  %v4232_v59 = vpack.c.bf16 %v3898_v6, %v3890_v0  ;;  %v4236_v62 = vpack.c.bf16 %v3927_v35, %v3916_v28  ;;  %v434_v46 = vsel %vm356_vm1, %v432_v30, %v433_v16  ;;  %v436_v53 = vsel %vm356_vm1, %v433_v16, %v435_v33 }
  0x47   : > { %3319 = vmatmul.mubr.msk.bf16.gmra.mrb[4].mxu0 %vm487_vm2, %v4154_v32  ;;  %v957_v47 = vrot.slane %v4857_v18, 2  ;;  %v962_v42 = vrot.slane %v4858_v43, 2  ;;  %v956_v0 = vsel %vm913_vm3, %v954_v23, %v955_v52  ;;  %v961_v28 = vsel %vm913_vm3, %v959_v20, %v960_v2 }
  0x48   : > { %3322 = vmatprep.mubr.msk.bf16.mxu0 %vm487_vm2, %v4160_v15  ;;  %v4254_v40 = vpack.c.bf16 %v3953_v58, %v3949_v51  ;;  %v4859_v13 = vmax.f32 %v3797_v8, 0.0  ;;  %v4258_v38 = vpack.c.bf16 %v436_v53, %v434_v46  ;;  %v964_v57 = vrot.slane %v4022_v29, 2 }
  0x49   : > { %v958_v6 = vsel %vm913_vm3, %v955_v52, %v957_v47  ;;  %v963_v35 = vsel %vm913_vm3, %v960_v2, %v962_v42  ;;  %v4263_v56 = vpack.c.bf16 %v3961_v5, %v3959_v4  ;;  %v965_v30 = vrot.slane %v4024_v34, 2 }
  0x4a   : > { %v917_v37 = vrot.slane %v4859_v13, 2  ;;  %v4265_v23 = vpack.c.bf16 %v958_v6, %v956_v0  ;;  %v4270_v16 = vpack.c.bf16 %v3992_v50, %v3990_v49  ;;  %v4274_v8 = vpack.c.bf16 %v4024_v34, %v4022_v29 }
  0x4b   : > { %v4276_v51 = vpack.c.bf16 %v963_v35, %v961_v28  ;;  %v4860_v58 = vmax.f32 %v4002_v19, 0.0  ;;  %v4282_v4 = vpack.c.bf16 %v4059_v27, %v4055_v21  ;;  %v4286_v5 = vpack.c.bf16 %v4068_v41, %v4066_v31 }
  0x4c   : > { %v4290_v49 = vpack.c.bf16 %v4112_v61, %v4110_v39  ;;  %v4294_v50 = vpack.c.bf16 %v4137_v11, %v4135_v7  ;;  %v4298_v19 = vpack.c.bf16 %v4185_v25, %v4183_v55  ;;  %v914_v29 = vrot.slane %v3799_v9, 2 }
  0x4d   : > { %3169 = vmatmul.mubr.msk.bf16.gmra.mrb[24].mxu1 %vm487_vm2, %v4206_v48  ;;  %v967_v33 = vrot.slane %v4860_v58, 2  ;;  %v969_v34 = vrot.slane %v4055_v21, 2  ;;  %v970_v52 = vrot.slane %v4059_v27, 2  ;;  %v4861_v18 = vmax.f32 %v4039_v14, 0.0 }
  0x4e   : > { %3172 = vmatprep.mubr.msk.bf16.mxu1 %vm487_vm2, %v4219_v54  ;;  %v915_v20 = vrot.slane %v3801_v10, 2  ;;  %v4862_v2 = vpack.c.bf16 %v3801_v10, %v3799_v9  ;;  %v966_v14 = vsel %vm913_vm3, %v964_v57, %v965_v30  ;;  %v1093_v46 = vsel %vm536_vm0, %v3882_v60, 0  ;;  %v4347_v60 = vld [vmem:[%s4800_s1 + $0x6] sm:$0x3] }
  0x4f   : > { %3323 = vmatmul.mubr.msk.bf16.gmra.mrb[8].mxu0 %vm487_vm2, %v4208_v22  ;;  %v972_v47 = vrot.slane %v4861_v18, 2  ;;  %v968_v43 = vsel %vm913_vm3, %v965_v30, %v967_v33  ;;  %v971_v9 = vsel %vm913_vm3, %v969_v34, %v970_v52  ;;  %v974_v6 = vrot.slane %v4066_v31, 2  ;;  %v4865_v33 = vld [vmem:[#allocation4_spill] sm:$0xff] }
  0x50   : > { %3326 = vmatprep.mubr.msk.bf16.mxu0 %vm487_vm2, %v4221_v45  ;;  %v4315_v21 = vsel %vm913_vm3, %v914_v29, %v915_v20  ;;  %v4318_v27 = vsel %vm913_vm3, %v915_v20, %v917_v37  ;;  %v4330_v53 = vpack.c.bf16 %v968_v43, %v966_v14  ;;  %v975_v28 = vrot.slane %v4068_v41, 2  ;;  %v231_v20 = vld [vmem:[%s3792_s25 + $0x180] sm:$0xff] }
  0x51   : > { %v1026_v42 = vpack.c.bf16 %v4318_v27, %v4315_v21  ;;  %v973_v10 = vsel %vm913_vm3, %v970_v52, %v972_v47  ;;  %v4863_v35 = vmax.f32 %v4049_v26, 0.0  ;;  %v979_v37 = vrot.slane %v4110_v39, 2  ;;  %v4866_v52 = vld [vmem:[#allocation17_spill] sm:$0xff]  ;;  %v4871_v21 = vld [vmem:[#allocation2_spill] sm:$0xff]  ;;  %v4872_v27 = vld [vmem:[#allocation16_spill] sm:$0xff] }
  0x52   : > { %v4332_v0 = vpack.c.bf16 %v973_v10, %v971_v9  ;;  %v980_v57 = vrot.slane %v4112_v61, 2  ;;  %v4864_v30 = vmax.f32 %v4092_v24, 0.0  ;;  %v976_v61 = vsel %vm913_vm3, %v974_v6, %v975_v28  ;;  %v232_v9 = vld [vmem:[%s3792_s25 + $0x188] sm:$0xff]  ;;  %v233_v10 = vld [vmem:[%s3792_s25 + $0x190] sm:$0x3] }
  0x53   : > { %v977_v13 = vrot.slane %v4863_v35, 2  ;;  %v984_v39 = vrot.slane %v4135_v7, 2  ;;  %v985_v29 = vrot.slane %v4137_v11, 2  ;;  %v4867_v18 = vmax.f32 %v4866_v52, 0.0  ;;  %v4868_v52 = vld [vmem:[#allocation18_spill] sm:$0xff] }
  0x54   : > { %v982_v58 = vrot.slane %v4864_v30, 2  ;;  %v981_v31 = vsel %vm913_vm3, %v979_v37, %v980_v57  ;;  %v990_v14 = vrot.slane %v4185_v25, 2  ;;  %v992_v43 = vrot.slane %v284_v3, 2 }
  0x55   : > { %3173 = vmatmul.mubr.msk.bf16.gmra.mrb[28].mxu1 %vm487_vm2, %v4258_v38  ;;  %v978_v26 = vsel %vm913_vm3, %v975_v28, %v977_v13  ;;  %v987_v47 = vrot.slane %v4867_v18, 2  ;;  %v986_v7 = vsel %vm913_vm3, %v984_v39, %v985_v29  ;;  %v285_v12 = vmax.f32 %v231_v20, 0.0 }
  0x56   : > { %3178 = vmatprep.mubr.msk.bf16.mxu1 %vm487_vm2, %v4862_v2  ;;  %v983_v41 = vsel %vm913_vm3, %v980_v57, %v982_v58  ;;  %v4361_v24 = vpack.c.bf16 %v978_v26, %v976_v61  ;;  %v989_v2 = vrot.slane %v4183_v55, 2  ;;  %v286_v3 = vmax.f32 %v232_v9, 0.0 }
  0x57   : > { %3327 = vmatmul.mubr.msk.bf16.gmra.mrb[12].mxu0 %vm487_vm2, %v4265_v23  ;;  %v4365_v34 = vpack.c.bf16 %v983_v41, %v981_v31  ;;  %v988_v55 = vsel %vm913_vm3, %v985_v29, %v987_v47  ;;  %v287_v11 = vmax.f32 %v233_v10, 0.0  ;;  %v1702_v35 = vrot.slane %v285_v12, 2  ;;  %v2969_v47 = vld [vmem:[%s4800_s1 + $0x10] sm:$0x3] }
  0x58   : > { %3330 = vmatprep.mubr.msk.bf16.mxu0 %vm487_vm2, %v4276_v51  ;;  %v991_v25 = vsel %vm913_vm3, %v989_v2, %v990_v14  ;;  %v4388_v6 = vpack.c.bf16 %v988_v55, %v986_v7  ;;  %v1703_v13 = vrot.slane %v286_v3, 2  ;;  %v1493_v57 = vrot.slane %v285_v12, 1  ;;  %v4869_v2 = vld [vmem:[#allocation12_spill] sm:$0xff]  ;;  %v4873_v55 = vld [vmem:[#allocation5_spill] sm:$0xff] }
  0x59   : > { %v1705_v37 = vrot.slane %v287_v11, 2  ;;  %v1494_v30 = vrot.slane %v286_v3, 1  ;;  %v1496_v58 = vrot.slane %v287_v11, 1  ;;  %v2130_v18 = vsel %vm536_vm0, %v4868_v52, 0  ;;  %v4875_v11 = vld [vmem:[#allocation7_spill] sm:$0xff] }
  0x5a   : > { %v1704_v61 = vsel %vm913_vm3, %v1702_v35, %v1703_v13  ;;  %v1295_v20 = vsel %vm536_vm0, %v4347_v60, 0  ;;  %v4878_v35 = vld [vmem:[#allocation10_spill] sm:$0xff] }
  0x5b   : > { %v1706_v26 = vsel %vm913_vm3, %v1703_v13, %v1705_v37  ;;  %v1495_v31 = vsel %vm356_vm1, %v1493_v57, %v1494_v30  ;;  %v1497_v41 = vsel %vm356_vm1, %v1494_v30, %v1496_v58  ;;  %v4879_v13 = vld [vmem:[#allocation11_spill] sm:$0xff]  ;;  %v4880_v37 = vld [vmem:[#allocation13_spill] sm:$0xff] }
  0x5c   : > { %v4404_v39 = vpack.c.bf16 %v1497_v41, %v1495_v31  ;;  %v4406_v29 = vpack.c.bf16 %v1706_v26, %v1704_v61  ;;  %v4881_v57 = vld [vmem:[#allocation15_spill] sm:$0xff] }
  0x5d   : > { %3179 = vmatmul.mubr.msk.bf16.vlgmr.msra.gmra.mrb[0].mxu1 %vm487_vm2, %v4865_v33  ;;  %v4882_v30 = vld [vmem:[#allocation3_spill] sm:$0xff] }
  0x5e   : > { %3211 = vmatpush3.bf16.msra.mxu1 %v1093_v46  ;;  %3182 = vmatprep.mubr.msk.bf16.mxu1 %vm487_vm2, %v4195_v63  ;;  %v993_v46 = vsel %vm913_vm3, %v990_v14, %v992_v43  ;;  %v4870_v14 = vld [vmem:[#allocation14_spill] sm:$0xff]  ;;  %v236_v58 = vld [vmem:[%s3792_s25 + $0x1a8] sm:$0x3] }
  0x5f   : > { %3331 = vmatmul.mubr.msk.bf16.gmra.mrb[16].mxu0 %vm487_vm2, %v4330_v53  ;;  %3709 = vmatprep.subr.msk.bf16.mxu1 %vm536_vm0, %v4347_v60  ;;  %v4390_v28 = vpack.c.bf16 %v993_v46, %v991_v25  ;;  %v234_v60 = vld [vmem:[%s3792_s25 + $0x198] sm:$0xff]  ;;  %v235_v43 = vld [vmem:[%s3792_s25 + $0x1a0] sm:$0xff]  ;;  %v4876_v25 = vld [vmem:[#allocation8_spill] sm:$0xff] }
  0x60   : > { %3334 = vmatprep.mubr.msk.bf16.mxu0 %vm487_vm2, %v4332_v0  ;;  %v4486_v9 = vmax.f32 %v234_v60, 0.0  ;;  %v4488_v10 = vmax.f32 %v235_v43, 0.0  ;;  %v4877_v46 = vld [vmem:[#allocation9_spill] sm:$0xff] }
  0x62   : > { %v1911_v7 = vpack.c.bf16 %v4488_v10, %v4486_v9 }
  0x65   : > { %3183 = vmatmul.mubr.msk.bf16.gmra.mrb[4].mxu1 %vm487_vm2, %v4204_v1 }
  0x66   : > { %3186 = vmatprep.mubr.msk.bf16.mxu1 %vm487_vm2, %v4217_v36 }
  0x67   : > { %3335 = vmatmul.mubr.msk.bf16.gmra.mrb[20].mxu0 %vm487_vm2, %v4361_v24 }
  0x68   : > { %3338 = vmatprep.mubr.msk.bf16.mxu0 %vm487_vm2, %v4365_v34 }
  0x6d   : > { %3187 = vmatmul.mubr.msk.bf16.gmra.mrb[8].mxu1 %vm487_vm2, %v4232_v59 }
  0x6e   : > { %3190 = vmatprep.mubr.msk.bf16.mxu1 %vm487_vm2, %v4236_v62 }
  0x6f   : > { %3339 = vmatmul.mubr.msk.bf16.gmra.mrb[24].mxu0 %vm487_vm2, %v4388_v6 }
  0x70   : > { %3342 = vmatprep.mubr.msk.bf16.mxu0 %vm487_vm2, %v4390_v28 }
  0x75   : > { %3191 = vmatmul.mubr.msk.bf16.gmra.mrb[12].mxu1 %vm487_vm2, %v4254_v40 }
  0x76   : > { %3194 = vmatprep.mubr.msk.bf16.mxu1 %vm487_vm2, %v4263_v56 }
  0x77   : > { %3343 = vmatmul.mubr.msk.bf16.gmra.mrb[28].mxu0 %vm487_vm2, %v4406_v29 }
  0x78   : > { %3348 = vmatprep.mubr.msk.bf16.mxu0 %vm487_vm2, %v4195_v63 }
  0x7d   : > { %3195 = vmatmul.mubr.msk.bf16.gmra.mrb[16].mxu1 %vm487_vm2, %v4270_v16 }
  0x7e   : > { %3198 = vmatprep.mubr.msk.bf16.mxu1 %vm487_vm2, %v4274_v8 }
  0x7f   : > { %3349 = vmatmul.mubr.msk.bf16.vlgmr.msra.gmra.mrb[0].mxu0 %vm487_vm2, %v4204_v1 }
  0x80   : > { %3381 = vmatpush3.bf16.msra.mxu0 %v2130_v18  ;;  %3352 = vmatprep.mubr.msk.bf16.mxu0 %vm487_vm2, %v4217_v36 }
  0x81   : > { %3715 = vmatprep.subr.msk.bf16.mxu0 %vm536_vm0, %v2969_v47 }
  0x85   : > { %3199 = vmatmul.mubr.msk.bf16.gmra.mrb[20].mxu1 %vm487_vm2, %v4282_v4 }
  0x86   : > { %3202 = vmatprep.mubr.msk.bf16.mxu1 %vm487_vm2, %v4286_v5 }
  0x87   : > { %3353 = vmatmul.mubr.msk.bf16.gmra.mrb[4].mxu0 %vm487_vm2, %v4232_v59 }
  0x88   : > { %3356 = vmatprep.mubr.msk.bf16.mxu0 %vm487_vm2, %v4236_v62 }
  0x8d   : > { %3203 = vmatmul.mubr.msk.bf16.gmra.mrb[24].mxu1 %vm487_vm2, %v4290_v49 }
  0x8e   : > { %3206 = vmatprep.mubr.msk.bf16.mxu1 %vm487_vm2, %v4294_v50 }
  0x8f   : > { %3357 = vmatmul.mubr.msk.bf16.gmra.mrb[8].mxu0 %vm487_vm2, %v4254_v40 }
  0x90   : > { %3360 = vmatprep.mubr.msk.bf16.mxu0 %vm487_vm2, %v4263_v56 }
  0x95   : > { %3207 = vmatmul.mubr.msk.bf16.gmra.mrb[28].mxu1 %vm487_vm2, %v4298_v19 }
  0x96   : > { %3212 = vmatprep.mubr.msk.bf16.mxu1 %vm487_vm2, %v1026_v42  ;;  %v4476_v42 = vpack.c.bf16 %v286_v3, %v285_v12  ;;  %v2339_v12 = vsel %vm536_vm0, %v2969_v47, 0  ;;  %v4874_v3 = vld [vmem:[#allocation6_spill] sm:$0xff] }
  0x97   : > { %3361 = vmatmul.mubr.msk.bf16.gmra.mrb[12].mxu0 %vm487_vm2, %v4270_v16 }
  0x98   : > { %3364 = vmatprep.mubr.msk.bf16.mxu0 %vm487_vm2, %v4274_v8 }
  0x9d   : > { %3213 = vmatmul.mubr.msk.bf16.vlgmr.msra.gmra.mrb[0].mxu1 %vm487_vm2, %v4869_v2 }
  0x9e   : > { %3245 = vmatpush3.bf16.msra.mxu1 %v1295_v20  ;;  %3216 = vmatprep.mubr.msk.bf16.mxu1 %vm487_vm2, %v4870_v14 }
  0x9f   : > { %3365 = vmatmul.mubr.msk.bf16.gmra.mrb[16].mxu0 %vm487_vm2, %v4282_v4  ;;  %3711 = vmatprep.subr.msk.bf16.mxu1 %vm536_vm0, %v4871_v21 }
  0xa0   : > { %3368 = vmatprep.mubr.msk.bf16.mxu0 %vm487_vm2, %v4286_v5 }
  0xa5   : > { %3217 = vmatmul.mubr.msk.bf16.gmra.mrb[4].mxu1 %vm487_vm2, %v4872_v27 }
  0xa6   : > { %3220 = vmatprep.mubr.msk.bf16.mxu1 %vm487_vm2, %v4154_v32 }
  0xa7   : > { %3369 = vmatmul.mubr.msk.bf16.gmra.mrb[20].mxu0 %vm487_vm2, %v4290_v49 }
  0xa8   : > { %3372 = vmatprep.mubr.msk.bf16.mxu0 %vm487_vm2, %v4294_v50 }
  0xad   : > { %3221 = vmatmul.mubr.msk.bf16.gmra.mrb[8].mxu1 %vm487_vm2, %v4160_v15 }
  0xae   : > { %3224 = vmatprep.mubr.msk.bf16.mxu1 %vm487_vm2, %v4208_v22 }
  0xaf   : > { %3373 = vmatmul.mubr.msk.bf16.gmra.mrb[24].mxu0 %vm487_vm2, %v4298_v19 }
  0xb0   : > { %3376 = vmatprep.mubr.msk.bf16.mxu0 %vm487_vm2, %v4476_v42 }
  0xb5   : > { %3225 = vmatmul.mubr.msk.bf16.gmra.mrb[12].mxu1 %vm487_vm2, %v4221_v45 }
  0xb6   : > { %3228 = vmatprep.mubr.msk.bf16.mxu1 %vm487_vm2, %v4265_v23 }
  0xb7   : > { %3377 = vmatmul.mubr.msk.bf16.gmra.mrb[28].mxu0 %vm487_vm2, %v1911_v7 }
  0xb8   : > { %3382 = vmatprep.mubr.msk.bf16.mxu0 %vm487_vm2, %v4873_v55 }
  0xbd   : > { %3229 = vmatmul.mubr.msk.bf16.gmra.mrb[16].mxu1 %vm487_vm2, %v4276_v51 }
  0xbe   : > { %3232 = vmatprep.mubr.msk.bf16.mxu1 %vm487_vm2, %v4330_v53 }
  0xbf   : > { %3383 = vmatmul.mubr.msk.bf16.vlgmr.msra.gmra.mrb[0].mxu0 %vm487_vm2, %v4874_v3 }
  0xc0   : > { %3415 = vmatpush3.bf16.msra.mxu0 %v2339_v12  ;;  %3386 = vmatprep.mubr.msk.bf16.mxu0 %vm487_vm2, %v4875_v11 }
  0xc5   : > { %3233 = vmatmul.mubr.msk.bf16.gmra.mrb[20].mxu1 %vm487_vm2, %v4332_v0 }
  0xc6   : > { %3236 = vmatprep.mubr.msk.bf16.mxu1 %vm487_vm2, %v4361_v24 }
  0xc7   : > { %3387 = vmatmul.mubr.msk.bf16.gmra.mrb[4].mxu0 %vm487_vm2, %v4876_v25 }
  0xc8   : > { %3390 = vmatprep.mubr.msk.bf16.mxu0 %vm487_vm2, %v4877_v46 }
  0xcd   : > { %3237 = vmatmul.mubr.msk.bf16.gmra.mrb[24].mxu1 %vm487_vm2, %v4365_v34 }
  0xce   : > { %3240 = vmatprep.mubr.msk.bf16.mxu1 %vm487_vm2, %v4388_v6 }
  0xcf   : > { %3391 = vmatmul.mubr.msk.bf16.gmra.mrb[8].mxu0 %vm487_vm2, %v4878_v35 }
  0xd0   : > { %3394 = vmatprep.mubr.msk.bf16.mxu0 %vm487_vm2, %v4879_v13 }
  0xd5   : > { %3241 = vmatmul.mubr.msk.bf16.gmra.mrb[28].mxu1 %vm487_vm2, %v4390_v28 }
  0xd6   : > { %3246 = vmatprep.mubr.msk.bf16.mxu1 %vm487_vm2, %v4865_v33  ;;  %v2116_v33 = vrot.slane %v4486_v9, 1 }
  0xd7   : > { %3395 = vmatmul.mubr.msk.bf16.gmra.mrb[12].mxu0 %vm487_vm2, %v4880_v37 }
  0xd8   : > { %3398 = vmatprep.mubr.msk.bf16.mxu0 %vm487_vm2, %v4881_v57 }
  0xdd   : > { %3247 = vmatmul.mubr.msk.bf16.vlgmr.msra.gmra.mrb[0].mxu1 %vm487_vm2, %v4195_v63  ;;  %v290_v63 = vmax.f32 %v236_v58, 0.0 }
  0xde   : > { %3449 = vmatpush3.bf16.msra.mxu1 %v4882_v30  ;;  %3250 = vmatprep.mubr.msk.bf16.mxu1 %vm487_vm2, %v4204_v1  ;;  %v2117_v1 = vrot.slane %v4488_v10, 1 }
  0xdf   : > { %3399 = vmatmul.mubr.msk.bf16.gmra.mrb[16].mxu0 %vm487_vm2, %v4152_v17  ;;  %v2119_v61 = vrot.slane %v290_v63, 1 }
  0xe0   : > { %3402 = vmatprep.mubr.msk.bf16.mxu0 %vm487_vm2, %v4156_v44 }
  0xe5   : > { %3251 = vmatmul.mubr.msk.bf16.gmra.mrb[4].mxu1 %vm487_vm2, %v4217_v36  ;;  %v2118_v36 = vsel %vm356_vm1, %v2116_v33, %v2117_v1 }
  0xe6   : > { %3254 = vmatprep.mubr.msk.bf16.mxu1 %vm487_vm2, %v4232_v59  ;;  %v2120_v59 = vsel %vm356_vm1, %v2117_v1, %v2119_v61 }
  0xe7   : > { %3403 = vmatmul.mubr.msk.bf16.gmra.mrb[20].mxu0 %vm487_vm2, %v4206_v48  ;;  %v2123_v26 = vpack.c.bf16 %v2120_v59, %v2118_v36 }
  0xe8   : > { %3406 = vmatprep.mubr.msk.bf16.mxu0 %vm487_vm2, %v4219_v54 }
  0xed   : > { %3255 = vmatmul.mubr.msk.bf16.gmra.mrb[8].mxu1 %vm487_vm2, %v4236_v62 }
  0xee   : > { %3258 = vmatprep.mubr.msk.bf16.mxu1 %vm487_vm2, %v4254_v40 }
  0xef   : > { %3407 = vmatmul.mubr.msk.bf16.gmra.mrb[24].mxu0 %vm487_vm2, %v4258_v38 }
  0xf0   : > { %3410 = vmatprep.mubr.msk.bf16.mxu0 %vm487_vm2, %v4404_v39 }
  0xf5   : > { %3259 = vmatmul.mubr.msk.bf16.gmra.mrb[12].mxu1 %vm487_vm2, %v4263_v56 }
  0xf6   : > { %3262 = vmatprep.mubr.msk.bf16.mxu1 %vm487_vm2, %v4270_v16 }
  0xf7   : > { %3411 = vmatmul.mubr.msk.bf16.gmra.mrb[28].mxu0 %vm487_vm2, %v2123_v26 }
  0xf8   : > { %3416 = vmatprep.mubr.msk.bf16.mxu0 %vm487_vm2, %v4870_v14 }
  0xfd   : > { %3263 = vmatmul.mubr.msk.bf16.gmra.mrb[16].mxu1 %vm487_vm2, %v4274_v8 }
  0xfe   : > { %3266 = vmatprep.mubr.msk.bf16.mxu1 %vm487_vm2, %v4282_v4 }
  0xff   : > { %3417 = vmatmul.mubr.msk.bf16.vlgmr.msra.gmra.mrb[0].mxu0 %vm487_vm2, %v4872_v27 }
 0x100   : > { %3420 = vmatprep.mubr.msk.bf16.mxu0 %vm487_vm2, %v4154_v32  ;;  %v2326_v32 = vrot.slane %v4488_v10, 2 }
 0x105   : > { %3267 = vmatmul.mubr.msk.bf16.gmra.mrb[20].mxu1 %vm487_vm2, %v4286_v5 }
 0x106   : > { %3270 = vmatprep.mubr.msk.bf16.mxu1 %vm487_vm2, %v4290_v49 }
 0x107   : > { %3421 = vmatmul.mubr.msk.bf16.gmra.mrb[4].mxu0 %vm487_vm2, %v4160_v15  ;;  %v2325_v15 = vrot.slane %v4486_v9, 2 }
 0x108   : > { %3424 = vmatprep.mubr.msk.bf16.mxu0 %vm487_vm2, %v4208_v22 }
 0x10d   : > { %3271 = vmatmul.mubr.msk.bf16.gmra.mrb[24].mxu1 %vm487_vm2, %v4294_v50 }
 0x10e   : > { %3274 = vmatprep.mubr.msk.bf16.mxu1 %vm487_vm2, %v4298_v19 }
 0x10f   : > { %3425 = vmatmul.mubr.msk.bf16.gmra.mrb[8].mxu0 %vm487_vm2, %v4221_v45 }
 0x110   : > { %3428 = vmatprep.mubr.msk.bf16.mxu0 %vm487_vm2, %v4265_v23 }
 0x115   : > { %3275 = vmatmul.mubr.msk.bf16.gmra.mrb[28].mxu1 %vm487_vm2, %v4476_v42 }
 0x116   : > { %3296 = vmatprep.mubr.msk.bf16.mxu1 %vm487_vm2, %v4880_v37 }
 0x117   : > { %3429 = vmatmul.mubr.msk.bf16.gmra.mrb[12].mxu0 %vm487_vm2, %v4276_v51 }
 0x118   : > { %3432 = vmatprep.mubr.msk.bf16.mxu0 %vm487_vm2, %v4330_v53 }
 0x11d   : > { %3297 = vmatmul.mubr.msk.bf16.vlgmr.msra.gmra.mrb[16].mxu1 %vm487_vm2, %v4881_v57 }
 0x11e   : > { %3300 = vmatprep.mubr.msk.bf16.mxu1 %vm487_vm2, %v4152_v17  ;;  %v2328_v17 = vrot.slane %v290_v63, 2 }
 0x11f   : > { %3433 = vmatmul.mubr.msk.bf16.gmra.mrb[16].mxu0 %vm487_vm2, %v4332_v0 }
 0x120   : > { %3436 = vmatprep.mubr.msk.bf16.mxu0 %vm487_vm2, %v4361_v24 }
 0x125   : > { %3301 = vmatmul.mubr.msk.bf16.gmra.mrb[20].mxu1 %vm487_vm2, %v4156_v44  ;;  %v2327_v44 = vsel %vm913_vm3, %v2325_v15, %v2326_v32 }
 0x126   : > { %3304 = vmatprep.mubr.msk.bf16.mxu1 %vm487_vm2, %v4206_v48  ;;  %v2329_v48 = vsel %vm913_vm3, %v2326_v32, %v2328_v17 }
 0x127   : > { %3437 = vmatmul.mubr.msk.bf16.gmra.mrb[20].mxu0 %vm487_vm2, %v4365_v34  ;;  %v2332_v22 = vpack.c.bf16 %v2329_v48, %v2327_v44 }
 0x128   : > { %3440 = vmatprep.mubr.msk.bf16.mxu0 %vm487_vm2, %v4388_v6 }
 0x12d   : > { %3305 = vmatmul.mubr.msk.bf16.gmra.mrb[24].mxu1 %vm487_vm2, %v4219_v54 }
 0x12e   : > { %3308 = vmatprep.mubr.msk.bf16.mxu1 %vm487_vm2, %v4258_v38 }
 0x12f   : > { %3441 = vmatmul.mubr.msk.bf16.gmra.mrb[24].mxu0 %vm487_vm2, %v4390_v28 }
 0x130   : > { %3444 = vmatprep.mubr.msk.bf16.mxu0 %vm487_vm2, %v4406_v29 }
 0x135   : > { %3309 = vmatmul.mubr.msk.bf16.gmra.mrb[28].mxu1 %vm487_vm2, %v4404_v39 }
 0x137   : > { %3445 = vmatmul.mubr.msk.bf16.gmra.mrb[28].mxu0 %vm487_vm2, %v2332_v22 }
 0x1b0   : > { %v3248_v54 = vpop.f32.mrb[0].mxu1 }
 0x1b1   : > { %v1331_v45 = vpop.f32.mrb[1].mxu1 }
 0x1b2   : > { %v3249_v62 = vpop.f32.mrb[2].mxu1 }
 0x1b3   : > { %v1334_v40 = vpop.f32.mrb[3].mxu1 }
 0x1b8   : > { %v3252_v56 = vpop.f32.mrb[4].mxu1 }
 0x1b9   : > { %v1347_v38 = vpop.f32.mrb[5].mxu1 }
 0x1ba   : > { %v3253_v23 = vpop.f32.mrb[6].mxu1 }
 0x1bb   : > { %v1350_v16 = vpop.f32.mrb[7].mxu1 }
 0x1c0   : > { %v4634_v8 = vpop.f32.mrb[8].mxu1 }
 0x1c1   : > { %v4636_v51 = vpop.f32.mrb[9].mxu1 }
 0x1c2   : > { %v4638_v4 = vpop.f32.mrb[10].mxu1 }
 0x1c3   : > { %v4640_v5 = vpop.f32.mrb[11].mxu1 }
 0x1c8   : > { %v4642_v49 = vpop.f32.mrb[12].mxu1 }
 0x1c9   : > { %v4644_v50 = vpop.f32.mrb[13].mxu1 }
 0x1ca   : > { %v4646_v19 = vpop.f32.mrb[14].mxu1 }
 0x1cb   : > { %v4648_v53 = vpop.f32.mrb[15].mxu1 }
 0x1d2   : > { %v3418_v0 = vpop.f32.mrb[0].mxu0 }
 0x1d3   : > { %v3450_v24 = vadd.f32 %v3418_v0, %v3248_v54  ;;  %v2375_v34 = vpop.f32.mrb[1].mxu0 }
 0x1d4   : > { %v3451_v6 = vadd.f32 %v2375_v34, %v1331_v45  ;;  %v3419_v28 = vpop.f32.mrb[2].mxu0 }
 0x1d5   : > { %2536 = vst.msk [vmem:[%s4654_s14 + $0x10] sm:$0xff] %vm487_vm2, %v3450_v24  ;;  %v3452_v31 = vadd.f32 %v3419_v28, %v3249_v62  ;;  %v2378_v41 = vpop.f32.mrb[3].mxu0  ;;  %v2639_v52 = vmul.f32 %v3450_v24, %v3450_v24  ;;  %v2569_v21 = vsel %vm487_vm2, %v3450_v24, 0.0 }
 0x1d6   : > { %2534 = vst.msk [vmem:[%s4654_s14] sm:$0xff] %vm487_vm2, %v3451_v6  ;;  %v2637_v39 = vmul.f32 %v3451_v6, %v3451_v6  ;;  %v3453_v29 = vadd.f32 %v2378_v41, %v1334_v40  ;;  %v2566_v18 = vsel %vm487_vm2, %v3451_v6, 0.0 }
 0x1d7   : > { %2537 = vst.msk [vmem:[%s4654_s14 + $0x18] sm:$0xff] %vm487_vm2, %v3452_v31  ;;  %v2640_v2 = vmul.f32 %v3452_v31, %v3452_v31  ;;  %v2672_v55 = vsel %vm487_vm2, %v2639_v52, 0.0  ;;  %v2571_v12 = vsel %vm487_vm2, %v3452_v31, 0.0 }
 0x1d8   : > { %2535 = vst.msk [vmem:[%s4654_s14 + $0x8] sm:$0xff] %vm487_vm2, %v3453_v29  ;;  %v2567_v47 = vsel %vm487_vm2, %v3453_v29, 0.0  ;;  %v2638_v20 = vmul.f32 %v3453_v29, %v3453_v29  ;;  %v2669_v27 = vsel %vm487_vm2, %v2637_v39, 0.0 }
 0x1d9   : > { %v2568_v14 = vadd.f32 %v2567_v47, %v2566_v18  ;;  %v2674_v25 = vsel %vm487_vm2, %v2640_v2, 0.0 }
 0x1da   : > { %v2670_v42 = vsel %vm487_vm2, %v2638_v20, 0.0  ;;  %v3422_v60 = vpop.f32.mrb[4].mxu0 }
 0x1db   : > { %v2570_v43 = vadd.f32 %v2569_v21, %v2568_v14  ;;  %v2671_v9 = vadd.f32 %v2670_v42, %v2669_v27  ;;  %v3454_v10 = vadd.f32 %v3422_v60, %v3252_v56  ;;  %v2391_v7 = vpop.f32.mrb[5].mxu0 }
 0x1dc   : > { %v3455_v3 = vadd.f32 %v2391_v7, %v1347_v38  ;;  %v3423_v11 = vpop.f32.mrb[6].mxu0 }
 0x1dd   : > { %v2673_v46 = vadd.f32 %v2672_v55, %v2671_v9  ;;  %2540 = vst.msk [vmem:[%s4654_s14 + $0x30] sm:$0xff] %vm487_vm2, %v3454_v10  ;;  %v2572_v35 = vadd.f32 %v2571_v12, %v2570_v43  ;;  %v2394_v13 = vpop.f32.mrb[7].mxu0  ;;  %v3456_v30 = vadd.f32 %v3423_v11, %v3253_v23  ;;  %v2643_v36 = vmul.f32 %v3454_v10, %v3454_v10 }
 0x1de   : > { %2538 = vst.msk [vmem:[%s4654_s14 + $0x20] sm:$0xff] %vm487_vm2, %v3455_v3  ;;  %v2573_v37 = vsel %vm487_vm2, %v3455_v3, 0.0  ;;  %v2641_v57 = vmul.f32 %v3455_v3, %v3455_v3  ;;  %v3457_v58 = vadd.f32 %v2394_v13, %v1350_v16  ;;  %v2577_v32 = vsel %vm487_vm2, %v3454_v10, 0.0 }
 0x1df   : > { %v2574_v63 = vadd.f32 %v2573_v37, %v2572_v35  ;;  %v2675_v33 = vadd.f32 %v2674_v25, %v2673_v46  ;;  %2541 = vst.msk [vmem:[%s4654_s14 + $0x38] sm:$0xff] %vm487_vm2, %v3456_v30  ;;  %v2644_v44 = vmul.f32 %v3456_v30, %v3456_v30  ;;  %v2579_v62 = vsel %vm487_vm2, %v3456_v30, 0.0 }
 0x1e0   : > { %v2676_v1 = vsel %vm487_vm2, %v2641_v57, 0.0  ;;  %2539 = vst.msk [vmem:[%s4654_s14 + $0x28] sm:$0xff] %vm487_vm2, %v3457_v58  ;;  %v2575_v61 = vsel %vm487_vm2, %v3457_v58, 0.0  ;;  %v2642_v15 = vmul.f32 %v3457_v58, %v3457_v58  ;;  %v2680_v23 = vsel %vm487_vm2, %v2643_v36, 0.0 }
 0x1e1   : > { %v2677_v59 = vadd.f32 %v2676_v1, %v2675_v33  ;;  %v2576_v26 = vadd.f32 %v2575_v61, %v2574_v63 }
 0x1e2   : > { %v3426_v17 = vpop.f32.mrb[8].mxu0  ;;  %v2678_v22 = vsel %vm487_vm2, %v2642_v15, 0.0 }
 0x1e3   : > { %v2578_v48 = vadd.f32 %v2577_v32, %v2576_v26  ;;  %v3458_v54 = vadd.f32 %v3426_v17, %v4634_v8  ;;  %v2407_v45 = vpop.f32.mrb[9].mxu0  ;;  %v2679_v40 = vadd.f32 %v2678_v22, %v2677_v59 }
 0x1e4   : > { %v3459_v56 = vadd.f32 %v2407_v45, %v4636_v51  ;;  %v3427_v38 = vpop.f32.mrb[10].mxu0  ;;  %v2682_v51 = vsel %vm487_vm2, %v2644_v44, 0.0 }
 0x1e5   : > { %2544 = vst.msk [vmem:[%s4654_s14 + $0x50] sm:$0xff] %vm487_vm2, %v3458_v54  ;;  %v2580_v16 = vadd.f32 %v2579_v62, %v2578_v48  ;;  %v3460_v0 = vadd.f32 %v3427_v38, %v4638_v4  ;;  %v2410_v24 = vpop.f32.mrb[11].mxu0  ;;  %v2681_v34 = vadd.f32 %v2680_v23, %v2679_v40  ;;  %v2647_v52 = vmul.f32 %v3458_v54, %v3458_v54 }
 0x1e6   : > { %2542 = vst.msk [vmem:[%s4654_s14 + $0x40] sm:$0xff] %vm487_vm2, %v3459_v56  ;;  %v2581_v8 = vsel %vm487_vm2, %v3459_v56, 0.0  ;;  %v2645_v6 = vmul.f32 %v3459_v56, %v3459_v56  ;;  %v3461_v28 = vadd.f32 %v2410_v24, %v4640_v5  ;;  %v2585_v47 = vsel %vm487_vm2, %v3458_v54, 0.0 }
 0x1e7   : > { %v2582_v31 = vadd.f32 %v2581_v8, %v2580_v16  ;;  %2545 = vst.msk [vmem:[%s4654_s14 + $0x58] sm:$0xff] %vm487_vm2, %v3460_v0  ;;  %v2683_v41 = vadd.f32 %v2682_v51, %v2681_v34  ;;  %v2648_v14 = vmul.f32 %v3460_v0, %v3460_v0  ;;  %v2587_v60 = vsel %vm487_vm2, %v3460_v0, 0.0 }
 0x1e8   : > { %v2684_v39 = vsel %vm487_vm2, %v2645_v6, 0.0  ;;  %2543 = vst.msk [vmem:[%s4654_s14 + $0x48] sm:$0xff] %vm487_vm2, %v3461_v28  ;;  %v2583_v4 = vsel %vm487_vm2, %v3461_v28, 0.0  ;;  %v2646_v29 = vmul.f32 %v3461_v28, %v3461_v28  ;;  %v2688_v7 = vsel %vm487_vm2, %v2647_v52, 0.0 }
 0x1e9   : > { %v2584_v18 = vadd.f32 %v2583_v4, %v2582_v31  ;;  %v2685_v20 = vadd.f32 %v2684_v39, %v2683_v41 }
 0x1ea   : > { %v2686_v5 = vsel %vm487_vm2, %v2646_v29, 0.0  ;;  %v3430_v2 = vpop.f32.mrb[12].mxu0 }
 0x1eb   : > { %v2586_v21 = vadd.f32 %v2585_v47, %v2584_v18  ;;  %v3462_v27 = vadd.f32 %v3430_v2, %v4642_v49  ;;  %v2423_v42 = vpop.f32.mrb[13].mxu0  ;;  %v2687_v43 = vadd.f32 %v2686_v5, %v2685_v20 }
 0x1ec   : > { %v3463_v9 = vadd.f32 %v2423_v42, %v4644_v50  ;;  %v3431_v10 = vpop.f32.mrb[14].mxu0  ;;  %v2690_v50 = vsel %vm487_vm2, %v2648_v14, 0.0 }
 0x1ed   : > { %2548 = vst.msk [vmem:[%s4654_s14 + $0x70] sm:$0xff] %vm487_vm2, %v3462_v27  ;;  %v2588_v55 = vadd.f32 %v2587_v60, %v2586_v21  ;;  %v3464_v12 = vadd.f32 %v3431_v10, %v4646_v19  ;;  %v2426_v3 = vpop.f32.mrb[15].mxu0  ;;  %v2689_v11 = vadd.f32 %v2688_v7, %v2687_v43  ;;  %v2651_v30 = vmul.f32 %v3462_v27, %v3462_v27 }
 0x1ee   : > { %2546 = vst.msk [vmem:[%s4654_s14 + $0x60] sm:$0xff] %vm487_vm2, %v3463_v9  ;;  %v2589_v49 = vsel %vm487_vm2, %v3463_v9, 0.0  ;;  %v2649_v25 = vmul.f32 %v3463_v9, %v3463_v9  ;;  %v3465_v46 = vadd.f32 %v2426_v3, %v4648_v53  ;;  %v2593_v33 = vsel %vm487_vm2, %v3462_v27, 0.0 }
 0x1ef   : > { %v2590_v35 = vadd.f32 %v2589_v49, %v2588_v55  ;;  %2549 = vst.msk [vmem:[%s4654_s14 + $0x78] sm:$0xff] %vm487_vm2, %v3464_v12  ;;  %v2691_v13 = vadd.f32 %v2690_v50, %v2689_v11  ;;  %v2652_v59 = vmul.f32 %v3464_v12, %v3464_v12  ;;  %v2595_v44 = vsel %vm487_vm2, %v3464_v12, 0.0 }
 0x1f0   : > { %v2692_v37 = vsel %vm487_vm2, %v2649_v25, 0.0  ;;  %2547 = vst.msk [vmem:[%s4654_s14 + $0x68] sm:$0xff] %vm487_vm2, %v3465_v46  ;;  %v2591_v19 = vsel %vm487_vm2, %v3465_v46, 0.0  ;;  %v2650_v57 = vmul.f32 %v3465_v46, %v3465_v46  ;;  %v3298_v63 = vpop.f32.mrb[16].mxu1  ;;  %v2696_v62 = vsel %vm487_vm2, %v2651_v30, 0.0 }
 0x1f1   : > { %v2592_v58 = vadd.f32 %v2591_v19, %v2590_v35  ;;  %v2693_v53 = vadd.f32 %v2692_v37, %v2691_v13  ;;  %v1607_v36 = vpop.f32.mrb[17].mxu1  ;;  %v2698_v34 = vsel %vm487_vm2, %v2652_v59, 0.0 }
 0x1f2   : > { %v2694_v1 = vsel %vm487_vm2, %v2650_v57, 0.0  ;;  %v3434_v61 = vpop.f32.mrb[16].mxu0  ;;  %v3299_v17 = vpop.f32.mrb[18].mxu1 }
 0x1f3   : > { %v2594_v26 = vadd.f32 %v2593_v33, %v2592_v58  ;;  %v3466_v15 = vadd.f32 %v3434_v61, %v3298_v63  ;;  %v2439_v32 = vpop.f32.mrb[17].mxu0  ;;  %v2695_v48 = vadd.f32 %v2694_v1, %v2693_v53  ;;  %v1610_v45 = vpop.f32.mrb[19].mxu1 }
 0x1f4   : > { %v3467_v22 = vadd.f32 %v2439_v32, %v1607_v36  ;;  %v3435_v54 = vpop.f32.mrb[18].mxu0 }
 0x1f5   : > { %2552 = vst.msk [vmem:[%s4654_s14 + $0x90] sm:$0xff] %vm487_vm2, %v3466_v15  ;;  %v2596_v40 = vadd.f32 %v2595_v44, %v2594_v26  ;;  %v3468_v56 = vadd.f32 %v3435_v54, %v3299_v17  ;;  %v2442_v38 = vpop.f32.mrb[19].mxu0  ;;  %v2697_v23 = vadd.f32 %v2696_v62, %v2695_v48  ;;  %v2655_v41 = vmul.f32 %v3466_v15, %v3466_v15 }
 0x1f6   : > { %2550 = vst.msk [vmem:[%s4654_s14 + $0x80] sm:$0xff] %vm487_vm2, %v3467_v22  ;;  %v2597_v16 = vsel %vm487_vm2, %v3467_v22, 0.0  ;;  %v2653_v0 = vmul.f32 %v3467_v22, %v3467_v22  ;;  %v3469_v24 = vadd.f32 %v2442_v38, %v1610_v45  ;;  %v2601_v29 = vsel %vm487_vm2, %v3466_v15, 0.0 }
 0x1f7   : > { %v2598_v8 = vadd.f32 %v2597_v16, %v2596_v40  ;;  %2553 = vst.msk [vmem:[%s4654_s14 + $0x98] sm:$0xff] %vm487_vm2, %v3468_v56  ;;  %v2699_v6 = vadd.f32 %v2698_v34, %v2697_v23  ;;  %v2656_v5 = vmul.f32 %v3468_v56, %v3468_v56  ;;  %v2603_v42 = vsel %vm487_vm2, %v3468_v56, 0.0 }
 0x1f8   : > { %v2700_v28 = vsel %vm487_vm2, %v2653_v0, 0.0  ;;  %2551 = vst.msk [vmem:[%s4654_s14 + $0x88] sm:$0xff] %vm487_vm2, %v3469_v24  ;;  %v2599_v51 = vsel %vm487_vm2, %v3469_v24, 0.0  ;;  %v2654_v31 = vmul.f32 %v3469_v24, %v3469_v24  ;;  %v3302_v4 = vpop.f32.mrb[20].mxu1  ;;  %v2704_v7 = vsel %vm487_vm2, %v2655_v41, 0.0 }
 0x1f9   : > { %v2600_v39 = vadd.f32 %v2599_v51, %v2598_v8  ;;  %v2701_v52 = vadd.f32 %v2700_v28, %v2699_v6  ;;  %v1623_v20 = vpop.f32.mrb[21].mxu1  ;;  %v2706_v50 = vsel %vm487_vm2, %v2656_v5, 0.0 }
 0x1fa   : > { %v2702_v18 = vsel %vm487_vm2, %v2654_v31, 0.0  ;;  %v3438_v47 = vpop.f32.mrb[20].mxu0  ;;  %v3303_v27 = vpop.f32.mrb[22].mxu1 }
 0x1fb   : > { %v2602_v2 = vadd.f32 %v2601_v29, %v2600_v39  ;;  %v3470_v14 = vadd.f32 %v3438_v47, %v3302_v4  ;;  %v2455_v21 = vpop.f32.mrb[21].mxu0  ;;  %v2703_v60 = vadd.f32 %v2702_v18, %v2701_v52  ;;  %v1626_v10 = vpop.f32.mrb[23].mxu1 }
 0x1fc   : > { %v3471_v43 = vadd.f32 %v2455_v21, %v1623_v20  ;;  %v3439_v9 = vpop.f32.mrb[22].mxu0 }
 0x1fd   : > { %2556 = vst.msk [vmem:[%s4654_s14 + $0xb0] sm:$0xff] %vm487_vm2, %v3470_v14  ;;  %v2604_v55 = vadd.f32 %v2603_v42, %v2602_v2  ;;  %v3472_v12 = vadd.f32 %v3439_v9, %v3303_v27  ;;  %v2458_v3 = vpop.f32.mrb[23].mxu0  ;;  %v2705_v11 = vadd.f32 %v2704_v7, %v2703_v60  ;;  %v2659_v30 = vmul.f32 %v3470_v14, %v3470_v14 }
 0x1fe   : > { %2554 = vst.msk [vmem:[%s4654_s14 + $0xa0] sm:$0xff] %vm487_vm2, %v3471_v43  ;;  %v2605_v49 = vsel %vm487_vm2, %v3471_v43, 0.0  ;;  %v2657_v25 = vmul.f32 %v3471_v43, %v3471_v43  ;;  %v3473_v46 = vadd.f32 %v2458_v3, %v1626_v10  ;;  %v2609_v33 = vsel %vm487_vm2, %v3470_v14, 0.0 }
 0x1ff   : > { %v2606_v35 = vadd.f32 %v2605_v49, %v2604_v55  ;;  %2557 = vst.msk [vmem:[%s4654_s14 + $0xb8] sm:$0xff] %vm487_vm2, %v3472_v12  ;;  %v2707_v13 = vadd.f32 %v2706_v50, %v2705_v11  ;;  %v2660_v59 = vmul.f32 %v3472_v12, %v3472_v12  ;;  %v2611_v44 = vsel %vm487_vm2, %v3472_v12, 0.0 }
 0x200   : > { %v2708_v37 = vsel %vm487_vm2, %v2657_v25, 0.0  ;;  %2555 = vst.msk [vmem:[%s4654_s14 + $0xa8] sm:$0xff] %vm487_vm2, %v3473_v46  ;;  %v2607_v19 = vsel %vm487_vm2, %v3473_v46, 0.0  ;;  %v2658_v57 = vmul.f32 %v3473_v46, %v3473_v46  ;;  %v3306_v63 = vpop.f32.mrb[24].mxu1  ;;  %v2712_v62 = vsel %vm487_vm2, %v2659_v30, 0.0 }
 0x201   : > { %v2608_v58 = vadd.f32 %v2607_v19, %v2606_v35  ;;  %v2709_v53 = vadd.f32 %v2708_v37, %v2707_v13  ;;  %v1639_v36 = vpop.f32.mrb[25].mxu1  ;;  %v2714_v34 = vsel %vm487_vm2, %v2660_v59, 0.0 }
 0x202   : > { %v2710_v1 = vsel %vm487_vm2, %v2658_v57, 0.0  ;;  %v3442_v61 = vpop.f32.mrb[24].mxu0  ;;  %v3307_v17 = vpop.f32.mrb[26].mxu1 }
 0x203   : > { %v2610_v26 = vadd.f32 %v2609_v33, %v2608_v58  ;;  %v3474_v15 = vadd.f32 %v3442_v61, %v3306_v63  ;;  %v2471_v32 = vpop.f32.mrb[25].mxu0  ;;  %v2711_v48 = vadd.f32 %v2710_v1, %v2709_v53  ;;  %v1642_v45 = vpop.f32.mrb[27].mxu1 }
 0x204   : > { %v3475_v22 = vadd.f32 %v2471_v32, %v1639_v36  ;;  %v3443_v54 = vpop.f32.mrb[26].mxu0 }
 0x205   : > { %2560 = vst.msk [vmem:[%s4654_s14 + $0xd0] sm:$0xff] %vm487_vm2, %v3474_v15  ;;  %v2612_v40 = vadd.f32 %v2611_v44, %v2610_v26  ;;  %v3476_v56 = vadd.f32 %v3443_v54, %v3307_v17  ;;  %v2474_v38 = vpop.f32.mrb[27].mxu0  ;;  %v2713_v23 = vadd.f32 %v2712_v62, %v2711_v48  ;;  %v2663_v41 = vmul.f32 %v3474_v15, %v3474_v15 }
 0x206   : > { %2558 = vst.msk [vmem:[%s4654_s14 + $0xc0] sm:$0xff] %vm487_vm2, %v3475_v22  ;;  %v2613_v16 = vsel %vm487_vm2, %v3475_v22, 0.0  ;;  %v2661_v0 = vmul.f32 %v3475_v22, %v3475_v22  ;;  %v3477_v24 = vadd.f32 %v2474_v38, %v1642_v45  ;;  %v2617_v29 = vsel %vm487_vm2, %v3474_v15, 0.0 }
 0x207   : > { %v2614_v8 = vadd.f32 %v2613_v16, %v2612_v40  ;;  %2561 = vst.msk [vmem:[%s4654_s14 + $0xd8] sm:$0xff] %vm487_vm2, %v3476_v56  ;;  %v2715_v6 = vadd.f32 %v2714_v34, %v2713_v23  ;;  %v2664_v5 = vmul.f32 %v3476_v56, %v3476_v56  ;;  %v2619_v42 = vsel %vm487_vm2, %v3476_v56, 0.0 }
 0x208   : > { %v2716_v28 = vsel %vm487_vm2, %v2661_v0, 0.0  ;;  %2559 = vst.msk [vmem:[%s4654_s14 + $0xc8] sm:$0xff] %vm487_vm2, %v3477_v24  ;;  %v2615_v51 = vsel %vm487_vm2, %v3477_v24, 0.0  ;;  %v2662_v31 = vmul.f32 %v3477_v24, %v3477_v24  ;;  %v3310_v4 = vpop.f32.mrb[28].mxu1  ;;  %v2720_v7 = vsel %vm487_vm2, %v2663_v41, 0.0 }
 0x209   : > { %v2616_v39 = vadd.f32 %v2615_v51, %v2614_v8  ;;  %v2717_v52 = vadd.f32 %v2716_v28, %v2715_v6  ;;  %v1655_v20 = vpop.f32.mrb[29].mxu1  ;;  %v2722_v50 = vsel %vm487_vm2, %v2664_v5, 0.0 }
 0x20a   : > { %v2718_v18 = vsel %vm487_vm2, %v2662_v31, 0.0  ;;  %v3446_v47 = vpop.f32.mrb[28].mxu0  ;;  %v3311_v27 = vpop.f32.mrb[30].mxu1 }
 0x20b   : > { %v2618_v2 = vadd.f32 %v2617_v29, %v2616_v39  ;;  %v3478_v14 = vadd.f32 %v3446_v47, %v3310_v4  ;;  %v2487_v21 = vpop.f32.mrb[29].mxu0  ;;  %v2719_v60 = vadd.f32 %v2718_v18, %v2717_v52  ;;  %v1658_v10 = vpop.f32.mrb[31].mxu1 }
 0x20c   : > { %v3479_v43 = vadd.f32 %v2487_v21, %v1655_v20  ;;  %v3447_v9 = vpop.f32.mrb[30].mxu0 }
 0x20d   : > { %2564 = vst.msk [vmem:[%s4654_s14 + $0xf0] sm:$0xff] %vm487_vm2, %v3478_v14  ;;  %v2620_v55 = vadd.f32 %v2619_v42, %v2618_v2  ;;  %v3480_v12 = vadd.f32 %v3447_v9, %v3311_v27  ;;  %v2490_v3 = vpop.f32.mrb[31].mxu0  ;;  %v2721_v11 = vadd.f32 %v2720_v7, %v2719_v60  ;;  %v2667_v30 = vmul.f32 %v3478_v14, %v3478_v14 }
 0x20e   : > { %2562 = vst.msk [vmem:[%s4654_s14 + $0xe0] sm:$0xff] %vm487_vm2, %v3479_v43  ;;  %v2621_v49 = vsel %vm487_vm2, %v3479_v43, 0.0  ;;  %v2665_v25 = vmul.f32 %v3479_v43, %v3479_v43  ;;  %v3481_v46 = vadd.f32 %v2490_v3, %v1658_v10  ;;  %v2625_v63 = vsel %vm487_vm2, %v3478_v14, 0.0 }
 0x20f   : > { %v2622_v35 = vadd.f32 %v2621_v49, %v2620_v55  ;;  %2565 = vst.msk [vmem:[%s4654_s14 + $0xf8] sm:$0xff] %vm487_vm2, %v3480_v12  ;;  %v2723_v13 = vadd.f32 %v2722_v50, %v2721_v11  ;;  %v2668_v1 = vmul.f32 %v3480_v12, %v3480_v12  ;;  %v2627_v36 = vsel %vm487_vm2, %v3480_v12, 0.0 }
 0x210   : > { %v2724_v37 = vsel %vm487_vm2, %v2665_v25, 0.0  ;;  %2563 = vst.msk [vmem:[%s4654_s14 + $0xe8] sm:$0xff] %vm487_vm2, %v3481_v46  ;;  %v2623_v19 = vsel %vm487_vm2, %v3481_v46, 0.0  ;;  %v2666_v57 = vmul.f32 %v3481_v46, %v3481_v46  ;;  %v2728_v26 = vsel %vm487_vm2, %v2667_v30, 0.0 }
 0x211   : > { %v2624_v58 = vadd.f32 %v2623_v19, %v2622_v35  ;;  %v2725_v33 = vadd.f32 %v2724_v37, %v2723_v13  ;;  %v2730_v17 = vsel %vm487_vm2, %v2668_v1, 0.0 }
 0x212   : > { %v2726_v53 = vsel %vm487_vm2, %v2666_v57, 0.0 }
 0x213   : > { %v2626_v61 = vadd.f32 %v2625_v63, %v2624_v58  ;;  %v2727_v59 = vadd.f32 %v2726_v53, %v2725_v33 }
 0x215   : > { %v2628_v15 = vadd.f32 %v2627_v36, %v2626_v61  ;;  %v2729_v32 = vadd.f32 %v2728_v26, %v2727_v59 }
 0x217   : > { %v2629_v44 = vrot.slane %v2628_v15, 4  ;;  %v2731_v48 = vadd.f32 %v2730_v17, %v2729_v32 }
 0x219   : > { %v2630_v22 = vadd.f32 %v2629_v44, %v2628_v15  ;;  %v2732_v54 = vrot.slane %v2731_v48, 4 }
 0x21b   : > { %v2631_v45 = vrot.slane %v2630_v22, 2  ;;  %v2733_v62 = vadd.f32 %v2732_v54, %v2731_v48 }
 0x21d   : > { %v2632_v40 = vadd.f32 %v2631_v45, %v2630_v22  ;;  %v2734_v56 = vrot.slane %v2733_v62, 2 }
 0x21f   : > { %v2633_v38 = vrot.slane %v2632_v40, 1  ;;  %v2735_v23 = vadd.f32 %v2734_v56, %v2733_v62 }
 0x221   : > { %v2634_v16 = vadd.f32 %v2633_v38, %v2632_v40  ;;  %v2736_v0 = vrot.slane %v2735_v23, 1 }
 0x223   : > { %2636 = vst.msk [vmem:[%s181_s18] sm:$0x1] %vm2635_vm4, %v2634_v16  ;;  %v2737_v24 = vadd.f32 %v2736_v0, %v2735_v23 }
 0x225   : > { %2738 = vst.msk [vmem:[%s181_s18 + $0x1] sm:$0x1] %vm2635_vm4, %v2737_v24 }
 0x226 PF: > { %s14_s12 = sadd.s32 1, %s3731_s12  }
 0x227   : > { %p11_p4 = scmp.ge.s32.totalorder %s14_s12, 4  }
 0x229   :  { %13 = sbr.rel (!%p11_p4) target bundleno = 1 (0x1), region = 78 }

// kernel: sepconv_forward.4
= control target key start
LH: loop header
LB: loop body
LE: loop exit
PB: predicated region body
PF: predicated region fallthrough
CT: control target
= control target key end

     0   :  { %s3980_s18 = smov 0   ;;  %s5082_s0 = inlined_call_operand.vmem [shape: f32[2,256,4], index: 0, kind: input, shape index: {}]   ;;  %s5083_s1 = inlined_call_operand.vmem [shape: f32[1,4], index: 1, kind: input, shape index: {}]   ;;  %s5084_s2 = inlined_call_operand.vmem [shape: f32[1,4], index: 2, kind: input, shape index: {}]   ;;  %s5085_s3 = inlined_call_operand.vmem [shape: bf16[9,4,8], index: 3, kind: input, shape index: {}]   ;;  %s5086_s4 = inlined_call_operand.vmem [shape: f32[2,256,8], index: 4, kind: output, shape index: {0}]   ;;  %s5087_s5 = inlined_call_operand.vmem [shape: f32[2,2,8], index: 5, kind: output, shape index: {1}]  }
   0x1 LB: > { %s3036_s19 = sadd.s32 4294967295, %s3947_s18   ;;  %p3040_p0 = scmp.ge.s32.totalorder %s3947_s18, 1  ;;  %s3947_s18 = sphi %s3980_s18, %s16_s18  }
   0x2   : > { %p190_p1 = scmp.lt.s32.totalorder %s3947_s18, 3 }
   0x4   : > { %p191_p2 = pnand %p3040_p0, %p190_p1 }
   0x6   : > { %194 = sbr.rel (%p191_p2) target bundleno = 563 (0x233), region = 36 }
   0xd   : > { %v3048_v0 = vld [vmem:[%s5085_s3 + $0x2] sm:$0x3]  ;;  %vm776_vm0 = vcmask 1041408   ;;  %v3115_v1 = vld [vmem:[%s5085_s3 + $0x8] sm:$0x3]  ;;  %vm412_vm1 = vcmask 1040384  }
   0xe   : > { %3921 = vmatprep.subr.msk.bf16.mxu1 %vm776_vm0, %v3048_v0  ;;  %3925 = vmatprep.subr.msk.bf16.mxu0 %vm776_vm0, %v3115_v1  ;;  %v778_v2 = vsel %vm776_vm0, %v3048_v0, 0  ;;  %v3998_v3 = vsel %vm776_vm0, %v3115_v1, 0  ;;  %p222_p3 = scmp.lt.s32.totalorder %s3036_s19, 1  ;;  %v3949_v4 = vmov 0.0   ;;  %v563_v6 = vld [vmem:[%s5085_s3] sm:$0x3] }
   0xf   : > { %5117 = vst [vmem:[#allocation2_spill] sm:$0xff] %v3998_v3  ;;  %3358 = vmatpush3.bf16.msra.mxu1 %v778_v2  ;;  %3494 = vmatpush3.bf16.msra.mxu0 %v3998_v3  ;;  %v4001_v5 = vrot.slane %v3949_v4, 7  ;;  %v3132_v7 = vld [vmem:[%s5085_s3 + $0xa] sm:$0x3]  ;;  %vm596_vm2 = vcmask 1046528   ;;  %vm727_vm3 = vcmask 31744  }
  0x10   : > { %s5156_s19 = smov (!%p222_p3, %s3036_s19), 1  ;;  %3922 = vmatprep.subr.msk.bf16.mxu1 %vm776_vm0, %v563_v6  ;;  %3927 = vmatprep.subr.msk.bf16.mxu0 %vm776_vm0, %v3132_v7  ;;  %v4028_v13 = vld [vmem:[%s5083_s1] ss:$0 sm:$0xff]  ;;  %v4045_v15 = vld [vmem:[%s5085_s3 + $0xc] sm:$0x3]  ;;  %v4052_v20 = vsel %vm776_vm0, %v563_v6, 0 }
  0x11   : > { %v4013_v8 = vsel %vm412_vm1, 0.0, %v4001_v5  ;;  %v4017_v9 = vsel %vm412_vm1, %v4001_v5, 0.0  ;;  %v598_v10 = vrot.slane %v4001_v5, 1  ;;  %s3202_s28 = sshll.u32 %s5156_s19, 8  ;;  %v4040_v14 = vld [vmem:[%s5084_s2] ss:$0 sm:$0xff] }
  0x12   : > { %v597_v11 = vrot.slane %v4013_v8, 1  ;;  %v600_v12 = vrot.slane %v4017_v9, 1  ;;  %s4035_s8 = scalar_lea.vmem %s5082_s0, %s3202_s28  ;;  %v4056_v22 = vsel %vm776_vm0, %v3132_v7, 0  ;;  %v4073_v35 = vsel %vm776_vm0, %v4045_v15, 0  ;;  %s4937_s27 = scalar_lea.vmem %s5086_s4, %s3202_s28 }
  0x13   : > { %v237_v18 = vld [vmem:[%s4035_s8] sm:$0xff]  ;;  %v238_v19 = vld [vmem:[%s4035_s8 + $0x8] sm:$0xff]  ;;  %v239_v21 = vld [vmem:[%s4035_s8 + $0x10] sm:$0xff]  ;;  %vm1153_vm4 = vcmask 1045504   ;;  %vm2744_vm5 = vcmask 64512   ;;  %s3045_s28 = sshll.u32 %s5156_s19, 1 }
  0x14   : > { %v599_v16 = vsel %vm596_vm2, %v597_v11, %v598_v10  ;;  %v601_v17 = vsel %vm596_vm2, %v598_v10, %v600_v12  ;;  %v276_v24 = vmul.f32 %v4028_v13, %v237_v18  ;;  %v277_v25 = vmul.f32 %v4028_v13, %v238_v19  ;;  %v240_v26 = vld [vmem:[%s4035_s8 + $0x18] sm:$0xff]  ;;  %v241_v28 = vld [vmem:[%s4035_s8 + $0x20] sm:$0xff]  ;;  %v242_v29 = vld [vmem:[%s4035_s8 + $0x28] sm:$0xff]  ;;  %s235_s6 = scalar_lea.vmem %s5087_s5, %s3045_s28 }
  0x15   : > { %v4058_v23 = vpack.c.bf16 %v601_v17, %v599_v16  ;;  %v278_v27 = vmul.f32 %v4028_v13, %v239_v21  ;;  %v279_v30 = vmul.f32 %v4028_v13, %v240_v26  ;;  %v280_v31 = vmul.f32 %v4028_v13, %v241_v28  ;;  %v243_v33 = vld [vmem:[%s4035_s8 + $0x30] sm:$0xff]  ;;  %v244_v34 = vld [vmem:[%s4035_s8 + $0x38] sm:$0xff]  ;;  %v245_v26 = vld [vmem:[%s4035_s8 + $0x40] sm:$0xff] }
  0x16   : > { %v281_v32 = vmul.f32 %v4028_v13, %v242_v29  ;;  %v315_v36 = vadd.f32 %v4040_v14, %v276_v24  ;;  %v316_v37 = vadd.f32 %v4040_v14, %v277_v25  ;;  %v282_v39 = vmul.f32 %v4028_v13, %v243_v33  ;;  %v247_v28 = vld [vmem:[%s4035_s8 + $0x50] sm:$0xff]  ;;  %v248_v33 = vld [vmem:[%s4035_s8 + $0x58] sm:$0xff] }
  0x17   : > { %5118 = vst [vmem:[#allocation3_spill] sm:$0xff] %v4058_v23  ;;  %3359 = vmatprep.mubr.msk.bf16.mxu1 %vm727_vm3, %v4058_v23  ;;  %v317_v38 = vadd.f32 %v4040_v14, %v278_v27  ;;  %v318_v40 = vadd.f32 %v4040_v14, %v279_v30  ;;  %v319_v41 = vadd.f32 %v4040_v14, %v280_v31  ;;  %v246_v27 = vld [vmem:[%s4035_s8 + $0x48] sm:$0xff]  ;;  %vm2846_vm6 = vcmask 57344  }
  0x18   : > { %v320_v42 = vadd.f32 %v4040_v14, %v281_v32  ;;  %v283_v43 = vmul.f32 %v4028_v13, %v244_v34  ;;  %v347_v44 = vmax.f32 %v315_v36, 0.0  ;;  %v348_v45 = vmax.f32 %v316_v37, 0.0 }
  0x19   : > { %v349_v46 = vmax.f32 %v317_v38, 0.0  ;;  %v321_v47 = vadd.f32 %v4040_v14, %v282_v39  ;;  %v350_v48 = vmax.f32 %v318_v40, 0.0  ;;  %v351_v49 = vmax.f32 %v319_v41, 0.0  ;;  %v4141_v39 = vld [vmem:[%s5085_s3 + $0x4] sm:$0x3] }
  0x1a   : > { %v352_v50 = vmax.f32 %v320_v42, 0.0  ;;  %v322_v51 = vadd.f32 %v4040_v14, %v283_v43  ;;  %v415_v52 = vrot.slane %v347_v44, 7  ;;  %v416_v53 = vrot.slane %v348_v45, 7 }
  0x1b   : > { %v418_v54 = vrot.slane %v349_v46, 7  ;;  %v353_v55 = vmax.f32 %v321_v47, 0.0  ;;  %v419_v56 = vrot.slane %v350_v48, 7  ;;  %v421_v57 = vrot.slane %v351_v49, 7  ;;  %v249_v47 = vld [vmem:[%s4035_s8 + $0x60] sm:$0xff]  ;;  %v250_v48 = vld [vmem:[%s4035_s8 + $0x68] sm:$0xff] }
  0x1c   : > { %v422_v58 = vrot.slane %v352_v50, 7  ;;  %v354_v59 = vmax.f32 %v322_v51, 0.0  ;;  %v4088_v60 = vsel %vm412_vm1, %v415_v52, %v416_v53  ;;  %v4091_v61 = vsel %vm412_vm1, 0.0, %v415_v52 }
  0x1d   : > { %v4094_v62 = vsel %vm412_vm1, %v416_v53, 0.0  ;;  %v4097_v63 = vsel %vm412_vm1, 0.0, %v418_v54  ;;  %v602_v0 = vrot.slane %v4091_v61, 1  ;;  %v603_v1 = vrot.slane %v4088_v60, 1 }
  0x1e   : > { %v605_v2 = vrot.slane %v4094_v62, 1  ;;  %v4103_v4 = vsel %vm412_vm1, %v418_v54, %v419_v56  ;;  %v4106_v6 = vsel %vm412_vm1, %v419_v56, 0.0  ;;  %v607_v7 = vrot.slane %v4097_v63, 1 }
  0x1f   : > { %v608_v10 = vrot.slane %v4103_v4, 1  ;;  %v1164_v11 = vrot.slane %v4097_v63, 2  ;;  %v604_v12 = vsel %vm596_vm2, %v602_v0, %v603_v1  ;;  %v610_v17 = vrot.slane %v4106_v6, 1  ;;  %v251_v0 = vld [vmem:[%s4035_s8 + $0x70] sm:$0xff] }
  0x20   : > { %v606_v16 = vsel %vm596_vm2, %v603_v1, %v605_v2  ;;  %v1165_v18 = vrot.slane %v4103_v4, 2  ;;  %v1167_v24 = vrot.slane %v4106_v6, 2  ;;  %v4118_v25 = vsel %vm412_vm1, %v421_v57, %v422_v58 }
  0x21   : > { %v710_v19 = vpack.c.bf16 %v606_v16, %v604_v12  ;;  %v609_v21 = vsel %vm596_vm2, %v607_v7, %v608_v10  ;;  %v611_v29 = vsel %vm596_vm2, %v608_v10, %v610_v17  ;;  %v4125_v30 = vsel %vm412_vm1, 0.0, %v421_v57  ;;  %v252_v12 = vld [vmem:[%s4035_s8 + $0x78] sm:$0xff] }
  0x22   : > { %v4128_v31 = vsel %vm412_vm1, %v422_v58, 0.0  ;;  %v613_v32 = vrot.slane %v4118_v25, 1  ;;  %v4134_v34 = vpack.c.bf16 %v611_v29, %v609_v21  ;;  %v612_v36 = vrot.slane %v4125_v30, 1 }
  0x23   : > { %3360 = vmatmul.mubr.msk.bf16.vlgmr.msra.gmra.mrb[0].mxu1 %vm727_vm3, %v710_v19  ;;  %3495 = vmatprep.mubr.msk.bf16.mxu0 %vm727_vm3, %v710_v19  ;;  %v615_v37 = vrot.slane %v4128_v31, 1  ;;  %v424_v38 = vrot.slane %v353_v55, 7  ;;  %v425_v40 = vrot.slane %v354_v59, 7  ;;  %v284_v41 = vmul.f32 %v4028_v13, %v245_v26 }
  0x24   : > { %5119 = vst [vmem:[#allocation4_spill] sm:$0xff] %v4134_v34  ;;  %3392 = vmatpush3.bf16.msra.mxu1 %v4052_v20  ;;  %v285_v42 = vmul.f32 %v4028_v13, %v246_v27  ;;  %v286_v43 = vmul.f32 %v4028_v13, %v247_v28  ;;  %3496 = vmatmul.mubr.msk.bf16.vlgmr.msra.gmra.mrb[0].mxu0 %vm727_vm3, %v4134_v34 }
  0x25   : > { %3363 = vmatprep.mubr.msk.bf16.mxu1 %vm727_vm3, %v4134_v34  ;;  %v614_v44 = vsel %vm596_vm2, %v612_v36, %v613_v32  ;;  %v616_v45 = vsel %vm596_vm2, %v613_v32, %v615_v37  ;;  %v4154_v46 = vsel %vm412_vm1, 0.0, %v424_v38  ;;  %v287_v20 = vmul.f32 %v4028_v13, %v248_v33  ;;  %3528 = vmatpush3.bf16.msra.mxu0 %v4056_v22 }
  0x26   : > { %v4160_v49 = vpack.c.bf16 %v616_v45, %v614_v44  ;;  %v4163_v50 = vsel %vm412_vm1, %v424_v38, %v425_v40  ;;  %v4166_v51 = vsel %vm412_vm1, %v425_v40, 0.0  ;;  %v617_v52 = vrot.slane %v4154_v46, 1  ;;  %3923 = vmatprep.subr.msk.bf16.mxu1 %vm776_vm0, %v4141_v39  ;;  %3928 = vmatprep.subr.msk.bf16.mxu0 %vm776_vm0, %v4045_v15 }
  0x27   : > { %v618_v53 = vrot.slane %v4163_v50, 1  ;;  %v620_v54 = vrot.slane %v4166_v51, 1  ;;  %v323_v22 = vadd.f32 %v4040_v14, %v284_v41  ;;  %v324_v55 = vadd.f32 %v4040_v14, %v285_v42 }
  0x28   : > { %5120 = vst [vmem:[#allocation5_spill] sm:$0xff] %v4160_v49  ;;  %3499 = vmatprep.mubr.msk.bf16.mxu0 %vm727_vm3, %v4160_v49  ;;  %v325_v56 = vadd.f32 %v4040_v14, %v286_v43  ;;  %v326_v57 = vadd.f32 %v4040_v14, %v287_v20  ;;  %v288_v58 = vmul.f32 %v4028_v13, %v249_v47  ;;  %v1174_v23 = vrot.slane %v4154_v46, 2 }
  0x29   : > { %v289_v59 = vmul.f32 %v4028_v13, %v250_v48  ;;  %v619_v1 = vsel %vm596_vm2, %v617_v52, %v618_v53  ;;  %v621_v2 = vsel %vm596_vm2, %v618_v53, %v620_v54  ;;  %v355_v7 = vmax.f32 %v323_v22, 0.0 }
  0x2a   : > { %v356_v10 = vmax.f32 %v324_v55, 0.0  ;;  %v4187_v15 = vpack.c.bf16 %v621_v2, %v619_v1  ;;  %v357_v16 = vmax.f32 %v325_v56, 0.0  ;;  %v358_v17 = vmax.f32 %v326_v57, 0.0 }
  0x2b   : > { %v327_v19 = vadd.f32 %v4040_v14, %v288_v58  ;;  %3364 = vmatmul.mubr.msk.bf16.gmra.mrb[4].mxu1 %vm727_vm3, %v4160_v49  ;;  %v427_v21 = vrot.slane %v355_v7, 7  ;;  %v328_v27 = vadd.f32 %v4040_v14, %v289_v59  ;;  %v290_v28 = vmul.f32 %v4028_v13, %v251_v0  ;;  %v253_v0 = vld [vmem:[%s4035_s8 + $0x80] sm:$0xff] }
  0x2c   : > { %5121 = vst [vmem:[#allocation6_spill] sm:$0xff] %v4187_v15  ;;  %v428_v26 = vrot.slane %v356_v10, 7  ;;  %3367 = vmatprep.mubr.msk.bf16.mxu1 %vm727_vm3, %v4187_v15  ;;  %v430_v29 = vrot.slane %v357_v16, 7  ;;  %v431_v32 = vrot.slane %v358_v17, 7  ;;  %v291_v36 = vmul.f32 %v4028_v13, %v252_v12  ;;  %3500 = vmatmul.mubr.msk.bf16.gmra.mrb[4].mxu0 %vm727_vm3, %v4187_v15  ;;  %v254_v12 = vld [vmem:[%s4035_s8 + $0x88] sm:$0xff] }
  0x2d   : > { %v359_v33 = vmax.f32 %v327_v19, 0.0  ;;  %v4203_v38 = vsel %vm412_vm1, 0.0, %v427_v21  ;;  %v360_v41 = vmax.f32 %v328_v27, 0.0  ;;  %v329_v59 = vadd.f32 %v4040_v14, %v290_v28 }
  0x2e   : > { %v4200_v37 = vsel %vm412_vm1, %v427_v21, %v428_v26  ;;  %v4206_v40 = vsel %vm412_vm1, %v428_v26, 0.0  ;;  %v622_v42 = vrot.slane %v4203_v38, 1  ;;  %v4212_v45 = vsel %vm412_vm1, %v430_v29, %v431_v32 }
  0x2f   : > { %v623_v43 = vrot.slane %v4200_v37, 1  ;;  %v625_v44 = vrot.slane %v4206_v40, 1  ;;  %v4215_v20 = vsel %vm412_vm1, 0.0, %v430_v29  ;;  %v4218_v47 = vsel %vm412_vm1, %v431_v32, 0.0 }
  0x30   : > { %v628_v48 = vrot.slane %v4212_v45, 1  ;;  %v433_v52 = vrot.slane %v359_v33, 7  ;;  %v627_v22 = vrot.slane %v4215_v20, 1  ;;  %v630_v55 = vrot.slane %v4218_v47, 1 }
  0x31   : > { %v624_v53 = vsel %vm596_vm2, %v622_v42, %v623_v43  ;;  %v626_v54 = vsel %vm596_vm2, %v623_v43, %v625_v44  ;;  %v434_v57 = vrot.slane %v360_v41, 7  ;;  %v330_v10 = vadd.f32 %v4040_v14, %v291_v36 }
  0x32   : > { %v4225_v56 = vpack.c.bf16 %v626_v54, %v624_v53  ;;  %v4228_v58 = vsel %vm412_vm1, 0.0, %v433_v52  ;;  %v629_v1 = vsel %vm596_vm2, %v627_v22, %v628_v48  ;;  %v631_v2 = vsel %vm596_vm2, %v628_v48, %v630_v55  ;;  %v255_v55 = vld [vmem:[%s4035_s8 + $0x90] sm:$0xff] }
  0x33   : > { %v632_v7 = vrot.slane %v4228_v58, 1  ;;  %v4241_v16 = vpack.c.bf16 %v631_v2, %v629_v1  ;;  %v4244_v17 = vsel %vm412_vm1, %v433_v52, %v434_v57  ;;  %v4247_v19 = vsel %vm412_vm1, %v434_v57, 0.0 }
  0x34   : > { %5122 = vst [vmem:[#allocation7_spill] sm:$0xff] %v4225_v56  ;;  %3368 = vmatmul.mubr.msk.bf16.gmra.mrb[8].mxu1 %vm727_vm3, %v4225_v56  ;;  %3503 = vmatprep.mubr.msk.bf16.mxu0 %vm727_vm3, %v4225_v56  ;;  %v361_v21 = vmax.f32 %v329_v59, 0.0  ;;  %v633_v26 = vrot.slane %v4244_v17, 1  ;;  %v635_v27 = vrot.slane %v4247_v19, 1  ;;  %v362_v28 = vmax.f32 %v330_v10, 0.0 }
  0x35   : > { %5123 = vst [vmem:[#allocation8_spill] sm:$0xff] %v4241_v16  ;;  %v292_v29 = vmul.f32 %v4028_v13, %v253_v0  ;;  %3504 = vmatmul.mubr.msk.bf16.gmra.mrb[8].mxu0 %vm727_vm3, %v4241_v16  ;;  %3371 = vmatprep.mubr.msk.bf16.mxu1 %vm727_vm3, %v4241_v16  ;;  %v293_v33 = vmul.f32 %v4028_v13, %v254_v12  ;;  %v1159_v36 = vrot.slane %v4091_v61, 2  ;;  %v1160_v41 = vrot.slane %v4088_v60, 2 }
  0x36   : > { %v436_v32 = vrot.slane %v361_v21, 7  ;;  %v634_v42 = vsel %vm596_vm2, %v632_v7, %v633_v26  ;;  %v636_v43 = vsel %vm596_vm2, %v633_v26, %v635_v27  ;;  %v437_v44 = vrot.slane %v362_v28, 7  ;;  %v256_v28 = vld [vmem:[%s4035_s8 + $0x98] sm:$0xff] }
  0x37   : > { %v331_v48 = vadd.f32 %v4040_v14, %v292_v29  ;;  %v4262_v52 = vpack.c.bf16 %v636_v43, %v634_v42  ;;  %v332_v54 = vadd.f32 %v4040_v14, %v293_v33  ;;  %v1161_v22 = vsel %vm1153_vm4, %v1159_v36, %v1160_v41  ;;  %v258_v43 = vld [vmem:[%s4035_s8 + $0xa8] sm:$0xff] }
  0x38   : > { %v4265_v53 = vsel %vm412_vm1, 0.0, %v436_v32  ;;  %v4271_v57 = vsel %vm412_vm1, %v436_v32, %v437_v44  ;;  %v4274_v59 = vsel %vm412_vm1, %v437_v44, 0.0  ;;  %v1162_v12 = vrot.slane %v4094_v62, 2 }
  0x39   : > { %5124 = vst [vmem:[#allocation9_spill] sm:$0xff] %v4262_v52  ;;  %v637_v0 = vrot.slane %v4265_v53, 1  ;;  %v363_v1 = vmax.f32 %v331_v48, 0.0  ;;  %3507 = vmatprep.mubr.msk.bf16.mxu0 %vm727_vm3, %v4262_v52  ;;  %v638_v2 = vrot.slane %v4271_v57, 1  ;;  %v640_v7 = vrot.slane %v4274_v59, 1 }
  0x3a   : > { %v364_v10 = vmax.f32 %v332_v54, 0.0  ;;  %v1166_v26 = vsel %vm1153_vm4, %v1164_v11, %v1165_v18  ;;  %v1168_v27 = vsel %vm1153_vm4, %v1165_v18, %v1167_v24  ;;  %v294_v29 = vmul.f32 %v4028_v13, %v255_v55  ;;  %v257_v11 = vld [vmem:[%s4035_s8 + $0xa0] sm:$0xff] }
  0x3b   : > { %v439_v21 = vrot.slane %v363_v1, 7  ;;  %v639_v62 = vsel %vm596_vm2, %v637_v0, %v638_v2  ;;  %v641_v32 = vsel %vm596_vm2, %v638_v2, %v640_v7  ;;  %v1163_v36 = vsel %vm1153_vm4, %v1160_v41, %v1162_v12 }
  0x3c   : > { %3372 = vmatmul.mubr.msk.bf16.gmra.mrb[12].mxu1 %vm727_vm3, %v4262_v52  ;;  %v440_v33 = vrot.slane %v364_v10, 7  ;;  %v4300_v42 = vpack.c.bf16 %v641_v32, %v639_v62  ;;  %v4305_v18 = vpack.c.bf16 %v1163_v36, %v1161_v22  ;;  %v4307_v24 = vpack.c.bf16 %v1168_v27, %v1166_v26  ;;  %v259_v36 = vld [vmem:[%s4035_s8 + $0xb0] sm:$0xff] }
  0x3d   : > { %v4303_v6 = vsel %vm412_vm1, 0.0, %v439_v21  ;;  %v295_v41 = vmul.f32 %v4028_v13, %v256_v28  ;;  %v333_v0 = vadd.f32 %v4040_v14, %v294_v29  ;;  %v296_v1 = vmul.f32 %v4028_v13, %v257_v11 }
  0x3e   : > { %5125 = vst [vmem:[#allocation10_spill] sm:$0xff] %v4300_v42  ;;  %v4311_v44 = vsel %vm412_vm1, %v439_v21, %v440_v33  ;;  %v4314_v48 = vsel %vm412_vm1, %v440_v33, 0.0  ;;  %v642_v54 = vrot.slane %v4303_v6, 1  ;;  %3508 = vmatmul.mubr.msk.bf16.gmra.mrb[12].mxu0 %vm727_vm3, %v4300_v42  ;;  %3375 = vmatprep.mubr.msk.bf16.mxu1 %vm727_vm3, %v4300_v42  ;;  %v297_v7 = vmul.f32 %v4028_v13, %v258_v43 }
  0x3f   : > { %v643_v22 = vrot.slane %v4311_v44, 1  ;;  %v645_v55 = vrot.slane %v4314_v48, 1  ;;  %3529 = vmatprep.mubr.msk.bf16.mxu0 %vm727_vm3, %v4305_v18  ;;  %v334_v2 = vadd.f32 %v4040_v14, %v295_v41  ;;  %v1169_v10 = vrot.slane %v4125_v30, 2 }
  0x40   : > { %v1170_v12 = vrot.slane %v4118_v25, 2  ;;  %v365_v27 = vmax.f32 %v333_v0, 0.0  ;;  %v335_v28 = vadd.f32 %v4040_v14, %v296_v1  ;;  %v336_v32 = vadd.f32 %v4040_v14, %v297_v7 }
  0x41   : > { %v644_v21 = vsel %vm596_vm2, %v642_v54, %v643_v22  ;;  %v646_v26 = vsel %vm596_vm2, %v643_v22, %v645_v55  ;;  %v366_v62 = vmax.f32 %v334_v2, 0.0  ;;  %v1172_v41 = vrot.slane %v4128_v31, 2 }
  0x42   : > { %v4335_v29 = vpack.c.bf16 %v646_v26, %v644_v21  ;;  %v1171_v33 = vsel %vm1153_vm4, %v1169_v10, %v1170_v12  ;;  %v442_v11 = vrot.slane %v365_v27, 7  ;;  %v367_v43 = vmax.f32 %v335_v28, 0.0 }
  0x43   : > { %v443_v54 = vrot.slane %v366_v62, 7  ;;  %v368_v22 = vmax.f32 %v336_v32, 0.0  ;;  %v1175_v55 = vrot.slane %v4163_v50, 2  ;;  %v1177_v0 = vrot.slane %v4166_v51, 2  ;;  %v4361_v51 = vld [vmem:[%s5085_s3 + $0xe] sm:$0x3] }
  0x44   : > { %5126 = vst [vmem:[#allocation11_spill] sm:$0xff] %v4335_v29  ;;  %3376 = vmatmul.mubr.msk.bf16.gmra.mrb[16].mxu1 %vm727_vm3, %v4335_v29  ;;  %v4347_v1 = vsel %vm412_vm1, 0.0, %v442_v11  ;;  %v445_v2 = vrot.slane %v367_v43, 7  ;;  %v1173_v7 = vsel %vm1153_vm4, %v1170_v12, %v1172_v41  ;;  %v298_v31 = vmul.f32 %v4028_v13, %v259_v36  ;;  %v260_v36 = vld [vmem:[%s4035_s8 + $0xb8] sm:$0xff] }
  0x45   : > { %v4352_v10 = vsel %vm412_vm1, %v442_v11, %v443_v54  ;;  %v4355_v21 = vsel %vm412_vm1, %v443_v54, 0.0  ;;  %v647_v26 = vrot.slane %v4347_v1, 1  ;;  %v446_v27 = vrot.slane %v368_v22, 7  ;;  %v261_v22 = vld [vmem:[%s4035_s8 + $0xc0] sm:$0xff] }
  0x46   : > { %3530 = vmatmul.mubr.msk.bf16.vlgmr.msra.gmra.mrb[0].mxu0 %vm727_vm3, %v4307_v24  ;;  %v648_v12 = vrot.slane %v4352_v10, 1  ;;  %v650_v28 = vrot.slane %v4355_v21, 1  ;;  %v4368_v62 = vsel %vm412_vm1, 0.0, %v445_v2  ;;  %v4370_v32 = vpack.c.bf16 %v1173_v7, %v1171_v33 }
  0x47   : > { %3562 = vmatpush3.bf16.msra.mxu0 %v4073_v35  ;;  %v4375_v11 = vsel %vm412_vm1, %v445_v2, %v446_v27  ;;  %v4378_v43 = vsel %vm412_vm1, %v446_v27, 0.0  ;;  %v652_v41 = vrot.slane %v4368_v62, 1  ;;  %v1176_v54 = vsel %vm1153_vm4, %v1174_v23, %v1175_v55  ;;  %v262_v35 = vld [vmem:[%s4035_s8 + $0xc8] sm:$0xff] }
  0x48   : > { %v649_v3 = vsel %vm596_vm2, %v647_v26, %v648_v12  ;;  %v651_v29 = vsel %vm596_vm2, %v648_v12, %v650_v28  ;;  %v653_v33 = vrot.slane %v4375_v11, 1  ;;  %v655_v7 = vrot.slane %v4378_v43, 1  ;;  %3533 = vmatprep.mubr.msk.bf16.mxu0 %vm727_vm3, %v4370_v32  ;;  %3929 = vmatprep.subr.msk.bf16.mxu0 %vm776_vm0, %v4361_v51 }
  0x49   : > { %v4392_v2 = vpack.c.bf16 %v651_v29, %v649_v3  ;;  %v1178_v23 = vsel %vm1153_vm4, %v1175_v55, %v1177_v0  ;;  %v299_v27 = vmul.f32 %v4028_v13, %v260_v36  ;;  %v337_v26 = vadd.f32 %v4040_v14, %v298_v31 }
  0x4a   : > { %v654_v12 = vsel %vm596_vm2, %v652_v41, %v653_v33  ;;  %v656_v28 = vsel %vm596_vm2, %v653_v33, %v655_v7  ;;  %v4399_v42 = vpack.c.bf16 %v1178_v23, %v1176_v54  ;;  %v300_v52 = vmul.f32 %v4028_v13, %v261_v22 }
  0x4b   : > { %5127 = vst [vmem:[#allocation12_spill] sm:$0xff] %v4392_v2  ;;  %3379 = vmatprep.mubr.msk.bf16.mxu1 %vm727_vm3, %v4392_v2  ;;  %v4404_v16 = vpack.c.bf16 %v656_v28, %v654_v12  ;;  %v338_v3 = vadd.f32 %v4040_v14, %v299_v27  ;;  %v369_v29 = vmax.f32 %v337_v26, 0.0  ;;  %v301_v55 = vmul.f32 %v4028_v13, %v262_v35  ;;  %v266_v2 = vld [vmem:[%s4035_s8 + $0xe8] sm:$0xff] }
  0x4c   : > { %5128 = vst [vmem:[#allocation13_spill] sm:$0xff] %v4399_v42  ;;  %v339_v0 = vadd.f32 %v4040_v14, %v300_v52  ;;  %v1179_v31 = vrot.slane %v4203_v38, 2  ;;  %v1180_v36 = vrot.slane %v4200_v37, 2  ;;  %v1182_v41 = vrot.slane %v4206_v40, 2  ;;  %v263_v40 = vld [vmem:[%s4035_s8 + $0xd0] sm:$0xff] }
  0x4d   : > { %5129 = vst [vmem:[#allocation14_spill] sm:$0xff] %v4404_v16  ;;  %3380 = vmatmul.mubr.msk.bf16.gmra.mrb[20].mxu1 %vm727_vm3, %v4404_v16  ;;  %v370_v54 = vmax.f32 %v338_v3, 0.0  ;;  %v448_v22 = vrot.slane %v369_v29, 7  ;;  %v340_v33 = vadd.f32 %v4040_v14, %v301_v55  ;;  %v1184_v7 = vrot.slane %v4215_v20, 2 }
  0x4e   : > { %3534 = vmatmul.mubr.msk.bf16.gmra.mrb[4].mxu0 %vm727_vm3, %v4399_v42  ;;  %v371_v35 = vmax.f32 %v339_v0, 0.0  ;;  %v1181_v52 = vsel %vm1153_vm4, %v1179_v31, %v1180_v36  ;;  %v1183_v23 = vsel %vm1153_vm4, %v1180_v36, %v1182_v41  ;;  %v1185_v27 = vrot.slane %v4212_v45, 2 }
  0x4f   : > { %v449_v26 = vrot.slane %v370_v54, 7  ;;  %v4423_v12 = vsel %vm412_vm1, 0.0, %v448_v22  ;;  %v372_v28 = vmax.f32 %v340_v33, 0.0  ;;  %v4425_v3 = vpack.c.bf16 %v1183_v23, %v1181_v52  ;;  %v265_v23 = vld [vmem:[%s4035_s8 + $0xe0] sm:$0xff] }
  0x50   : > { %v657_v29 = vrot.slane %v4423_v12, 1  ;;  %v451_v55 = vrot.slane %v371_v35, 7  ;;  %v1186_v0 = vsel %vm1153_vm4, %v1184_v7, %v1185_v27  ;;  %v1187_v31 = vrot.slane %v4218_v47, 2 }
  0x51   : > { %5130 = vst [vmem:[#allocation15_spill] sm:$0xff] %v4425_v3  ;;  %v4431_v36 = vsel %vm412_vm1, %v448_v22, %v449_v26  ;;  %v4434_v41 = vsel %vm412_vm1, %v449_v26, 0.0  ;;  %v452_v54 = vrot.slane %v372_v28, 7  ;;  %3537 = vmatprep.mubr.msk.bf16.mxu0 %vm727_vm3, %v4425_v3  ;;  %v302_v33 = vmul.f32 %v4028_v13, %v263_v40  ;;  %v264_v22 = vld [vmem:[%s4035_s8 + $0xd8] sm:$0xff] }
  0x52   : > { %v658_v52 = vrot.slane %v4431_v36, 1  ;;  %v660_v35 = vrot.slane %v4434_v41, 1  ;;  %v4442_v7 = vsel %vm412_vm1, 0.0, %v451_v55  ;;  %v1188_v47 = vsel %vm1153_vm4, %v1185_v27, %v1187_v31 }
  0x53   : > { %v4448_v26 = vsel %vm412_vm1, %v451_v55, %v452_v54  ;;  %v4451_v28 = vsel %vm412_vm1, %v452_v54, 0.0  ;;  %v662_v16 = vrot.slane %v4442_v7, 1  ;;  %v4454_v40 = vpack.c.bf16 %v1188_v47, %v1186_v0 }
  0x54   : > { %v659_v56 = vsel %vm596_vm2, %v657_v29, %v658_v52  ;;  %v661_v15 = vsel %vm596_vm2, %v658_v52, %v660_v35  ;;  %v663_v49 = vrot.slane %v4448_v26, 1  ;;  %v665_v27 = vrot.slane %v4451_v28, 1 }
  0x55   : > { %5131 = vst [vmem:[#allocation16_spill] sm:$0xff] %v4454_v40  ;;  %v4461_v31 = vpack.c.bf16 %v661_v15, %v659_v56  ;;  %v303_v55 = vmul.f32 %v4028_v13, %v264_v22  ;;  %v341_v54 = vadd.f32 %v4040_v14, %v302_v33  ;;  %v304_v34 = vmul.f32 %v4028_v13, %v265_v23 }
  0x56   : > { %v664_v0 = vsel %vm596_vm2, %v662_v16, %v663_v49  ;;  %v666_v47 = vsel %vm596_vm2, %v663_v49, %v665_v27  ;;  %3538 = vmatmul.mubr.msk.bf16.gmra.mrb[8].mxu0 %vm727_vm3, %v4454_v40  ;;  %v305_v29 = vmul.f32 %v4028_v13, %v266_v2  ;;  %v1189_v52 = vrot.slane %v4228_v58, 2 }
  0x57   : > { %5132 = vst [vmem:[#allocation17_spill] sm:$0xff] %v4461_v31  ;;  %3383 = vmatprep.mubr.msk.bf16.mxu1 %vm727_vm3, %v4461_v31  ;;  %v4474_v15 = vpack.c.bf16 %v666_v47, %v664_v0  ;;  %v342_v56 = vadd.f32 %v4040_v14, %v303_v55  ;;  %v373_v33 = vmax.f32 %v341_v54, 0.0  ;;  %v343_v35 = vadd.f32 %v4040_v14, %v304_v34 }
  0x58   : > { %v344_v16 = vadd.f32 %v4040_v14, %v305_v29  ;;  %v1190_v49 = vrot.slane %v4244_v17, 2  ;;  %v1192_v22 = vrot.slane %v4247_v19, 2  ;;  %v1194_v2 = vrot.slane %v4265_v53, 2 }
  0x59   : > { %5133 = vst [vmem:[#allocation18_spill] sm:$0xff] %v4474_v15  ;;  %3384 = vmatmul.mubr.msk.bf16.gmra.mrb[24].mxu1 %vm727_vm3, %v4474_v15  ;;  %v374_v23 = vmax.f32 %v342_v56, 0.0  ;;  %v454_v27 = vrot.slane %v373_v33, 7  ;;  %v375_v0 = vmax.f32 %v343_v35, 0.0  ;;  %v1195_v47 = vrot.slane %v4271_v57, 2 }
  0x5a   : > { %v376_v55 = vmax.f32 %v344_v16, 0.0  ;;  %v1191_v54 = vsel %vm1153_vm4, %v1189_v52, %v1190_v49  ;;  %v1193_v34 = vsel %vm1153_vm4, %v1190_v49, %v1192_v22  ;;  %v1197_v29 = vrot.slane %v4274_v59, 2 }
  0x5b   : > { %v455_v31 = vrot.slane %v374_v23, 7  ;;  %v4489_v19 = vsel %vm412_vm1, 0.0, %v454_v27  ;;  %v457_v40 = vrot.slane %v375_v0, 7  ;;  %v4491_v3 = vpack.c.bf16 %v1193_v34, %v1191_v54 }
  0x5c   : > { %v667_v56 = vrot.slane %v4489_v19, 1  ;;  %v458_v33 = vrot.slane %v376_v55, 7  ;;  %v1196_v35 = vsel %vm1153_vm4, %v1194_v2, %v1195_v47  ;;  %v1198_v16 = vsel %vm1153_vm4, %v1195_v47, %v1197_v29 }
  0x5d   : > { %5134 = vst [vmem:[#allocation19_spill] sm:$0xff] %v4491_v3  ;;  %v4497_v52 = vsel %vm412_vm1, %v454_v27, %v455_v31  ;;  %v4500_v49 = vsel %vm412_vm1, %v455_v31, 0.0  ;;  %v4503_v59 = vsel %vm412_vm1, 0.0, %v457_v40  ;;  %3541 = vmatprep.mubr.msk.bf16.mxu0 %vm727_vm3, %v4491_v3  ;;  %v4507_v22 = vpack.c.bf16 %v1198_v16, %v1196_v35 }
  0x5e   : > { %v668_v23 = vrot.slane %v4497_v52, 1  ;;  %v670_v2 = vrot.slane %v4500_v49, 1  ;;  %v4512_v0 = vsel %vm412_vm1, %v457_v40, %v458_v33  ;;  %v4515_v27 = vsel %vm412_vm1, %v458_v33, 0.0 }
  0x5f   : > { %5135 = vst [vmem:[#allocation20_spill] sm:$0xff] %v4507_v22  ;;  %v672_v31 = vrot.slane %v4503_v59, 1  ;;  %v673_v47 = vrot.slane %v4512_v0, 1  ;;  %v675_v55 = vrot.slane %v4515_v27, 1  ;;  %3542 = vmatmul.mubr.msk.bf16.gmra.mrb[12].mxu0 %vm727_vm3, %v4507_v22  ;;  %v4524_v54 = vpack.c.bf16 %v4001_v5, %v4013_v8 }
  0x60   : > { %v669_v34 = vsel %vm596_vm2, %v667_v56, %v668_v23  ;;  %v671_v40 = vsel %vm596_vm2, %v668_v23, %v670_v2  ;;  %v1199_v29 = vrot.slane %v4303_v6, 2  ;;  %v1200_v33 = vrot.slane %v4311_v44, 2 }
  0x61   : > { %v4530_v35 = vpack.c.bf16 %v671_v40, %v669_v34  ;;  %v674_v16 = vsel %vm596_vm2, %v672_v31, %v673_v47  ;;  %v676_v15 = vsel %vm596_vm2, %v673_v47, %v675_v55  ;;  %v1202_v22 = vrot.slane %v4314_v48, 2 }
  0x62   : > { %v4535_v3 = vpack.c.bf16 %v676_v15, %v674_v16  ;;  %v1201_v42 = vsel %vm1153_vm4, %v1199_v29, %v1200_v33  ;;  %v1204_v56 = vrot.slane %v4347_v1, 2  ;;  %v1205_v23 = vrot.slane %v4352_v10, 2 }
  0x63   : > { %3387 = vmatprep.mubr.msk.bf16.mxu1 %vm727_vm3, %v4530_v35  ;;  %v4544_v2 = vpack.c.bf16 %v4088_v60, %v4091_v61  ;;  %v1203_v31 = vsel %vm1153_vm4, %v1200_v33, %v1202_v22  ;;  %v1207_v47 = vrot.slane %v4355_v21, 2  ;;  %v1209_v55 = vrot.slane %v4368_v62, 2 }
  0x64   : > { %3388 = vmatmul.mubr.msk.bf16.gmra.mrb[28].mxu1 %vm727_vm3, %v4535_v3  ;;  %v4550_v48 = vpack.c.bf16 %v1203_v31, %v1201_v42  ;;  %v1206_v15 = vsel %vm1153_vm4, %v1204_v56, %v1205_v23  ;;  %v1210_v34 = vrot.slane %v4375_v11, 2  ;;  %v1212_v61 = vrot.slane %v4378_v43, 2 }
  0x65   : > { %3393 = vmatprep.mubr.msk.bf16.mxu1 %vm727_vm3, %v4524_v54  ;;  %v1208_v60 = vsel %vm1153_vm4, %v1205_v23, %v1207_v47  ;;  %v1214_v21 = vrot.slane %v4423_v12, 2  ;;  %v1215_v22 = vrot.slane %v4431_v36, 2  ;;  %v1217_v29 = vrot.slane %v4434_v41, 2 }
  0x66   : > { %3545 = vmatprep.mubr.msk.bf16.mxu0 %vm727_vm3, %v4550_v48  ;;  %v4563_v42 = vpack.c.bf16 %v1208_v60, %v1206_v15  ;;  %v1211_v40 = vsel %vm1153_vm4, %v1209_v55, %v1210_v34  ;;  %v4569_v33 = vpack.c.bf16 %v4163_v50, %v4154_v46  ;;  %v1213_v43 = vsel %vm1153_vm4, %v1210_v34, %v1212_v61  ;;  %v267_v15 = vld [vmem:[%s4035_s8 + $0xf0] sm:$0xff] }
  0x67   : > { %v1216_v16 = vsel %vm1153_vm4, %v1214_v21, %v1215_v22  ;;  %v4575_v56 = vpack.c.bf16 %v4200_v37, %v4203_v38  ;;  %v1219_v23 = vrot.slane %v4442_v7, 2  ;;  %v4580_v31 = vpack.c.bf16 %v1213_v43, %v1211_v40  ;;  %v4614_v21 = vld [vmem:[%s5085_s3 + $0x6] sm:$0x3] }
  0x68   : > { %3546 = vmatmul.mubr.msk.bf16.gmra.mrb[16].mxu0 %vm727_vm3, %v4563_v42  ;;  %v1218_v41 = vsel %vm1153_vm4, %v1215_v22, %v1217_v29  ;;  %v1220_v46 = vrot.slane %v4448_v26, 2  ;;  %v1222_v50 = vrot.slane %v4451_v28, 2  ;;  %v1154_v47 = vrot.slane %v4013_v8, 2 }
  0x69   : > { %v1333_v37 = vsel %vm776_vm0, %v4141_v39, 0  ;;  %v4590_v38 = vpack.c.bf16 %v4103_v4, %v4097_v63  ;;  %3549 = vmatprep.mubr.msk.bf16.mxu0 %vm727_vm3, %v4580_v31  ;;  %v4599_v28 = vpack.c.bf16 %v4212_v45, %v4215_v20  ;;  %v4603_v8 = vpack.c.bf16 %v4244_v17, %v4228_v58  ;;  %v268_v39 = vld [vmem:[%s4035_s8 + $0xf8] sm:$0xff] }
  0x6a   : > { %v1221_v55 = vsel %vm1153_vm4, %v1219_v23, %v1220_v46  ;;  %v1223_v34 = vsel %vm1153_vm4, %v1220_v46, %v1222_v50  ;;  %v1157_v63 = vrot.slane %v4017_v9, 2  ;;  %v4607_v4 = vpack.c.bf16 %v1218_v41, %v1216_v16 }
  0x6b   : > { %v1224_v60 = vrot.slane %v4489_v19, 2  ;;  %v1225_v61 = vrot.slane %v4497_v52, 2  ;;  %v4618_v45 = vpack.c.bf16 %v1223_v34, %v1221_v55  ;;  %v1227_v20 = vrot.slane %v4500_v49, 2 }
  0x6c   : > { %3394 = vmatmul.mubr.msk.bf16.vlgmr.msra.gmra.mrb[0].mxu1 %vm727_vm3, %v4544_v2  ;;  %v1229_v9 = vrot.slane %v4503_v59, 2  ;;  %v306_v58 = vmul.f32 %v4028_v13, %v267_v15  ;;  %v307_v17 = vmul.f32 %v4028_v13, %v268_v39  ;;  %v4628_v22 = vpack.c.bf16 %v4271_v57, %v4265_v53 }
  0x6d   : > { %3426 = vmatpush3.bf16.msra.mxu1 %v1333_v37  ;;  %3397 = vmatprep.mubr.msk.bf16.mxu1 %vm727_vm3, %v4590_v38  ;;  %v4632_v40 = vpack.c.bf16 %v4311_v44, %v4303_v6  ;;  %v1155_v49 = vrot.slane %v4001_v5, 2  ;;  %v1230_v29 = vrot.slane %v4512_v0, 2  ;;  %v1232_v43 = vrot.slane %v4515_v27, 2 }
  0x6e   : > { %v345_v16 = vadd.f32 %v4040_v14, %v306_v58  ;;  %v4640_v23 = vpack.c.bf16 %v4352_v10, %v4347_v1  ;;  %3924 = vmatprep.subr.msk.bf16.mxu1 %vm776_vm0, %v4614_v21  ;;  %v4646_v13 = vpack.c.bf16 %v4118_v25, %v4125_v30  ;;  %v346_v53 = vadd.f32 %v4040_v14, %v307_v17  ;;  %v3183_v17 = vld [vmem:[%s5085_s3 + $0x10] sm:$0x3] }
  0x6f   : > { %v4651_v5 = vpack.c.bf16 %v4375_v11, %v4368_v62  ;;  %v4655_v57 = vpack.c.bf16 %v4431_v36, %v4423_v12  ;;  %v1226_v6 = vsel %vm1153_vm4, %v1224_v60, %v1225_v61  ;;  %v4662_v25 = vpack.c.bf16 %v4448_v26, %v4442_v7 }
  0x70   : > { %3550 = vmatmul.mubr.msk.bf16.gmra.mrb[20].mxu0 %vm727_vm3, %v4607_v4  ;;  %v377_v44 = vmax.f32 %v345_v16, 0.0  ;;  %v4666_v14 = vpack.c.bf16 %v4512_v0, %v4503_v59  ;;  %v1228_v30 = vsel %vm1153_vm4, %v1225_v61, %v1227_v20  ;;  %v378_v1 = vmax.f32 %v346_v53, 0.0  ;;  %v5140_v16 = vld [vmem:[#allocation19_spill] sm:$0xff]  ;;  %v5141_v53 = vld [vmem:[#allocation20_spill] sm:$0xff] }
  0x71   : > { %3553 = vmatprep.mubr.msk.bf16.mxu0 %vm727_vm3, %v4618_v45  ;;  %v1156_v10 = vsel %vm1153_vm4, %v1154_v47, %v1155_v49  ;;  %v1158_v62 = vsel %vm1153_vm4, %v1155_v49, %v1157_v63  ;;  %v1231_v11 = vsel %vm1153_vm4, %v1229_v9, %v1230_v29  ;;  %v1233_v12 = vsel %vm1153_vm4, %v1230_v29, %v1232_v43  ;;  %v5137_v49 = vld [vmem:[#allocation15_spill] sm:$0xff]  ;;  %v5138_v29 = vld [vmem:[#allocation16_spill] sm:$0xff] }
  0x72   : > { %v460_v36 = vrot.slane %v377_v44, 7  ;;  %v4675_v7 = vpack.c.bf16 %v1158_v62, %v1156_v10  ;;  %v461_v26 = vrot.slane %v378_v1, 7  ;;  %v4679_v59 = vpack.c.bf16 %v1228_v30, %v1226_v6  ;;  %v5139_v43 = vld [vmem:[#allocation4_spill] sm:$0xff]  ;;  %v5142_v44 = vld [vmem:[#allocation5_spill] sm:$0xff]  ;;  %v5143_v30 = vld [vmem:[#allocation6_spill] sm:$0xff] }
  0x73   : > { %v4684_v27 = vpack.c.bf16 %v1233_v12, %v1231_v11  ;;  %v2351_v58 = vsel %vm776_vm0, %v4361_v51, 0  ;;  %v4738_v51 = vpack.c.bf16 %v4497_v52, %v4489_v19  ;;  %v1535_v19 = vsel %vm776_vm0, %v4614_v21, 0  ;;  %v3940_v52 = vld [vmem:[%s5085_s3 + $0x8] sm:$0x3]  ;;  %v5145_v1 = vld [vmem:[#allocation8_spill] sm:$0xff]  ;;  %v5146_v10 = vld [vmem:[#allocation9_spill] sm:$0xff] }
  0x74   : > { %3398 = vmatmul.mubr.msk.bf16.gmra.mrb[4].mxu1 %vm727_vm3, %v4646_v13  ;;  %v529_v0 = vsel %vm412_vm1, 0.0, %v460_v36  ;;  %v462_v41 = vsel %vm412_vm1, %v460_v36, %v461_v26  ;;  %v546_v46 = vsel %vm412_vm1, %v461_v26, 0.0  ;;  %v2549_v6 = vsel %vm776_vm0, %v3183_v17, 0  ;;  %v5147_v62 = vld [vmem:[#allocation10_spill] sm:$0xff]  ;;  %v5148_v11 = vld [vmem:[#allocation11_spill] sm:$0xff]  ;;  %v5149_v12 = vld [vmem:[#allocation12_spill] sm:$0xff] }
  0x75   : > { %3401 = vmatprep.mubr.msk.bf16.mxu1 %vm727_vm3, %v4569_v33  ;;  %v1941_v50 = vrot.slane %v529_v0, 2  ;;  %v1942_v47 = vrot.slane %v462_v41, 2  ;;  %v1944_v37 = vrot.slane %v546_v46, 2  ;;  %v1732_v39 = vrot.slane %v529_v0, 1  ;;  %v5150_v36 = vld [vmem:[#allocation14_spill] sm:$0xff]  ;;  %v5151_v26 = vld [vmem:[#allocation17_spill] sm:$0xff] }
  0x76   : > { %v1733_v63 = vrot.slane %v462_v41, 1  ;;  %v1735_v60 = vrot.slane %v546_v46, 1  ;;  %v1528_v21 = vpack.c.bf16 %v462_v41, %v529_v0  ;;  %v5152_v0 = vld [vmem:[#allocation2_spill] sm:$0xff] }
  0x77   : > { %v1943_v15 = vsel %vm1153_vm4, %v1941_v50, %v1942_v47  ;;  %v1945_v55 = vsel %vm1153_vm4, %v1942_v47, %v1944_v37  ;;  %v5153_v41 = vld [vmem:[#allocation18_spill] sm:$0xff] }
  0x78   : > { %3554 = vmatmul.mubr.msk.bf16.gmra.mrb[24].mxu0 %vm727_vm3, %v4679_v59  ;;  %v4696_v34 = vpack.c.bf16 %v1945_v55, %v1943_v15  ;;  %v1734_v61 = vsel %vm596_vm2, %v1732_v39, %v1733_v63  ;;  %v1736_v20 = vsel %vm596_vm2, %v1733_v63, %v1735_v60 }
  0x79   : > { %3557 = vmatprep.mubr.msk.bf16.mxu0 %vm727_vm3, %v4684_v27  ;;  %v4706_v9 = vpack.c.bf16 %v1736_v20, %v1734_v61 }
  0x7c   : > { %3402 = vmatmul.mubr.msk.bf16.gmra.mrb[8].mxu1 %vm727_vm3, %v4575_v56 }
  0x7d   : > { %3405 = vmatprep.mubr.msk.bf16.mxu1 %vm727_vm3, %v4599_v28 }
  0x80   : > { %3558 = vmatmul.mubr.msk.bf16.gmra.mrb[28].mxu0 %vm727_vm3, %v4696_v34 }
  0x81   : > { %3563 = vmatprep.mubr.msk.bf16.mxu0 %vm727_vm3, %v4590_v38 }
  0x84   : > { %3406 = vmatmul.mubr.msk.bf16.gmra.mrb[12].mxu1 %vm727_vm3, %v4603_v8 }
  0x85   : > { %3409 = vmatprep.mubr.msk.bf16.mxu1 %vm727_vm3, %v4628_v22 }
  0x88   : > { %3564 = vmatmul.mubr.msk.bf16.vlgmr.msra.gmra.mrb[0].mxu0 %vm727_vm3, %v4646_v13 }
  0x89   : > { %3596 = vmatpush3.bf16.msra.mxu0 %v2351_v58  ;;  %3567 = vmatprep.mubr.msk.bf16.mxu0 %vm727_vm3, %v4569_v33 }
  0x8a   : > { %3930 = vmatprep.subr.msk.bf16.mxu0 %vm776_vm0, %v3183_v17 }
  0x8c   : > { %3410 = vmatmul.mubr.msk.bf16.gmra.mrb[16].mxu1 %vm727_vm3, %v4632_v40 }
  0x8d   : > { %3413 = vmatprep.mubr.msk.bf16.mxu1 %vm727_vm3, %v4640_v23 }
  0x90   : > { %3568 = vmatmul.mubr.msk.bf16.gmra.mrb[4].mxu0 %vm727_vm3, %v4575_v56 }
  0x91   : > { %3571 = vmatprep.mubr.msk.bf16.mxu0 %vm727_vm3, %v4599_v28 }
  0x94   : > { %3414 = vmatmul.mubr.msk.bf16.gmra.mrb[20].mxu1 %vm727_vm3, %v4651_v5 }
  0x95   : > { %3417 = vmatprep.mubr.msk.bf16.mxu1 %vm727_vm3, %v4655_v57 }
  0x98   : > { %3572 = vmatmul.mubr.msk.bf16.gmra.mrb[8].mxu0 %vm727_vm3, %v4603_v8 }
  0x99   : > { %3575 = vmatprep.mubr.msk.bf16.mxu0 %vm727_vm3, %v4628_v22 }
  0x9c   : > { %3418 = vmatmul.mubr.msk.bf16.gmra.mrb[24].mxu1 %vm727_vm3, %v4662_v25 }
  0x9d   : > { %3421 = vmatprep.mubr.msk.bf16.mxu1 %vm727_vm3, %v4738_v51 }
  0xa0   : > { %3576 = vmatmul.mubr.msk.bf16.gmra.mrb[12].mxu0 %vm727_vm3, %v4632_v40 }
  0xa1   : > { %3579 = vmatprep.mubr.msk.bf16.mxu0 %vm727_vm3, %v4640_v23 }
  0xa4   : > { %3422 = vmatmul.mubr.msk.bf16.gmra.mrb[28].mxu1 %vm727_vm3, %v4666_v14 }
  0xa5   : > { %3427 = vmatprep.mubr.msk.bf16.mxu1 %vm727_vm3, %v4675_v7 }
  0xa8   : > { %3580 = vmatmul.mubr.msk.bf16.gmra.mrb[16].mxu0 %vm727_vm3, %v4651_v5 }
  0xa9   : > { %3583 = vmatprep.mubr.msk.bf16.mxu0 %vm727_vm3, %v4655_v57 }
  0xac   : > { %3428 = vmatmul.mubr.msk.bf16.vlgmr.msra.gmra.mrb[0].mxu1 %vm727_vm3, %v4305_v18  ;;  %v5136_v18 = vld [vmem:[#allocation13_spill] sm:$0xff] }
  0xad   : > { %3460 = vmatpush3.bf16.msra.mxu1 %v1535_v19  ;;  %3431 = vmatprep.mubr.msk.bf16.mxu1 %vm727_vm3, %v4307_v24 }
  0xae   : > { %3926 = vmatprep.subr.msk.bf16.mxu1 %vm776_vm0, %v3940_v52 }
  0xb0   : > { %3584 = vmatmul.mubr.msk.bf16.gmra.mrb[20].mxu0 %vm727_vm3, %v4662_v25 }
  0xb1   : > { %3587 = vmatprep.mubr.msk.bf16.mxu0 %vm727_vm3, %v4738_v51 }
  0xb4   : > { %3432 = vmatmul.mubr.msk.bf16.gmra.mrb[4].mxu1 %vm727_vm3, %v4370_v32 }
  0xb5   : > { %3435 = vmatprep.mubr.msk.bf16.mxu1 %vm727_vm3, %v5136_v18 }
  0xb8   : > { %3588 = vmatmul.mubr.msk.bf16.gmra.mrb[24].mxu0 %vm727_vm3, %v4666_v14 }
  0xb9   : > { %3591 = vmatprep.mubr.msk.bf16.mxu0 %vm727_vm3, %v1528_v21 }
  0xbc   : > { %3436 = vmatmul.mubr.msk.bf16.gmra.mrb[8].mxu1 %vm727_vm3, %v5137_v49 }
  0xbd   : > { %3439 = vmatprep.mubr.msk.bf16.mxu1 %vm727_vm3, %v5138_v29 }
  0xc0   : > { %3592 = vmatmul.mubr.msk.bf16.gmra.mrb[28].mxu0 %vm727_vm3, %v4524_v54  ;;  %v5144_v54 = vld [vmem:[#allocation7_spill] sm:$0xff] }
  0xc1   : > { %3597 = vmatprep.mubr.msk.bf16.mxu0 %vm727_vm3, %v5139_v43 }
  0xc4   : > { %3440 = vmatmul.mubr.msk.bf16.gmra.mrb[12].mxu1 %vm727_vm3, %v5140_v16 }
  0xc5   : > { %3443 = vmatprep.mubr.msk.bf16.mxu1 %vm727_vm3, %v5141_v53 }
  0xc8   : > { %3598 = vmatmul.mubr.msk.bf16.vlgmr.msra.gmra.mrb[0].mxu0 %vm727_vm3, %v5142_v44 }
  0xc9   : > { %3630 = vmatpush3.bf16.msra.mxu0 %v2549_v6  ;;  %3601 = vmatprep.mubr.msk.bf16.mxu0 %vm727_vm3, %v5143_v30 }
  0xcc   : > { %3444 = vmatmul.mubr.msk.bf16.gmra.mrb[16].mxu1 %vm727_vm3, %v4550_v48 }
  0xcd   : > { %3447 = vmatprep.mubr.msk.bf16.mxu1 %vm727_vm3, %v4563_v42 }
  0xd0   : > { %3602 = vmatmul.mubr.msk.bf16.gmra.mrb[4].mxu0 %vm727_vm3, %v5144_v54 }
  0xd1   : > { %3605 = vmatprep.mubr.msk.bf16.mxu0 %vm727_vm3, %v5145_v1 }
  0xd4   : > { %3448 = vmatmul.mubr.msk.bf16.gmra.mrb[20].mxu1 %vm727_vm3, %v4580_v31 }
  0xd5   : > { %3451 = vmatprep.mubr.msk.bf16.mxu1 %vm727_vm3, %v4607_v4 }
  0xd8   : > { %3606 = vmatmul.mubr.msk.bf16.gmra.mrb[8].mxu0 %vm727_vm3, %v5146_v10 }
  0xd9   : > { %3609 = vmatprep.mubr.msk.bf16.mxu0 %vm727_vm3, %v5147_v62 }
  0xdc   : > { %3452 = vmatmul.mubr.msk.bf16.gmra.mrb[24].mxu1 %vm727_vm3, %v4618_v45 }
  0xdd   : > { %3455 = vmatprep.mubr.msk.bf16.mxu1 %vm727_vm3, %v4679_v59 }
  0xe0   : > { %3610 = vmatmul.mubr.msk.bf16.gmra.mrb[12].mxu0 %vm727_vm3, %v5148_v11 }
  0xe1   : > { %3613 = vmatprep.mubr.msk.bf16.mxu0 %vm727_vm3, %v5149_v12 }
  0xe4   : > { %3456 = vmatmul.mubr.msk.bf16.gmra.mrb[28].mxu1 %vm727_vm3, %v4684_v27 }
  0xe5   : > { %3461 = vmatprep.mubr.msk.bf16.mxu1 %vm727_vm3, %v4544_v2  ;;  %v5154_v2 = vld [vmem:[#allocation3_spill] sm:$0xff] }
  0xe8   : > { %3614 = vmatmul.mubr.msk.bf16.gmra.mrb[16].mxu0 %vm727_vm3, %v5150_v36 }
  0xe9   : > { %3617 = vmatprep.mubr.msk.bf16.mxu0 %vm727_vm3, %v5151_v26 }
  0xec   : > { %3462 = vmatmul.mubr.msk.bf16.vlgmr.msra.gmra.mrb[0].mxu1 %vm727_vm3, %v4590_v38 }
  0xed   : > { %3664 = vmatpush3.bf16.msra.mxu1 %v5152_v0  ;;  %3465 = vmatprep.mubr.msk.bf16.mxu1 %vm727_vm3, %v4646_v13 }
  0xf0   : > { %3618 = vmatmul.mubr.msk.bf16.gmra.mrb[20].mxu0 %vm727_vm3, %v5153_v41 }
  0xf1   : > { %3621 = vmatprep.mubr.msk.bf16.mxu0 %vm727_vm3, %v4530_v35 }
  0xf4   : > { %3466 = vmatmul.mubr.msk.bf16.gmra.mrb[4].mxu1 %vm727_vm3, %v4569_v33 }
  0xf5   : > { %3469 = vmatprep.mubr.msk.bf16.mxu1 %vm727_vm3, %v4575_v56 }
  0xf8   : > { %3622 = vmatmul.mubr.msk.bf16.gmra.mrb[24].mxu0 %vm727_vm3, %v4535_v3 }
  0xf9   : > { %3625 = vmatprep.mubr.msk.bf16.mxu0 %vm727_vm3, %v4706_v9 }
  0xfc   : > { %3470 = vmatmul.mubr.msk.bf16.gmra.mrb[8].mxu1 %vm727_vm3, %v4599_v28 }
  0xfd   : > { %3473 = vmatprep.mubr.msk.bf16.mxu1 %vm727_vm3, %v4603_v8 }
 0x100   : > { %3626 = vmatmul.mubr.msk.bf16.gmra.mrb[28].mxu0 %vm727_vm3, %v5154_v2 }
 0x101   : > { %3631 = vmatprep.mubr.msk.bf16.mxu0 %vm727_vm3, %v4307_v24 }
 0x104   : > { %3474 = vmatmul.mubr.msk.bf16.gmra.mrb[12].mxu1 %vm727_vm3, %v4628_v22 }
 0x105   : > { %3477 = vmatprep.mubr.msk.bf16.mxu1 %vm727_vm3, %v4632_v40 }
 0x108   : > { %3632 = vmatmul.mubr.msk.bf16.vlgmr.msra.gmra.mrb[0].mxu0 %vm727_vm3, %v4370_v32 }
 0x109   : > { %3635 = vmatprep.mubr.msk.bf16.mxu0 %vm727_vm3, %v5136_v18 }
 0x10c   : > { %3478 = vmatmul.mubr.msk.bf16.gmra.mrb[16].mxu1 %vm727_vm3, %v4640_v23 }
 0x10d   : > { %3481 = vmatprep.mubr.msk.bf16.mxu1 %vm727_vm3, %v4651_v5 }
 0x110   : > { %3636 = vmatmul.mubr.msk.bf16.gmra.mrb[4].mxu0 %vm727_vm3, %v5137_v49 }
 0x111   : > { %3639 = vmatprep.mubr.msk.bf16.mxu0 %vm727_vm3, %v5138_v29 }
 0x114   : > { %3482 = vmatmul.mubr.msk.bf16.gmra.mrb[20].mxu1 %vm727_vm3, %v4655_v57 }
 0x115   : > { %3485 = vmatprep.mubr.msk.bf16.mxu1 %vm727_vm3, %v4662_v25 }
 0x118   : > { %3640 = vmatmul.mubr.msk.bf16.gmra.mrb[8].mxu0 %vm727_vm3, %v5140_v16 }
 0x119   : > { %3643 = vmatprep.mubr.msk.bf16.mxu0 %vm727_vm3, %v5141_v53 }
 0x11c   : > { %3486 = vmatmul.mubr.msk.bf16.gmra.mrb[24].mxu1 %vm727_vm3, %v4738_v51 }
 0x11d   : > { %3489 = vmatprep.mubr.msk.bf16.mxu1 %vm727_vm3, %v4666_v14 }
 0x120   : > { %3644 = vmatmul.mubr.msk.bf16.gmra.mrb[12].mxu0 %vm727_vm3, %v4550_v48 }
 0x121   : > { %3647 = vmatprep.mubr.msk.bf16.mxu0 %vm727_vm3, %v4563_v42 }
 0x124   : > { %3490 = vmatmul.mubr.msk.bf16.gmra.mrb[28].mxu1 %vm727_vm3, %v1528_v21 }
 0x125   : > { %3511 = vmatprep.mubr.msk.bf16.mxu1 %vm727_vm3, %v5148_v11 }
 0x128   : > { %3648 = vmatmul.mubr.msk.bf16.gmra.mrb[16].mxu0 %vm727_vm3, %v4580_v31 }
 0x129   : > { %3651 = vmatprep.mubr.msk.bf16.mxu0 %vm727_vm3, %v4607_v4 }
 0x12c   : > { %3512 = vmatmul.mubr.msk.bf16.vlgmr.msra.gmra.mrb[16].mxu1 %vm727_vm3, %v5149_v12 }
 0x12d   : > { %3515 = vmatprep.mubr.msk.bf16.mxu1 %vm727_vm3, %v5150_v36 }
 0x130   : > { %3652 = vmatmul.mubr.msk.bf16.gmra.mrb[20].mxu0 %vm727_vm3, %v4618_v45 }
 0x131   : > { %3655 = vmatprep.mubr.msk.bf16.mxu0 %vm727_vm3, %v4679_v59 }
 0x134   : > { %3516 = vmatmul.mubr.msk.bf16.gmra.mrb[20].mxu1 %vm727_vm3, %v5151_v26 }
 0x135   : > { %3519 = vmatprep.mubr.msk.bf16.mxu1 %vm727_vm3, %v5153_v41 }
 0x138   : > { %3656 = vmatmul.mubr.msk.bf16.gmra.mrb[24].mxu0 %vm727_vm3, %v4684_v27 }
 0x139   : > { %3659 = vmatprep.mubr.msk.bf16.mxu0 %vm727_vm3, %v4696_v34 }
 0x13c   : > { %3520 = vmatmul.mubr.msk.bf16.gmra.mrb[24].mxu1 %vm727_vm3, %v4530_v35 }
 0x13d   : > { %3523 = vmatprep.mubr.msk.bf16.mxu1 %vm727_vm3, %v4535_v3 }
 0x140   : > { %3660 = vmatmul.mubr.msk.bf16.gmra.mrb[28].mxu0 %vm727_vm3, %v4675_v7 }
 0x144   : > { %3524 = vmatmul.mubr.msk.bf16.gmra.mrb[28].mxu1 %vm727_vm3, %v4706_v9 }
 0x1bf   : > { %v3463_v24 = vpop.f32.mrb[0].mxu1 }
 0x1c0   : > { %v1571_v32 = vpop.f32.mrb[1].mxu1 }
 0x1c1   : > { %v3464_v48 = vpop.f32.mrb[2].mxu1 }
 0x1c2   : > { %v1574_v42 = vpop.f32.mrb[3].mxu1 }
 0x1c7   : > { %v3467_v33 = vpop.f32.mrb[4].mxu1 }
 0x1c8   : > { %v1587_v56 = vpop.f32.mrb[5].mxu1 }
 0x1c9   : > { %v3468_v31 = vpop.f32.mrb[6].mxu1 }
 0x1ca   : > { %v1590_v38 = vpop.f32.mrb[7].mxu1 }
 0x1cf   : > { %v4916_v28 = vpop.f32.mrb[8].mxu1 }
 0x1d0   : > { %v4918_v35 = vpop.f32.mrb[9].mxu1 }
 0x1d1   : > { %v4920_v3 = vpop.f32.mrb[10].mxu1 }
 0x1d2   : > { %v4922_v8 = vpop.f32.mrb[11].mxu1 }
 0x1d7   : > { %v4924_v4 = vpop.f32.mrb[12].mxu1 }
 0x1d8   : > { %v4926_v45 = vpop.f32.mrb[13].mxu1 }
 0x1d9   : > { %v4928_v22 = vpop.f32.mrb[14].mxu1 }
 0x1da   : > { %v4930_v40 = vpop.f32.mrb[15].mxu1 }
 0x1db   : > { %v3633_v23 = vpop.f32.mrb[0].mxu0 }
 0x1dc   : > { %v3665_v13 = vadd.f32 %v3633_v23, %v3463_v24  ;;  %v2585_v5 = vpop.f32.mrb[1].mxu0 }
 0x1dd   : > { %v3666_v57 = vadd.f32 %v2585_v5, %v1571_v32  ;;  %v3634_v25 = vpop.f32.mrb[2].mxu0 }
 0x1de   : > { %2747 = vst.msk [vmem:[%s4937_s27 + $0x10] sm:$0xff] %vm2744_vm5, %v3665_v13  ;;  %v3667_v14 = vadd.f32 %v3634_v25, %v3464_v48  ;;  %v2588_v7 = vpop.f32.mrb[3].mxu0  ;;  %v2850_v46 = vmul.f32 %v3665_v13, %v3665_v13  ;;  %v2780_v34 = vsel %vm2744_vm5, %v3665_v13, 0.0 }
 0x1df   : > { %2745 = vst.msk [vmem:[%s4937_s27] sm:$0xff] %vm2744_vm5, %v3666_v57  ;;  %v2848_v59 = vmul.f32 %v3666_v57, %v3666_v57  ;;  %v3668_v27 = vadd.f32 %v2588_v7, %v1574_v42  ;;  %v2777_v50 = vsel %vm2744_vm5, %v3666_v57, 0.0 }
 0x1e0   : > { %2748 = vst.msk [vmem:[%s4937_s27 + $0x18] sm:$0xff] %vm2744_vm5, %v3667_v14  ;;  %v2851_v15 = vmul.f32 %v3667_v14, %v3667_v14  ;;  %v2883_v17 = vsel %vm2744_vm5, %v2850_v46, 0.0  ;;  %v2782_v51 = vsel %vm2744_vm5, %v3667_v14, 0.0 }
 0x1e1   : > { %2746 = vst.msk [vmem:[%s4937_s27 + $0x8] sm:$0xff] %vm2744_vm5, %v3668_v27  ;;  %v2778_v47 = vsel %vm2744_vm5, %v3668_v27, 0.0  ;;  %v2849_v37 = vmul.f32 %v3668_v27, %v3668_v27  ;;  %v2880_v39 = vsel %vm2744_vm5, %v2848_v59, 0.0 }
 0x1e2   : > { %v2779_v55 = vadd.f32 %v2778_v47, %v2777_v50  ;;  %v2885_v18 = vsel %vm2744_vm5, %v2851_v15, 0.0 }
 0x1e3   : > { %v2881_v63 = vsel %vm2744_vm5, %v2849_v37, 0.0  ;;  %v3637_v60 = vpop.f32.mrb[4].mxu0 }
 0x1e4   : > { %v2781_v61 = vadd.f32 %v2780_v34, %v2779_v55  ;;  %v2882_v20 = vadd.f32 %v2881_v63, %v2880_v39  ;;  %v3669_v9 = vadd.f32 %v3637_v60, %v3467_v33  ;;  %v2601_v58 = vpop.f32.mrb[5].mxu0 }
 0x1e5   : > { %v3670_v19 = vadd.f32 %v2601_v58, %v1587_v56  ;;  %v3638_v52 = vpop.f32.mrb[6].mxu0 }
 0x1e6   : > { %v2884_v21 = vadd.f32 %v2883_v17, %v2882_v20  ;;  %2751 = vst.msk [vmem:[%s4937_s27 + $0x30] sm:$0xff] %vm2744_vm5, %v3669_v9  ;;  %v2783_v49 = vadd.f32 %v2782_v51, %v2781_v61  ;;  %v2604_v29 = vpop.f32.mrb[7].mxu0  ;;  %v3671_v53 = vadd.f32 %v3638_v52, %v3468_v31  ;;  %v2854_v10 = vmul.f32 %v3669_v9, %v3669_v9 }
 0x1e7   : > { %2749 = vst.msk [vmem:[%s4937_s27 + $0x20] sm:$0xff] %vm2744_vm5, %v3670_v19  ;;  %v2784_v43 = vsel %vm2744_vm5, %v3670_v19, 0.0  ;;  %v2852_v16 = vmul.f32 %v3670_v19, %v3670_v19  ;;  %v3672_v6 = vadd.f32 %v2604_v29, %v1590_v38  ;;  %v2788_v36 = vsel %vm2744_vm5, %v3669_v9, 0.0 }
 0x1e8   : > { %v2785_v44 = vadd.f32 %v2784_v43, %v2783_v49  ;;  %v2886_v30 = vadd.f32 %v2885_v18, %v2884_v21  ;;  %2752 = vst.msk [vmem:[%s4937_s27 + $0x38] sm:$0xff] %vm2744_vm5, %v3671_v53  ;;  %v2855_v0 = vmul.f32 %v3671_v53, %v3671_v53  ;;  %v2790_v48 = vsel %vm2744_vm5, %v3671_v53, 0.0 }
 0x1e9   : > { %v2887_v54 = vsel %vm2744_vm5, %v2852_v16, 0.0  ;;  %2750 = vst.msk [vmem:[%s4937_s27 + $0x28] sm:$0xff] %vm2744_vm5, %v3672_v6  ;;  %v2786_v1 = vsel %vm2744_vm5, %v3672_v6, 0.0  ;;  %v2853_v12 = vmul.f32 %v3672_v6, %v3672_v6  ;;  %v2891_v31 = vsel %vm2744_vm5, %v2854_v10, 0.0 }
 0x1ea   : > { %v2888_v62 = vadd.f32 %v2887_v54, %v2886_v30  ;;  %v2787_v11 = vadd.f32 %v2786_v1, %v2785_v44 }
 0x1eb   : > { %v3641_v26 = vpop.f32.mrb[8].mxu0  ;;  %v2889_v2 = vsel %vm2744_vm5, %v2853_v12, 0.0 }
 0x1ec   : > { %v2789_v41 = vadd.f32 %v2788_v36, %v2787_v11  ;;  %v3673_v24 = vadd.f32 %v3641_v26, %v4916_v28  ;;  %v2617_v32 = vpop.f32.mrb[9].mxu0  ;;  %v2890_v42 = vadd.f32 %v2889_v2, %v2888_v62 }
 0x1ed   : > { %v3674_v33 = vadd.f32 %v2617_v32, %v4918_v35  ;;  %v3642_v56 = vpop.f32.mrb[10].mxu0  ;;  %v2893_v35 = vsel %vm2744_vm5, %v2855_v0, 0.0 }
 0x1ee   : > { %2755 = vst.msk [vmem:[%s4937_s27 + $0x50] sm:$0xff] %vm2744_vm5, %v3673_v24  ;;  %v2791_v38 = vadd.f32 %v2790_v48, %v2789_v41  ;;  %v3675_v23 = vadd.f32 %v3642_v56, %v4920_v3  ;;  %v2620_v13 = vpop.f32.mrb[11].mxu0  ;;  %v2892_v5 = vadd.f32 %v2891_v31, %v2890_v42  ;;  %v2858_v46 = vmul.f32 %v3673_v24, %v3673_v24 }
 0x1ef   : > { %2753 = vst.msk [vmem:[%s4937_s27 + $0x40] sm:$0xff] %vm2744_vm5, %v3674_v33  ;;  %v2792_v28 = vsel %vm2744_vm5, %v3674_v33, 0.0  ;;  %v2856_v57 = vmul.f32 %v3674_v33, %v3674_v33  ;;  %v3676_v25 = vadd.f32 %v2620_v13, %v4922_v8  ;;  %v2796_v47 = vsel %vm2744_vm5, %v3673_v24, 0.0 }
 0x1f0   : > { %v2793_v14 = vadd.f32 %v2792_v28, %v2791_v38  ;;  %2756 = vst.msk [vmem:[%s4937_s27 + $0x58] sm:$0xff] %vm2744_vm5, %v3675_v23  ;;  %v2894_v7 = vadd.f32 %v2893_v35, %v2892_v5  ;;  %v2859_v55 = vmul.f32 %v3675_v23, %v3675_v23  ;;  %v2798_v60 = vsel %vm2744_vm5, %v3675_v23, 0.0 }
 0x1f1   : > { %v2895_v59 = vsel %vm2744_vm5, %v2856_v57, 0.0  ;;  %2754 = vst.msk [vmem:[%s4937_s27 + $0x48] sm:$0xff] %vm2744_vm5, %v3676_v25  ;;  %v2794_v3 = vsel %vm2744_vm5, %v3676_v25, 0.0  ;;  %v2857_v27 = vmul.f32 %v3676_v25, %v3676_v25  ;;  %v2899_v58 = vsel %vm2744_vm5, %v2858_v46, 0.0 }
 0x1f2   : > { %v2795_v50 = vadd.f32 %v2794_v3, %v2793_v14  ;;  %v2896_v37 = vadd.f32 %v2895_v59, %v2894_v7 }
 0x1f3   : > { %v2897_v8 = vsel %vm2744_vm5, %v2857_v27, 0.0  ;;  %v3645_v15 = vpop.f32.mrb[12].mxu0 }
 0x1f4   : > { %v2797_v34 = vadd.f32 %v2796_v47, %v2795_v50  ;;  %v3677_v39 = vadd.f32 %v3645_v15, %v4924_v4  ;;  %v2633_v63 = vpop.f32.mrb[13].mxu0  ;;  %v2898_v61 = vadd.f32 %v2897_v8, %v2896_v37 }
 0x1f5   : > { %v3678_v20 = vadd.f32 %v2633_v63, %v4926_v45  ;;  %v3646_v9 = vpop.f32.mrb[14].mxu0  ;;  %v2901_v45 = vsel %vm2744_vm5, %v2859_v55, 0.0 }
 0x1f6   : > { %2759 = vst.msk [vmem:[%s4937_s27 + $0x70] sm:$0xff] %vm2744_vm5, %v3677_v39  ;;  %v2799_v17 = vadd.f32 %v2798_v60, %v2797_v34  ;;  %v3679_v51 = vadd.f32 %v3646_v9, %v4928_v22  ;;  %v2636_v19 = vpop.f32.mrb[15].mxu0  ;;  %v2900_v52 = vadd.f32 %v2899_v58, %v2898_v61  ;;  %v2862_v53 = vmul.f32 %v3677_v39, %v3677_v39 }
 0x1f7   : > { %2757 = vst.msk [vmem:[%s4937_s27 + $0x60] sm:$0xff] %vm2744_vm5, %v3678_v20  ;;  %v2800_v4 = vsel %vm2744_vm5, %v3678_v20, 0.0  ;;  %v2860_v18 = vmul.f32 %v3678_v20, %v3678_v20  ;;  %v3680_v21 = vadd.f32 %v2636_v19, %v4930_v40  ;;  %v2804_v44 = vsel %vm2744_vm5, %v3677_v39, 0.0 }
 0x1f8   : > { %v2801_v49 = vadd.f32 %v2800_v4, %v2799_v17  ;;  %2760 = vst.msk [vmem:[%s4937_s27 + $0x78] sm:$0xff] %vm2744_vm5, %v3679_v51  ;;  %v2902_v29 = vadd.f32 %v2901_v45, %v2900_v52  ;;  %v2863_v1 = vmul.f32 %v3679_v51, %v3679_v51  ;;  %v2806_v11 = vsel %vm2744_vm5, %v3679_v51, 0.0 }
 0x1f9   : > { %v2903_v43 = vsel %vm2744_vm5, %v2860_v18, 0.0  ;;  %2758 = vst.msk [vmem:[%s4937_s27 + $0x68] sm:$0xff] %vm2744_vm5, %v3680_v21  ;;  %v2802_v22 = vsel %vm2744_vm5, %v3680_v21, 0.0  ;;  %v2861_v16 = vmul.f32 %v3680_v21, %v3680_v21  ;;  %v2907_v26 = vsel %vm2744_vm5, %v2862_v53, 0.0 }
 0x1fa   : > { %v2803_v6 = vadd.f32 %v2802_v22, %v2801_v49  ;;  %v2904_v30 = vadd.f32 %v2903_v43, %v2902_v29  ;;  %v2909_v32 = vsel %vm2744_vm5, %v2863_v1, 0.0 }
 0x1fb   : > { %v2905_v40 = vsel %vm2744_vm5, %v2861_v16, 0.0  ;;  %v3649_v54 = vpop.f32.mrb[16].mxu0 }
 0x1fc   : > { %v2805_v10 = vadd.f32 %v2804_v44, %v2803_v6  ;;  %v2649_v62 = vpop.f32.mrb[17].mxu0  ;;  %v2906_v12 = vadd.f32 %v2905_v40, %v2904_v30 }
 0x1fd   : > { %v3650_v36 = vpop.f32.mrb[18].mxu0 }
 0x1fe   : > { %v2807_v0 = vadd.f32 %v2806_v11, %v2805_v10  ;;  %v2652_v41 = vpop.f32.mrb[19].mxu0  ;;  %v2908_v2 = vadd.f32 %v2907_v26, %v2906_v12 }
 0x1ff   : > { %v3513_v24 = vpop.f32.mrb[16].mxu1 }
 0x200   : > { %v1846_v48 = vpop.f32.mrb[17].mxu1  ;;  %v3681_v42 = vadd.f32 %v3649_v54, %v3513_v24  ;;  %v2910_v31 = vadd.f32 %v2909_v32, %v2908_v2 }
 0x201   : > { %v3514_v33 = vpop.f32.mrb[18].mxu1  ;;  %v3682_v56 = vadd.f32 %v2649_v62, %v1846_v48 }
 0x202   : > { %2763 = vst.msk [vmem:[%s4937_s27 + $0x90] sm:$0xff] %vm2744_vm5, %v3681_v42  ;;  %v1849_v38 = vpop.f32.mrb[19].mxu1  ;;  %v3683_v23 = vadd.f32 %v3650_v36, %v3514_v33  ;;  %v2866_v14 = vmul.f32 %v3681_v42, %v3681_v42  ;;  %v2812_v8 = vsel %vm2744_vm5, %v3681_v42, 0.0 }
 0x203   : > { %2761 = vst.msk [vmem:[%s4937_s27 + $0x80] sm:$0xff] %vm2744_vm5, %v3682_v56  ;;  %v2808_v13 = vsel %vm2744_vm5, %v3682_v56, 0.0  ;;  %v2864_v5 = vmul.f32 %v3682_v56, %v3682_v56  ;;  %v3684_v28 = vadd.f32 %v2652_v41, %v1849_v38  ;;  %v3653_v57 = vpop.f32.mrb[20].mxu0 }
 0x204   : > { %v2809_v25 = vadd.f32 %v2808_v13, %v2807_v0  ;;  %2764 = vst.msk [vmem:[%s4937_s27 + $0x98] sm:$0xff] %vm2744_vm5, %v3683_v23  ;;  %v2665_v35 = vpop.f32.mrb[21].mxu0  ;;  %v2867_v50 = vmul.f32 %v3683_v23, %v3683_v23  ;;  %v2915_v61 = vsel %vm2744_vm5, %v2866_v14, 0.0  ;;  %v2814_v20 = vsel %vm2744_vm5, %v3683_v23, 0.0 }
 0x205   : > { %v2911_v7 = vsel %vm2744_vm5, %v2864_v5, 0.0  ;;  %2762 = vst.msk [vmem:[%s4937_s27 + $0x88] sm:$0xff] %vm2744_vm5, %v3684_v28  ;;  %v2810_v59 = vsel %vm2744_vm5, %v3684_v28, 0.0  ;;  %v2865_v3 = vmul.f32 %v3684_v28, %v3684_v28  ;;  %v3654_v27 = vpop.f32.mrb[22].mxu0 }
 0x206   : > { %v2912_v46 = vadd.f32 %v2911_v7, %v2910_v31  ;;  %v2811_v47 = vadd.f32 %v2810_v59, %v2809_v25  ;;  %v2668_v37 = vpop.f32.mrb[23].mxu0  ;;  %v2917_v17 = vsel %vm2744_vm5, %v2867_v50, 0.0 }
 0x207   : > { %v2913_v15 = vsel %vm2744_vm5, %v2865_v3, 0.0  ;;  %v3517_v55 = vpop.f32.mrb[20].mxu1 }
 0x208   : > { %v2813_v34 = vadd.f32 %v2812_v8, %v2811_v47  ;;  %v2914_v39 = vadd.f32 %v2913_v15, %v2912_v46  ;;  %v1862_v63 = vpop.f32.mrb[21].mxu1  ;;  %v3685_v60 = vadd.f32 %v3653_v57, %v3517_v55 }
 0x209   : > { %v3518_v9 = vpop.f32.mrb[22].mxu1  ;;  %v3686_v58 = vadd.f32 %v2665_v35, %v1862_v63 }
 0x20a   : > { %v2916_v51 = vadd.f32 %v2915_v61, %v2914_v39  ;;  %2767 = vst.msk [vmem:[%s4937_s27 + $0xb0] sm:$0xff] %vm2744_vm5, %v3685_v60  ;;  %v2815_v19 = vadd.f32 %v2814_v20, %v2813_v34  ;;  %v1865_v52 = vpop.f32.mrb[23].mxu1  ;;  %v3687_v21 = vadd.f32 %v3654_v27, %v3518_v9  ;;  %v2870_v44 = vmul.f32 %v3685_v60, %v3685_v60 }
 0x20b   : > { %2765 = vst.msk [vmem:[%s4937_s27 + $0xa0] sm:$0xff] %vm2744_vm5, %v3686_v58  ;;  %v2816_v4 = vsel %vm2744_vm5, %v3686_v58, 0.0  ;;  %v2868_v18 = vmul.f32 %v3686_v58, %v3686_v58  ;;  %v3688_v45 = vadd.f32 %v2668_v37, %v1865_v52  ;;  %v3657_v49 = vpop.f32.mrb[24].mxu0  ;;  %v2820_v10 = vsel %vm2744_vm5, %v3685_v60, 0.0 }
 0x20c   : > { %v2817_v29 = vadd.f32 %v2816_v4, %v2815_v19  ;;  %v2918_v43 = vadd.f32 %v2917_v17, %v2916_v51  ;;  %v2681_v22 = vpop.f32.mrb[25].mxu0  ;;  %2768 = vst.msk [vmem:[%s4937_s27 + $0xb8] sm:$0xff] %vm2744_vm5, %v3687_v21  ;;  %v2871_v11 = vmul.f32 %v3687_v21, %v3687_v21  ;;  %v2822_v41 = vsel %vm2744_vm5, %v3687_v21, 0.0 }
 0x20d   : > { %v2919_v16 = vsel %vm2744_vm5, %v2868_v18, 0.0  ;;  %2766 = vst.msk [vmem:[%s4937_s27 + $0xa8] sm:$0xff] %vm2744_vm5, %v3688_v45  ;;  %v2818_v53 = vsel %vm2744_vm5, %v3688_v45, 0.0  ;;  %v3658_v6 = vpop.f32.mrb[26].mxu0  ;;  %v2869_v54 = vmul.f32 %v3688_v45, %v3688_v45  ;;  %v2923_v48 = vsel %vm2744_vm5, %v2870_v44, 0.0 }
 0x20e   : > { %v2920_v30 = vadd.f32 %v2919_v16, %v2918_v43  ;;  %v2819_v40 = vadd.f32 %v2818_v53, %v2817_v29  ;;  %v2684_v1 = vpop.f32.mrb[27].mxu0  ;;  %v2925_v28 = vsel %vm2744_vm5, %v2871_v11, 0.0 }
 0x20f   : > { %v3521_v62 = vpop.f32.mrb[24].mxu1  ;;  %v2921_v36 = vsel %vm2744_vm5, %v2869_v54, 0.0 }
 0x210   : > { %v2821_v12 = vadd.f32 %v2820_v10, %v2819_v40  ;;  %v1878_v26 = vpop.f32.mrb[25].mxu1  ;;  %v3689_v0 = vadd.f32 %v3657_v49, %v3521_v62  ;;  %v2922_v2 = vadd.f32 %v2921_v36, %v2920_v30 }
 0x211   : > { %v3522_v24 = vpop.f32.mrb[26].mxu1  ;;  %v3690_v32 = vadd.f32 %v2681_v22, %v1878_v26 }
 0x212   : > { %2771 = vst.msk [vmem:[%s4937_s27 + $0xd0] sm:$0xff] %vm2744_vm5, %v3689_v0  ;;  %v2823_v42 = vadd.f32 %v2822_v41, %v2821_v12  ;;  %v1881_v33 = vpop.f32.mrb[27].mxu1  ;;  %v3691_v56 = vadd.f32 %v3658_v6, %v3522_v24  ;;  %v2924_v31 = vadd.f32 %v2923_v48, %v2922_v2  ;;  %v2874_v27 = vmul.f32 %v3689_v0, %v3689_v0 }
 0x213   : > { %2769 = vst.msk [vmem:[%s4937_s27 + $0xc0] sm:$0xff] %vm2744_vm5, %v3690_v32  ;;  %v2824_v38 = vsel %vm2744_vm5, %v3690_v32, 0.0  ;;  %v2872_v23 = vmul.f32 %v3690_v32, %v3690_v32  ;;  %v3692_v13 = vadd.f32 %v2684_v1, %v1881_v33  ;;  %v3661_v5 = vpop.f32.mrb[28].mxu0  ;;  %v2828_v47 = vsel %vm2744_vm5, %v3689_v0, 0.0 }
 0x214   : > { %v2825_v57 = vadd.f32 %v2824_v38, %v2823_v42  ;;  %2772 = vst.msk [vmem:[%s4937_s27 + $0xd8] sm:$0xff] %vm2744_vm5, %v3691_v56  ;;  %v2697_v25 = vpop.f32.mrb[29].mxu0  ;;  %v2926_v35 = vadd.f32 %v2925_v28, %v2924_v31  ;;  %v2875_v55 = vmul.f32 %v3691_v56, %v3691_v56  ;;  %v2830_v60 = vsel %vm2744_vm5, %v3691_v56, 0.0 }
 0x215   : > { %v2927_v14 = vsel %vm2744_vm5, %v2872_v23, 0.0  ;;  %2770 = vst.msk [vmem:[%s4937_s27 + $0xc8] sm:$0xff] %vm2744_vm5, %v3692_v13  ;;  %v2826_v7 = vsel %vm2744_vm5, %v3692_v13, 0.0  ;;  %v2873_v59 = vmul.f32 %v3692_v13, %v3692_v13  ;;  %v3662_v3 = vpop.f32.mrb[30].mxu0  ;;  %v2931_v58 = vsel %vm2744_vm5, %v2874_v27, 0.0 }
 0x216   : > { %v2827_v46 = vadd.f32 %v2826_v7, %v2825_v57  ;;  %v2700_v50 = vpop.f32.mrb[31].mxu0  ;;  %v2928_v37 = vadd.f32 %v2927_v14, %v2926_v35  ;;  %v2933_v45 = vsel %vm2744_vm5, %v2875_v55, 0.0 }
 0x217   : > { %v2929_v8 = vsel %vm2744_vm5, %v2873_v59, 0.0  ;;  %v3525_v15 = vpop.f32.mrb[28].mxu1 }
 0x218   : > { %v2829_v34 = vadd.f32 %v2828_v47, %v2827_v46  ;;  %v1894_v39 = vpop.f32.mrb[29].mxu1  ;;  %v3693_v63 = vadd.f32 %v3661_v5, %v3525_v15  ;;  %v2930_v61 = vadd.f32 %v2929_v8, %v2928_v37 }
 0x219   : > { %v3526_v20 = vpop.f32.mrb[30].mxu1  ;;  %v3694_v9 = vadd.f32 %v2697_v25, %v1894_v39 }
 0x21a   : > { %2775 = vst.msk [vmem:[%s4937_s27 + $0xf0] sm:$0xff] %vm2744_vm5, %v3693_v63  ;;  %v2831_v17 = vadd.f32 %v2830_v60, %v2829_v34  ;;  %v1897_v51 = vpop.f32.mrb[31].mxu1  ;;  %v3695_v19 = vadd.f32 %v3662_v3, %v3526_v20  ;;  %v2932_v52 = vadd.f32 %v2931_v58, %v2930_v61  ;;  %v2878_v53 = vmul.f32 %v3693_v63, %v3693_v63 }
 0x21b   : > { %2773 = vst.msk [vmem:[%s4937_s27 + $0xe0] sm:$0xff] %vm2744_vm5, %v3694_v9  ;;  %v2832_v4 = vsel %vm2744_vm5, %v3694_v9, 0.0  ;;  %v2876_v18 = vmul.f32 %v3694_v9, %v3694_v9  ;;  %v3696_v21 = vadd.f32 %v2700_v50, %v1897_v51  ;;  %v2836_v44 = vsel %vm2744_vm5, %v3693_v63, 0.0 }
 0x21c   : > { %v2833_v49 = vadd.f32 %v2832_v4, %v2831_v17  ;;  %2776 = vst.msk [vmem:[%s4937_s27 + $0xf8] sm:$0xff] %vm2744_vm5, %v3695_v19  ;;  %v2934_v29 = vadd.f32 %v2933_v45, %v2932_v52  ;;  %v2879_v54 = vmul.f32 %v3695_v19, %v3695_v19  ;;  %v2838_v10 = vsel %vm2744_vm5, %v3695_v19, 0.0 }
 0x21d   : > { %v2935_v43 = vsel %vm2744_vm5, %v2876_v18, 0.0  ;;  %2774 = vst.msk [vmem:[%s4937_s27 + $0xe8] sm:$0xff] %vm2744_vm5, %v3696_v21  ;;  %v2834_v22 = vsel %vm2744_vm5, %v3696_v21, 0.0  ;;  %v2877_v16 = vmul.f32 %v3696_v21, %v3696_v21  ;;  %v2939_v11 = vsel %vm2744_vm5, %v2878_v53, 0.0 }
 0x21e   : > { %v2835_v6 = vadd.f32 %v2834_v22, %v2833_v49  ;;  %v2936_v30 = vadd.f32 %v2935_v43, %v2934_v29  ;;  %v2941_v26 = vsel %vm2744_vm5, %v2879_v54, 0.0 }
 0x21f   : > { %v2937_v40 = vsel %vm2744_vm5, %v2877_v16, 0.0 }
 0x220   : > { %v2837_v1 = vadd.f32 %v2836_v44, %v2835_v6  ;;  %v2938_v62 = vadd.f32 %v2937_v40, %v2936_v30 }
 0x222   : > { %v2839_v12 = vadd.f32 %v2838_v10, %v2837_v1  ;;  %v2940_v36 = vadd.f32 %v2939_v11, %v2938_v62 }
 0x224   : > { %v2840_v0 = vrot.slane %v2839_v12, 4  ;;  %v2942_v41 = vadd.f32 %v2941_v26, %v2940_v36 }
 0x226   : > { %v2841_v2 = vadd.f32 %v2840_v0, %v2839_v12  ;;  %v2943_v24 = vrot.slane %v2942_v41, 4 }
 0x228   : > { %v2842_v32 = vrot.slane %v2841_v2, 2  ;;  %v2944_v48 = vadd.f32 %v2943_v24, %v2942_v41 }
 0x22a   : > { %v2843_v42 = vadd.f32 %v2842_v32, %v2841_v2  ;;  %v2945_v33 = vrot.slane %v2944_v48, 2 }
 0x22c   : > { %v2844_v56 = vrot.slane %v2843_v42, 1  ;;  %v2946_v31 = vadd.f32 %v2945_v33, %v2944_v48 }
 0x22e   : > { %v2845_v38 = vadd.f32 %v2844_v56, %v2843_v42  ;;  %v2947_v23 = vrot.slane %v2946_v31, 1 }
 0x230   : > { %2847 = vst.msk [vmem:[%s235_s6] sm:$0x1] %vm2846_vm6, %v2845_v38  ;;  %v2948_v13 = vadd.f32 %v2947_v23, %v2946_v31 }
 0x232   : > { %2949 = vst.msk [vmem:[%s235_s6 + $0x1] sm:$0x1] %vm2846_vm6, %v2948_v13 }
 0x233 PF: > { %s16_s18 = sadd.s32 1, %s3947_s18  }
 0x234   : > { %p13_p4 = scmp.ge.s32.totalorder %s16_s18, 4  }
 0x236   :  { %15 = sbr.rel (!%p13_p4) target bundleno = 1 (0x1), region = 86 }

</bundles_post_ra>
